<compile_context>
chip_gen: v5e
topology: v5e:2x2
jax: 0.10.0
libtpu: 0.0.40
codegen_flags: <defaults>
</compile_context>

<pallas_src>
import functools
import math

import jax
import jax.numpy as jnp
from jax.experimental import pallas as pl
from jax.experimental.pallas import tpu as pltpu

# ---- scaled-down ViT config ------------------------------------------------
PATCH = 16
IMG = 64                       # 4x4 = 16 patches per image
EMBED = 128                    # lane-dense embed dim
HEADS = 2
HEAD_DIM = EMBED // HEADS      # 64
MLP_HIDDEN = 4 * EMBED         # 512
DEPTH = 2
NUM_CLASSES = 18
HEAD_PAD = 128                 # head output padded to full lane width
LN_EPS = 1e-6

N_PATCH = (IMG // PATCH) ** 2  # 16
SEQ = N_PATCH + 1              # 17 (cls + patches)
SEQ_PAD = 32                   # sublane-aligned padded sequence length
ATTN_SCALE = 1.0 / math.sqrt(HEAD_DIM)


# --------------------------------------------------------------------------
# In-kernel helpers
# --------------------------------------------------------------------------
def _layernorm(x, g, b):
    mu = jnp.mean(x, axis=-1, keepdims=True)
    var = jnp.mean(jnp.square(x - mu), axis=-1, keepdims=True)
    return (x - mu) * jax.lax.rsqrt(var + LN_EPS) * g + b


def _attention(qkv, n_batch):
    """Multi-head self-attention reading directly from the fused QKV buffer.

    qkv: (n_batch*SEQ_PAD, 3*EMBED) f32.  Returns (n_batch*SEQ_PAD, EMBED) f32
    with heads concatenated lane-dense.  Padded key tokens are masked.
    """
    outs = []
    for b in range(n_batch):
        rows = qkv[b * SEQ_PAD:(b + 1) * SEQ_PAD]          # (SEQ_PAD, 3D)
        heads = []
        for h in range(HEADS):
            q = rows[:, h * HEAD_DIM:(h + 1) * HEAD_DIM].astype(jnp.bfloat16)
            k = rows[:, EMBED + h * HEAD_DIM:
                        EMBED + (h + 1) * HEAD_DIM].astype(jnp.bfloat16)
            v = rows[:, 2 * EMBED + h * HEAD_DIM:
                        2 * EMBED + (h + 1) * HEAD_DIM].astype(jnp.bfloat16)
            s = jax.lax.dot_general(q, k, (((1,), (1,)), ((), ())),
                                    preferred_element_type=jnp.float32)
            s = s * ATTN_SCALE
            key_idx = jax.lax.broadcasted_iota(jnp.int32, s.shape, 1)
            s = jnp.where(key_idx < SEQ, s, -1e30)
            m = jnp.max(s, axis=-1, keepdims=True)
            p = jnp.exp(s - m)
            p = p / jnp.sum(p, axis=-1, keepdims=True)       # exact softmax
            heads.append(jnp.dot(p.astype(jnp.bfloat16), v,
                                 preferred_element_type=jnp.float32))
        outs.append(jnp.concatenate(heads, axis=-1))          # (SEQ_PAD, D)
    return jnp.concatenate(outs, axis=0)                      # (M, D)


# --------------------------------------------------------------------------
# Pallas kernels
# --------------------------------------------------------------------------
def _patch_embed_kernel(x_ref, w_ref, b_ref, o_ref):
    """[M, P*P*3] @ [P*P*3, D] + bias, single full-block matmul."""
    o_ref[...] = jnp.dot(x_ref[...].astype(jnp.bfloat16), w_ref[...],
                         preferred_element_type=jnp.float32) + b_ref[...]


def _block_kernel(x_ref, ln1g_ref, ln1b_ref, qkvw_ref, qkvb_ref,
                  projw_ref, projb_ref, ln2g_ref, ln2b_ref,
                  fc1w_ref, fc1b_ref, fc2w_ref, fc2b_ref, o_ref, *, n_batch):
    """One full transformer block per grid step; activations stay resident in
    the output VMEM block across the whole depth grid."""
    @pl.when(pl.program_id(0) == 0)
    def _():
        o_ref[...] = x_ref[...]

    x = o_ref[...]                                           # resident f32 stream

    # LayerNorm -> fused QKV projection
    xn = _layernorm(x, ln1g_ref[...], ln1b_ref[...])
    qkv = jnp.dot(xn.astype(jnp.bfloat16), qkvw_ref[...],
                  preferred_element_type=jnp.float32) + qkvb_ref[...]

    # multi-head self-attention (lane-dense output), proj + residual
    ao = _attention(qkv, n_batch)
    x = x + jnp.dot(ao.astype(jnp.bfloat16), projw_ref[...],
                    preferred_element_type=jnp.float32) + projb_ref[...]

    # LayerNorm -> MLP fc1 + GELU, fc2 + residual
    xn = _layernorm(x, ln2g_ref[...], ln2b_ref[...])
    h = jnp.dot(xn.astype(jnp.bfloat16), fc1w_ref[...],
                preferred_element_type=jnp.float32) + fc1b_ref[...]
    h = jax.nn.gelu(h, approximate=True)
    x = x + jnp.dot(h.astype(jnp.bfloat16), fc2w_ref[...],
                    preferred_element_type=jnp.float32) + fc2b_ref[...]

    o_ref[...] = x


def _head_kernel(x_ref, g_ref, bb_ref, w_ref, b_ref, o_ref):
    """Final LayerNorm + classifier Linear on the cls rows (lane-padded)."""
    xn = _layernorm(x_ref[...], g_ref[...], bb_ref[...])
    o_ref[...] = jnp.dot(xn.astype(jnp.bfloat16), w_ref[...],
                         preferred_element_type=jnp.float32) + b_ref[...]


# --------------------------------------------------------------------------
# pallas_call wrappers
# --------------------------------------------------------------------------
def patch_embed(patches, w_bf16, b):
    M, K = patches.shape
    Nout = w_bf16.shape[1]
    return pl.pallas_call(
        _patch_embed_kernel,
        out_shape=jax.ShapeDtypeStruct((M, Nout), jnp.float32),
        grid=(1,),
        in_specs=[
            pl.BlockSpec((M, K), lambda i: (0, 0)),
            pl.BlockSpec((K, Nout), lambda i: (0, 0)),
            pl.BlockSpec((1, Nout), lambda i: (0, 0)),
        ],
        out_specs=pl.BlockSpec((M, Nout), lambda i: (0, 0)),
    )(patches, w_bf16, b.reshape(1, Nout))


def transformer_blocks(xrows, p):
    M, D = xrows.shape
    Hm = MLP_HIDDEN
    n_batch = M // SEQ_PAD
    per_block = lambda d: (d, 0, 0)  # noqa: E731
    return pl.pallas_call(
        functools.partial(_block_kernel, n_batch=n_batch),
        out_shape=jax.ShapeDtypeStruct((M, D), jnp.float32),
        grid=(DEPTH,),
        in_specs=[
            pl.BlockSpec((M, D), lambda d: (0, 0)),              # x0 (read at d==0)
            pl.BlockSpec((None, 1, D), per_block),               # ln1_g
            pl.BlockSpec((None, 1, D), per_block),               # ln1_b
            pl.BlockSpec((None, D, 3 * D), per_block),           # qkv_w
            pl.BlockSpec((None, 1, 3 * D), per_block),           # qkv_b
            pl.BlockSpec((None, D, D), per_block),               # proj_w
            pl.BlockSpec((None, 1, D), per_block),               # proj_b
            pl.BlockSpec((None, 1, D), per_block),               # ln2_g
            pl.BlockSpec((None, 1, D), per_block),               # ln2_b
            pl.BlockSpec((None, D, Hm), per_block),              # fc1_w
            pl.BlockSpec((None, 1, Hm), per_block),              # fc1_b
            pl.BlockSpec((None, Hm, D), per_block),              # fc2_w
            pl.BlockSpec((None, 1, D), per_block),               # fc2_b
        ],
        out_specs=pl.BlockSpec((M, D), lambda d: (0, 0)),        # resident stream
        compiler_params=pltpu.CompilerParams(
            dimension_semantics=("arbitrary",)),
    )(xrows,
      p["blk_ln1_g"], p["blk_ln1_b"], p["blk_qkv_w"], p["blk_qkv_b"],
      p["blk_proj_w"], p["blk_proj_b"], p["blk_ln2_g"], p["blk_ln2_b"],
      p["blk_fc1_w"], p["blk_fc1_b"], p["blk_fc2_w"], p["blk_fc2_b"])


def head_fc(cls_rows, g, bb, w_pad_bf16, b_pad):
    N, D = cls_rows.shape
    Nout = w_pad_bf16.shape[1]
    return pl.pallas_call(
        _head_kernel,
        out_shape=jax.ShapeDtypeStruct((N, Nout), jnp.float32),
        grid=(1,),
        in_specs=[
            pl.BlockSpec((N, D), lambda i: (0, 0)),
            pl.BlockSpec((1, D), lambda i: (0, 0)),
            pl.BlockSpec((1, D), lambda i: (0, 0)),
            pl.BlockSpec((D, Nout), lambda i: (0, 0)),
            pl.BlockSpec((1, Nout), lambda i: (0, 0)),
        ],
        out_specs=pl.BlockSpec((N, Nout), lambda i: (0, 0)),
    )(cls_rows, g.reshape(1, D), bb.reshape(1, D), w_pad_bf16,
      b_pad.reshape(1, Nout))


# --------------------------------------------------------------------------
# Parameters & forward
# --------------------------------------------------------------------------
def init_params(key):
    D, Hm = EMBED, MLP_HIDDEN
    ks = iter(jax.random.split(key, 16))

    def nrm(shape, scale=0.02):
        return jax.random.normal(next(ks), shape, jnp.float32) * scale

    p = {
        # weights stored in bf16 once (MXU operand dtype), biases/LN in f32
        "patch_w": nrm((PATCH * PATCH * 3, D)).astype(jnp.bfloat16),
        "patch_b": jnp.zeros((D,), jnp.float32),
        "cls": nrm((1, 1, D)),
        "pos": nrm((1, SEQ, D)),
        "ln_f_g": jnp.ones((D,), jnp.float32),
        "ln_f_b": jnp.zeros((D,), jnp.float32),
        # per-depth block parameters stacked along axis 0 for the depth grid
        "blk_ln1_g": jnp.ones((DEPTH, 1, D), jnp.float32),
        "blk_ln1_b": jnp.zeros((DEPTH, 1, D), jnp.float32),
        "blk_qkv_w": nrm((DEPTH, D, 3 * D)).astype(jnp.bfloat16),
        "blk_qkv_b": jnp.zeros((DEPTH, 1, 3 * D), jnp.float32),
        "blk_proj_w": nrm((DEPTH, D, D)).astype(jnp.bfloat16),
        "blk_proj_b": jnp.zeros((DEPTH, 1, D), jnp.float32),
        "blk_ln2_g": jnp.ones((DEPTH, 1, D), jnp.float32),
        "blk_ln2_b": jnp.zeros((DEPTH, 1, D), jnp.float32),
        "blk_fc1_w": nrm((DEPTH, D, Hm)).astype(jnp.bfloat16),
        "blk_fc1_b": jnp.zeros((DEPTH, 1, Hm), jnp.float32),
        "blk_fc2_w": nrm((DEPTH, Hm, D)).astype(jnp.bfloat16),
        "blk_fc2_b": jnp.zeros((DEPTH, 1, D), jnp.float32),
    }

    # replaced head (as in __init__): xavier_uniform weight, uniform(-stdv,stdv)
    # bias; padded from 18 to 128 output lanes (sliced back after the kernel)
    limit = math.sqrt(6.0 / (D + NUM_CLASSES))
    w = jax.random.uniform(next(ks), (D, NUM_CLASSES), jnp.float32,
                           minval=-limit, maxval=limit)
    stdv = 1.0 / math.sqrt(NUM_CLASSES)
    b = jax.random.uniform(next(ks), (NUM_CLASSES,), jnp.float32,
                           minval=-stdv, maxval=stdv)
    p["head_w"] = jnp.pad(
        w, ((0, 0), (0, HEAD_PAD - NUM_CLASSES))).astype(jnp.bfloat16)
    p["head_b"] = jnp.pad(b, (0, HEAD_PAD - NUM_CLASSES))
    return p


def forward(params, x_nchw):
    N = x_nchw.shape[0]
    D = EMBED
    n_side = IMG // PATCH
    assert IMG % PATCH == 0

    # NCHW (PyTorch) -> NHWC; extract non-overlapping 16x16 patches (JAX glue)
    x = jnp.transpose(x_nchw, (0, 2, 3, 1)).astype(jnp.float32)
    patches = x.reshape(N, n_side, PATCH, n_side, PATCH, 3)
    patches = patches.transpose(0, 1, 3, 2, 4, 5).reshape(
        N * N_PATCH, PATCH * PATCH * 3)

    # patch embedding (single full-block matmul kernel)
    tok = patch_embed(patches, params["patch_w"], params["patch_b"])
    tok = tok.reshape(N, N_PATCH, D)

    # cls token + positional embedding; pad sequence to sublane-aligned length
    cls = jnp.broadcast_to(params["cls"], (N, 1, D))
    tok = jnp.concatenate([cls, tok], axis=1) + params["pos"]      # (N, SEQ, D)
    tok = jnp.pad(tok, ((0, 0), (0, SEQ_PAD - SEQ), (0, 0)))       # (N, SEQ_PAD, D)
    xrows = tok.reshape(N * SEQ_PAD, D)

    # all transformer blocks in one pallas_call; activations resident in VMEM
    xrows = transformer_blocks(xrows, params)

    # final LayerNorm + classifier head on the cls token (lane-padded classes)
    cls_rows = xrows.reshape(N, SEQ_PAD, D)[:, 0, :]
    logits_pad = head_fc(cls_rows, params["ln_f_g"], params["ln_f_b"],
                         params["head_w"], params["head_b"])
    return logits_pad[:, :NUM_CLASSES]


if __name__ == "__main__":
    key = jax.random.PRNGKey(0)
    pkey, xkey = jax.random.split(key)
    params = init_params(pkey)
    x = jax.random.normal(xkey, (2, 3, IMG, IMG), jnp.float32)   # NCHW like PyTorch

    logits = jax.jit(forward)(params, x)
    logits = jax.block_until_ready(logits)
    assert logits.shape == (2, NUM_CLASSES), logits.shape
    assert bool(jnp.all(jnp.isfinite(logits)))
    print("KERNEL_OK")
</pallas_src>

<mosaic_0001>
module attributes {stable_mosaic.version = 11 : i64} {
  func.func @_patch_embed_kernel(%arg0: i32, %arg1: memref<32x768xf32, #tpu.memory_space<vmem>>, %arg2: memref<768x128xbf16, #tpu.memory_space<vmem>>, %arg3: memref<1x128xf32, #tpu.memory_space<vmem>>, %arg4: memref<32x128xf32, #tpu.memory_space<vmem>>) attributes {dimension_semantics = [#tpu.dimension_semantics<arbitrary>], iteration_bounds = array<i64: 1>, scalar_prefetch = 0 : i64, scratch_operands = 0 : i64, tpu.core_type = #tpu.core_type<tc>, window_params = [{pipeline_mode = #tpu.pipeline_mode<synchronous>, transform_indices = @transform_0, window_bounds = array<i64: 32, 768>}, {pipeline_mode = #tpu.pipeline_mode<synchronous>, transform_indices = @transform_1, window_bounds = array<i64: 768, 128>}, {pipeline_mode = #tpu.pipeline_mode<synchronous>, transform_indices = @transform_2, window_bounds = array<i64: 1, 128>}, {pipeline_mode = #tpu.pipeline_mode<synchronous>, transform_indices = @transform_3, window_bounds = array<i64: 32, 128>}]} {
    %c0 = arith.constant 0 : index
    %c0_0 = arith.constant 0 : index
    %0 = vector.load %arg1[%c0, %c0_0] : memref<32x768xf32, #tpu.memory_space<vmem>>, vector<32x768xf32>
    %1 = arith.truncf %0 : vector<32x768xf32> to vector<32x768xbf16>
    %c0_1 = arith.constant 0 : index
    %c0_2 = arith.constant 0 : index
    %2 = vector.load %arg2[%c0_1, %c0_2] : memref<768x128xbf16, #tpu.memory_space<vmem>>, vector<768x128xbf16>
    %cst = arith.constant dense<0.000000e+00> : vector<32x128xf32>
    %3 = tpu.matmul %1, %2, %cst {dimension_numbers = #tpu.dot_dimension_numbers<[1], [0], [0], [1], [0, 0, 1, 1], [], []>} : vector<32x768xbf16>, vector<768x128xbf16>, vector<32x128xf32> -> vector<32x128xf32>
    %c0_3 = arith.constant 0 : index
    %c0_4 = arith.constant 0 : index
    %4 = vector.load %arg3[%c0_3, %c0_4] : memref<1x128xf32, #tpu.memory_space<vmem>>, vector<1x128xf32>
    %5 = vector.broadcast %4 : vector<1x128xf32> to vector<32x128xf32>
    %6 = arith.addf %3, %5 : vector<32x128xf32>
    %c0_5 = arith.constant 0 : index
    %c0_6 = arith.constant 0 : index
    %7 = vector.load %arg4[%c0_5, %c0_6] : memref<32x128xf32, #tpu.memory_space<vmem>>, vector<32x128xf32>
    tpu.vector_store %arg4[%c0_5, %c0_6], %6 {strides = array<i32>} : memref<32x128xf32, #tpu.memory_space<vmem>>, vector<32x128xf32>,
    return
  }
  func.func @transform_0(%arg0: i32) -> (i32, i32) {
    %c0_i32 = arith.constant 0 : i32
    %c0_i32_0 = arith.constant 0 : i32
    %c0_i32_1 = arith.constant 0 : i32
    return %c0_i32, %c0_i32_0 : i32, i32
  }
  func.func @transform_1(%arg0: i32) -> (i32, i32) {
    %c0_i32 = arith.constant 0 : i32
    %c0_i32_0 = arith.constant 0 : i32
    %c0_i32_1 = arith.constant 0 : i32
    return %c0_i32, %c0_i32_0 : i32, i32
  }
  func.func @transform_2(%arg0: i32) -> (i32, i32) {
    %c0_i32 = arith.constant 0 : i32
    %c0_i32_0 = arith.constant 0 : i32
    %c0_i32_1 = arith.constant 0 : i32
    return %c0_i32, %c0_i32_0 : i32, i32
  }
  func.func @transform_3(%arg0: i32) -> (i32, i32) {
    %c0_i32 = arith.constant 0 : i32
    %c0_i32_0 = arith.constant 0 : i32
    %c0_i32_1 = arith.constant 0 : i32
    return %c0_i32, %c0_i32_0 : i32, i32
  }
}

module attributes {stable_mosaic.version = 11 : i64} {
  func.func @_head_kernel(%arg0: i32, %arg1: memref<2x128xf32, #tpu.memory_space<vmem>>, %arg2: memref<1x128xf32, #tpu.memory_space<vmem>>, %arg3: memref<1x128xf32, #tpu.memory_space<vmem>>, %arg4: memref<128x128xbf16, #tpu.memory_space<vmem>>, %arg5: memref<1x128xf32, #tpu.memory_space<vmem>>, %arg6: memref<2x128xf32, #tpu.memory_space<vmem>>) attributes {dimension_semantics = [#tpu.dimension_semantics<arbitrary>], iteration_bounds = array<i64: 1>, scalar_prefetch = 0 : i64, scratch_operands = 0 : i64, tpu.core_type = #tpu.core_type<tc>, window_params = [{pipeline_mode = #tpu.pipeline_mode<synchronous>, transform_indices = @transform_0, window_bounds = array<i64: 2, 128>}, {pipeline_mode = #tpu.pipeline_mode<synchronous>, transform_indices = @transform_1, window_bounds = array<i64: 1, 128>}, {pipeline_mode = #tpu.pipeline_mode<synchronous>, transform_indices = @transform_2, window_bounds = array<i64: 1, 128>}, {pipeline_mode = #tpu.pipeline_mode<synchronous>, transform_indices = @transform_3, window_bounds = array<i64: 128, 128>}, {pipeline_mode = #tpu.pipeline_mode<synchronous>, transform_indices = @transform_4, window_bounds = array<i64: 1, 128>}, {pipeline_mode = #tpu.pipeline_mode<synchronous>, transform_indices = @transform_5, window_bounds = array<i64: 2, 128>}]} {
    %c0 = arith.constant 0 : index
    %c0_0 = arith.constant 0 : index
    %0 = vector.load %arg1[%c0, %c0_0] : memref<2x128xf32, #tpu.memory_space<vmem>>, vector<2x128xf32>
    %c0_1 = arith.constant 0 : index
    %c0_2 = arith.constant 0 : index
    %1 = vector.load %arg2[%c0_1, %c0_2] : memref<1x128xf32, #tpu.memory_space<vmem>>, vector<1x128xf32>
    %c0_3 = arith.constant 0 : index
    %c0_4 = arith.constant 0 : index
    %2 = vector.load %arg3[%c0_3, %c0_4] : memref<1x128xf32, #tpu.memory_space<vmem>>, vector<1x128xf32>
    %cst = arith.constant dense<0.000000e+00> : vector<2xf32>
    %3 = vector.multi_reduction <add>, %0, %cst [1] : vector<2x128xf32> to vector<2xf32>
    %4 = vector.shape_cast %3 : vector<2xf32> to vector<2x1xf32>
    %cst_5 = arith.constant 1.280000e+02 : f32
    %5 = vector.broadcast %cst_5 : f32 to vector<2x1xf32>
    %6 = arith.divf %4, %5 : vector<2x1xf32>
    %7 = vector.broadcast %6 : vector<2x1xf32> to vector<2x128xf32>
    %8 = arith.subf %0, %7 : vector<2x128xf32>
    %9 = arith.mulf %8, %8 : vector<2x128xf32>
    %cst_6 = arith.constant dense<0.000000e+00> : vector<2xf32>
    %10 = vector.multi_reduction <add>, %9, %cst_6 [1] : vector<2x128xf32> to vector<2xf32>
    %11 = vector.shape_cast %10 : vector<2xf32> to vector<2x1xf32>
    %cst_7 = arith.constant 1.280000e+02 : f32
    %12 = vector.broadcast %cst_7 : f32 to vector<2x1xf32>
    %13 = arith.divf %11, %12 : vector<2x1xf32>
    %14 = vector.broadcast %6 : vector<2x1xf32> to vector<2x128xf32>
    %15 = arith.subf %0, %14 : vector<2x128xf32>
    %cst_8 = arith.constant 9.99999997E-7 : f32
    %16 = vector.broadcast %cst_8 : f32 to vector<2x1xf32>
    %17 = arith.addf %13, %16 : vector<2x1xf32>
    %18 = math.rsqrt %17 : vector<2x1xf32>
    %19 = vector.broadcast %18 : vector<2x1xf32> to vector<2x128xf32>
    %20 = arith.mulf %15, %19 : vector<2x128xf32>
    %21 = vector.broadcast %1 : vector<1x128xf32> to vector<2x128xf32>
    %22 = arith.mulf %20, %21 : vector<2x128xf32>
    %23 = vector.broadcast %2 : vector<1x128xf32> to vector<2x128xf32>
    %24 = arith.addf %22, %23 : vector<2x128xf32>
    %25 = arith.truncf %24 : vector<2x128xf32> to vector<2x128xbf16>
    %c0_9 = arith.constant 0 : index
    %c0_10 = arith.constant 0 : index
    %26 = vector.load %arg4[%c0_9, %c0_10] : memref<128x128xbf16, #tpu.memory_space<vmem>>, vector<128x128xbf16>
    %cst_11 = arith.constant dense<0.000000e+00> : vector<2x128xf32>
    %27 = tpu.matmul %25, %26, %cst_11 {dimension_numbers = #tpu.dot_dimension_numbers<[1], [0], [0], [1], [0, 0, 1, 1], [], []>} : vector<2x128xbf16>, vector<128x128xbf16>, vector<2x128xf32> -> vector<2x128xf32>
    %c0_12 = arith.constant 0 : index
    %c0_13 = arith.constant 0 : index
    %28 = vector.load %arg5[%c0_12, %c0_13] : memref<1x128xf32, #tpu.memory_space<vmem>>, vector<1x128xf32>
    %29 = vector.broadcast %28 : vector<1x128xf32> to vector<2x128xf32>
    %30 = arith.addf %27, %29 : vector<2x128xf32>
    %c0_14 = arith.constant 0 : index
    %c0_15 = arith.constant 0 : index
    %31 = vector.load %arg6[%c0_14, %c0_15] : memref<2x128xf32, #tpu.memory_space<vmem>>, vector<2x128xf32>
    tpu.vector_store %arg6[%c0_14, %c0_15], %30 {strides = array<i32>} : memref<2x128xf32, #tpu.memory_space<vmem>>, vector<2x128xf32>,
    return
  }
  func.func @transform_0(%arg0: i32) -> (i32, i32) {
    %c0_i32 = arith.constant 0 : i32
    %c0_i32_0 = arith.constant 0 : i32
    %c0_i32_1 = arith.constant 0 : i32
    return %c0_i32, %c0_i32_0 : i32, i32
  }
  func.func @transform_1(%arg0: i32) -> (i32, i32) {
    %c0_i32 = arith.constant 0 : i32
    %c0_i32_0 = arith.constant 0 : i32
    %c0_i32_1 = arith.constant 0 : i32
    return %c0_i32, %c0_i32_0 : i32, i32
  }
  func.func @transform_2(%arg0: i32) -> (i32, i32) {
    %c0_i32 = arith.constant 0 : i32
    %c0_i32_0 = arith.constant 0 : i32
    %c0_i32_1 = arith.constant 0 : i32
    return %c0_i32, %c0_i32_0 : i32, i32
  }
  func.func @transform_3(%arg0: i32) -> (i32, i32) {
    %c0_i32 = arith.constant 0 : i32
    %c0_i32_0 = arith.constant 0 : i32
    %c0_i32_1 = arith.constant 0 : i32
    return %c0_i32, %c0_i32_0 : i32, i32
  }
  func.func @transform_4(%arg0: i32) -> (i32, i32) {
    %c0_i32 = arith.constant 0 : i32
    %c0_i32_0 = arith.constant 0 : i32
    %c0_i32_1 = arith.constant 0 : i32
    return %c0_i32, %c0_i32_0 : i32, i32
  }
  func.func @transform_5(%arg0: i32) -> (i32, i32) {
    %c0_i32 = arith.constant 0 : i32
    %c0_i32_0 = arith.constant 0 : i32
    %c0_i32_1 = arith.constant 0 : i32
    return %c0_i32, %c0_i32_0 : i32, i32
  }
}

module attributes {stable_mosaic.version = 11 : i64} {
  func.func @_block_kernel(%arg0: i32, %arg1: memref<64x128xf32, #tpu.memory_space<vmem>>, %arg2: memref<1x1x128xf32, #tpu.memory_space<vmem>>, %arg3: memref<1x1x128xf32, #tpu.memory_space<vmem>>, %arg4: memref<1x128x384xbf16, #tpu.memory_space<vmem>>, %arg5: memref<1x1x384xf32, #tpu.memory_space<vmem>>, %arg6: memref<1x128x128xbf16, #tpu.memory_space<vmem>>, %arg7: memref<1x1x128xf32, #tpu.memory_space<vmem>>, %arg8: memref<1x1x128xf32, #tpu.memory_space<vmem>>, %arg9: memref<1x1x128xf32, #tpu.memory_space<vmem>>, %arg10: memref<1x128x512xbf16, #tpu.memory_space<vmem>>, %arg11: memref<1x1x512xf32, #tpu.memory_space<vmem>>, %arg12: memref<1x512x128xbf16, #tpu.memory_space<vmem>>, %arg13: memref<1x1x128xf32, #tpu.memory_space<vmem>>, %arg14: memref<64x128xf32, #tpu.memory_space<vmem>>) attributes {dimension_semantics = [#tpu.dimension_semantics<arbitrary>], iteration_bounds = array<i64: 2>, scalar_prefetch = 0 : i64, scratch_operands = 0 : i64, tpu.core_type = #tpu.core_type<tc>, window_params = [{pipeline_mode = #tpu.pipeline_mode<synchronous>, transform_indices = @transform_0, window_bounds = array<i64: 64, 128>}, {transform_indices = @transform_1, window_bounds = array<i64: 1, 1, 128>}, {transform_indices = @transform_2, window_bounds = array<i64: 1, 1, 128>}, {transform_indices = @transform_3, window_bounds = array<i64: 1, 128, 384>}, {transform_indices = @transform_4, window_bounds = array<i64: 1, 1, 384>}, {transform_indices = @transform_5, window_bounds = array<i64: 1, 128, 128>}, {transform_indices = @transform_6, window_bounds = array<i64: 1, 1, 128>}, {transform_indices = @transform_7, window_bounds = array<i64: 1, 1, 128>}, {transform_indices = @transform_8, window_bounds = array<i64: 1, 1, 128>}, {transform_indices = @transform_9, window_bounds = array<i64: 1, 128, 512>}, {transform_indices = @transform_10, window_bounds = array<i64: 1, 1, 512>}, {transform_indices = @transform_11, window_bounds = array<i64: 1, 512, 128>}, {transform_indices = @transform_12, window_bounds = array<i64: 1, 1, 128>}, {pipeline_mode = #tpu.pipeline_mode<synchronous>, transform_indices = @transform_13, window_bounds = array<i64: 64, 128>}]} {
    %c0_i32 = arith.constant 0 : i32
    %0 = arith.cmpi eq, %arg0, %c0_i32 : i32
    %1 = arith.extui %0 : i1 to i32
    %c0_i32_0 = arith.constant 0 : i32
    %2 = arith.cmpi ne, %1, %c0_i32_0 : i32
    scf.if %2 {
      %c0_84 = arith.constant 0 : index
      %c0_85 = arith.constant 0 : index
      %209 = vector.load %arg1[%c0_84, %c0_85] : memref<64x128xf32, #tpu.memory_space<vmem>>, vector<64x128xf32>
      %c0_86 = arith.constant 0 : index
      %c0_87 = arith.constant 0 : index
      %210 = vector.load %arg14[%c0_86, %c0_87] : memref<64x128xf32, #tpu.memory_space<vmem>>, vector<64x128xf32>
      tpu.vector_store %arg14[%c0_86, %c0_87], %209 {strides = array<i32>} : memref<64x128xf32, #tpu.memory_space<vmem>>, vector<64x128xf32>,
    } else {
    }
    %c0 = arith.constant 0 : index
    %c0_1 = arith.constant 0 : index
    %3 = vector.load %arg14[%c0, %c0_1] : memref<64x128xf32, #tpu.memory_space<vmem>>, vector<64x128xf32>
    %c0_2 = arith.constant 0 : index
    %c0_3 = arith.constant 0 : index
    %c0_4 = arith.constant 0 : index
    %4 = vector.load %arg2[%c0_2, %c0_3, %c0_4] : memref<1x1x128xf32, #tpu.memory_space<vmem>>, vector<1x1x128xf32>
    %5 = vector.shape_cast %4 : vector<1x1x128xf32> to vector<1x128xf32>
    %c0_5 = arith.constant 0 : index
    %c0_6 = arith.constant 0 : index
    %c0_7 = arith.constant 0 : index
    %6 = vector.load %arg3[%c0_5, %c0_6, %c0_7] : memref<1x1x128xf32, #tpu.memory_space<vmem>>, vector<1x1x128xf32>
    %7 = vector.shape_cast %6 : vector<1x1x128xf32> to vector<1x128xf32>
    %cst = arith.constant dense<0.000000e+00> : vector<64xf32>
    %8 = vector.multi_reduction <add>, %3, %cst [1] : vector<64x128xf32> to vector<64xf32>
    %9 = vector.shape_cast %8 : vector<64xf32> to vector<64x1xf32>
    %cst_8 = arith.constant 1.280000e+02 : f32
    %10 = vector.broadcast %cst_8 : f32 to vector<64x1xf32>
    %11 = arith.divf %9, %10 : vector<64x1xf32>
    %12 = vector.broadcast %11 : vector<64x1xf32> to vector<64x128xf32>
    %13 = arith.subf %3, %12 : vector<64x128xf32>
    %14 = arith.mulf %13, %13 : vector<64x128xf32>
    %cst_9 = arith.constant dense<0.000000e+00> : vector<64xf32>
    %15 = vector.multi_reduction <add>, %14, %cst_9 [1] : vector<64x128xf32> to vector<64xf32>
    %16 = vector.shape_cast %15 : vector<64xf32> to vector<64x1xf32>
    %cst_10 = arith.constant 1.280000e+02 : f32
    %17 = vector.broadcast %cst_10 : f32 to vector<64x1xf32>
    %18 = arith.divf %16, %17 : vector<64x1xf32>
    %19 = vector.broadcast %11 : vector<64x1xf32> to vector<64x128xf32>
    %20 = arith.subf %3, %19 : vector<64x128xf32>
    %cst_11 = arith.constant 9.99999997E-7 : f32
    %21 = vector.broadcast %cst_11 : f32 to vector<64x1xf32>
    %22 = arith.addf %18, %21 : vector<64x1xf32>
    %23 = math.rsqrt %22 : vector<64x1xf32>
    %24 = vector.broadcast %23 : vector<64x1xf32> to vector<64x128xf32>
    %25 = arith.mulf %20, %24 : vector<64x128xf32>
    %26 = vector.broadcast %5 : vector<1x128xf32> to vector<64x128xf32>
    %27 = arith.mulf %25, %26 : vector<64x128xf32>
    %28 = vector.broadcast %7 : vector<1x128xf32> to vector<64x128xf32>
    %29 = arith.addf %27, %28 : vector<64x128xf32>
    %30 = arith.truncf %29 : vector<64x128xf32> to vector<64x128xbf16>
    %c0_12 = arith.constant 0 : index
    %c0_13 = arith.constant 0 : index
    %c0_14 = arith.constant 0 : index
    %31 = vector.load %arg4[%c0_12, %c0_13, %c0_14] : memref<1x128x384xbf16, #tpu.memory_space<vmem>>, vector<1x128x384xbf16>
    %32 = vector.shape_cast %31 : vector<1x128x384xbf16> to vector<128x384xbf16>
    %cst_15 = arith.constant dense<0.000000e+00> : vector<64x384xf32>
    %33 = tpu.matmul %30, %32, %cst_15 {dimension_numbers = #tpu.dot_dimension_numbers<[1], [0], [0], [1], [0, 0, 1, 1], [], []>} : vector<64x128xbf16>, vector<128x384xbf16>, vector<64x384xf32> -> vector<64x384xf32>
    %c0_16 = arith.constant 0 : index
    %c0_17 = arith.constant 0 : index
    %c0_18 = arith.constant 0 : index
    %34 = vector.load %arg5[%c0_16, %c0_17, %c0_18] : memref<1x1x384xf32, #tpu.memory_space<vmem>>, vector<1x1x384xf32>
    %35 = vector.shape_cast %34 : vector<1x1x384xf32> to vector<1x384xf32>
    %36 = vector.broadcast %35 : vector<1x384xf32> to vector<64x384xf32>
    %37 = arith.addf %33, %36 : vector<64x384xf32>
    %38 = vector.extract_strided_slice %37 {offsets = [0, 0], sizes = [32, 384], strides = [1, 1]} : vector<64x384xf32> to vector<32x384xf32>
    %39 = vector.extract_strided_slice %38 {offsets = [0, 0], sizes = [32, 64], strides = [1, 1]} : vector<32x384xf32> to vector<32x64xf32>
    %40 = arith.truncf %39 : vector<32x64xf32> to vector<32x64xbf16>
    %41 = vector.extract_strided_slice %38 {offsets = [0, 128], sizes = [32, 64], strides = [1, 1]} : vector<32x384xf32> to vector<32x64xf32>
    %42 = arith.truncf %41 : vector<32x64xf32> to vector<32x64xbf16>
    %43 = vector.extract_strided_slice %38 {offsets = [0, 256], sizes = [32, 64], strides = [1, 1]} : vector<32x384xf32> to vector<32x64xf32>
    %44 = arith.truncf %43 : vector<32x64xf32> to vector<32x64xbf16>
    %cst_19 = arith.constant dense<0.000000e+00> : vector<32x32xf32>
    %45 = tpu.matmul %40, %42, %cst_19 {dimension_numbers = #tpu.dot_dimension_numbers<[1], [1], [0], [0], [0, 0, 1, 0], [], []>} : vector<32x64xbf16>, vector<32x64xbf16>, vector<32x32xf32> -> vector<32x32xf32>
    %cst_20 = arith.constant 1.250000e-01 : f32
    %46 = vector.broadcast %cst_20 : f32 to vector<32x32xf32>
    %47 = arith.mulf %45, %46 : vector<32x32xf32>
    %48 = tpu.iota {dimensions = array<i32: 1>} : vector<32x32xi32>
    %c17_i32 = arith.constant 17 : i32
    %49 = vector.broadcast %c17_i32 : i32 to vector<32x32xi32>
    %50 = arith.cmpi slt, %48, %49 : vector<32x32xi32>
    %cst_21 = arith.constant -1.000000e+30 : f32
    %51 = vector.broadcast %cst_21 : f32 to vector<32x32xf32>
    %52 = arith.select %50, %47, %51 : vector<32x32xi1>, vector<32x32xf32>
    %cst_22 = arith.constant dense<0xFF800000> : vector<32xf32>
    %53 = vector.multi_reduction <maximumf>, %52, %cst_22 [1] : vector<32x32xf32> to vector<32xf32>
    %54 = vector.shape_cast %53 : vector<32xf32> to vector<32x1xf32>
    %55 = vector.broadcast %54 : vector<32x1xf32> to vector<32x32xf32>
    %56 = arith.subf %52, %55 : vector<32x32xf32>
    %57 = math.exp %56 : vector<32x32xf32>
    %cst_23 = arith.constant dense<0.000000e+00> : vector<32xf32>
    %58 = vector.multi_reduction <add>, %57, %cst_23 [1] : vector<32x32xf32> to vector<32xf32>
    %59 = vector.shape_cast %58 : vector<32xf32> to vector<32x1xf32>
    %60 = vector.broadcast %59 : vector<32x1xf32> to vector<32x32xf32>
    %61 = arith.divf %57, %60 : vector<32x32xf32>
    %62 = arith.truncf %61 : vector<32x32xf32> to vector<32x32xbf16>
    %cst_24 = arith.constant dense<0.000000e+00> : vector<32x64xf32>
    %63 = tpu.matmul %62, %44, %cst_24 {dimension_numbers = #tpu.dot_dimension_numbers<[1], [0], [0], [1], [0, 0, 1, 1], [], []>} : vector<32x32xbf16>, vector<32x64xbf16>, vector<32x64xf32> -> vector<32x64xf32>
    %64 = vector.extract_strided_slice %38 {offsets = [0, 64], sizes = [32, 64], strides = [1, 1]} : vector<32x384xf32> to vector<32x64xf32>
    %65 = arith.truncf %64 : vector<32x64xf32> to vector<32x64xbf16>
    %66 = vector.extract_strided_slice %38 {offsets = [0, 192], sizes = [32, 64], strides = [1, 1]} : vector<32x384xf32> to vector<32x64xf32>
    %67 = arith.truncf %66 : vector<32x64xf32> to vector<32x64xbf16>
    %68 = vector.extract_strided_slice %38 {offsets = [0, 320], sizes = [32, 64], strides = [1, 1]} : vector<32x384xf32> to vector<32x64xf32>
    %69 = arith.truncf %68 : vector<32x64xf32> to vector<32x64xbf16>
    %cst_25 = arith.constant dense<0.000000e+00> : vector<32x32xf32>
    %70 = tpu.matmul %65, %67, %cst_25 {dimension_numbers = #tpu.dot_dimension_numbers<[1], [1], [0], [0], [0, 0, 1, 0], [], []>} : vector<32x64xbf16>, vector<32x64xbf16>, vector<32x32xf32> -> vector<32x32xf32>
    %cst_26 = arith.constant 1.250000e-01 : f32
    %71 = vector.broadcast %cst_26 : f32 to vector<32x32xf32>
    %72 = arith.mulf %70, %71 : vector<32x32xf32>
    %73 = tpu.iota {dimensions = array<i32: 1>} : vector<32x32xi32>
    %c17_i32_27 = arith.constant 17 : i32
    %74 = vector.broadcast %c17_i32_27 : i32 to vector<32x32xi32>
    %75 = arith.cmpi slt, %73, %74 : vector<32x32xi32>
    %cst_28 = arith.constant -1.000000e+30 : f32
    %76 = vector.broadcast %cst_28 : f32 to vector<32x32xf32>
    %77 = arith.select %75, %72, %76 : vector<32x32xi1>, vector<32x32xf32>
    %cst_29 = arith.constant dense<0xFF800000> : vector<32xf32>
    %78 = vector.multi_reduction <maximumf>, %77, %cst_29 [1] : vector<32x32xf32> to vector<32xf32>
    %79 = vector.shape_cast %78 : vector<32xf32> to vector<32x1xf32>
    %80 = vector.broadcast %79 : vector<32x1xf32> to vector<32x32xf32>
    %81 = arith.subf %77, %80 : vector<32x32xf32>
    %82 = math.exp %81 : vector<32x32xf32>
    %cst_30 = arith.constant dense<0.000000e+00> : vector<32xf32>
    %83 = vector.multi_reduction <add>, %82, %cst_30 [1] : vector<32x32xf32> to vector<32xf32>
    %84 = vector.shape_cast %83 : vector<32xf32> to vector<32x1xf32>
    %85 = vector.broadcast %84 : vector<32x1xf32> to vector<32x32xf32>
    %86 = arith.divf %82, %85 : vector<32x32xf32>
    %87 = arith.truncf %86 : vector<32x32xf32> to vector<32x32xbf16>
    %cst_31 = arith.constant dense<0.000000e+00> : vector<32x64xf32>
    %88 = tpu.matmul %87, %69, %cst_31 {dimension_numbers = #tpu.dot_dimension_numbers<[1], [0], [0], [1], [0, 0, 1, 1], [], []>} : vector<32x32xbf16>, vector<32x64xbf16>, vector<32x64xf32> -> vector<32x64xf32>
    %89 = tpu.concatenate %63, %88 in 1 : vector<32x64xf32>, vector<32x64xf32> -> vector<32x128xf32>
    %90 = vector.extract_strided_slice %37 {offsets = [32, 0], sizes = [32, 384], strides = [1, 1]} : vector<64x384xf32> to vector<32x384xf32>
    %91 = vector.extract_strided_slice %90 {offsets = [0, 0], sizes = [32, 64], strides = [1, 1]} : vector<32x384xf32> to vector<32x64xf32>
    %92 = arith.truncf %91 : vector<32x64xf32> to vector<32x64xbf16>
    %93 = vector.extract_strided_slice %90 {offsets = [0, 128], sizes = [32, 64], strides = [1, 1]} : vector<32x384xf32> to vector<32x64xf32>
    %94 = arith.truncf %93 : vector<32x64xf32> to vector<32x64xbf16>
    %95 = vector.extract_strided_slice %90 {offsets = [0, 256], sizes = [32, 64], strides = [1, 1]} : vector<32x384xf32> to vector<32x64xf32>
    %96 = arith.truncf %95 : vector<32x64xf32> to vector<32x64xbf16>
    %cst_32 = arith.constant dense<0.000000e+00> : vector<32x32xf32>
    %97 = tpu.matmul %92, %94, %cst_32 {dimension_numbers = #tpu.dot_dimension_numbers<[1], [1], [0], [0], [0, 0, 1, 0], [], []>} : vector<32x64xbf16>, vector<32x64xbf16>, vector<32x32xf32> -> vector<32x32xf32>
    %cst_33 = arith.constant 1.250000e-01 : f32
    %98 = vector.broadcast %cst_33 : f32 to vector<32x32xf32>
    %99 = arith.mulf %97, %98 : vector<32x32xf32>
    %100 = tpu.iota {dimensions = array<i32: 1>} : vector<32x32xi32>
    %c17_i32_34 = arith.constant 17 : i32
    %101 = vector.broadcast %c17_i32_34 : i32 to vector<32x32xi32>
    %102 = arith.cmpi slt, %100, %101 : vector<32x32xi32>
    %cst_35 = arith.constant -1.000000e+30 : f32
    %103 = vector.broadcast %cst_35 : f32 to vector<32x32xf32>
    %104 = arith.select %102, %99, %103 : vector<32x32xi1>, vector<32x32xf32>
    %cst_36 = arith.constant dense<0xFF800000> : vector<32xf32>
    %105 = vector.multi_reduction <maximumf>, %104, %cst_36 [1] : vector<32x32xf32> to vector<32xf32>
    %106 = vector.shape_cast %105 : vector<32xf32> to vector<32x1xf32>
    %107 = vector.broadcast %106 : vector<32x1xf32> to vector<32x32xf32>
    %108 = arith.subf %104, %107 : vector<32x32xf32>
    %109 = math.exp %108 : vector<32x32xf32>
    %cst_37 = arith.constant dense<0.000000e+00> : vector<32xf32>
    %110 = vector.multi_reduction <add>, %109, %cst_37 [1] : vector<32x32xf32> to vector<32xf32>
    %111 = vector.shape_cast %110 : vector<32xf32> to vector<32x1xf32>
    %112 = vector.broadcast %111 : vector<32x1xf32> to vector<32x32xf32>
    %113 = arith.divf %109, %112 : vector<32x32xf32>
    %114 = arith.truncf %113 : vector<32x32xf32> to vector<32x32xbf16>
    %cst_38 = arith.constant dense<0.000000e+00> : vector<32x64xf32>
    %115 = tpu.matmul %114, %96, %cst_38 {dimension_numbers = #tpu.dot_dimension_numbers<[1], [0], [0], [1], [0, 0, 1, 1], [], []>} : vector<32x32xbf16>, vector<32x64xbf16>, vector<32x64xf32> -> vector<32x64xf32>
    %116 = vector.extract_strided_slice %90 {offsets = [0, 64], sizes = [32, 64], strides = [1, 1]} : vector<32x384xf32> to vector<32x64xf32>
    %117 = arith.truncf %116 : vector<32x64xf32> to vector<32x64xbf16>
    %118 = vector.extract_strided_slice %90 {offsets = [0, 192], sizes = [32, 64], strides = [1, 1]} : vector<32x384xf32> to vector<32x64xf32>
    %119 = arith.truncf %118 : vector<32x64xf32> to vector<32x64xbf16>
    %120 = vector.extract_strided_slice %90 {offsets = [0, 320], sizes = [32, 64], strides = [1, 1]} : vector<32x384xf32> to vector<32x64xf32>
    %121 = arith.truncf %120 : vector<32x64xf32> to vector<32x64xbf16>
    %cst_39 = arith.constant dense<0.000000e+00> : vector<32x32xf32>
    %122 = tpu.matmul %117, %119, %cst_39 {dimension_numbers = #tpu.dot_dimension_numbers<[1], [1], [0], [0], [0, 0, 1, 0], [], []>} : vector<32x64xbf16>, vector<32x64xbf16>, vector<32x32xf32> -> vector<32x32xf32>
    %cst_40 = arith.constant 1.250000e-01 : f32
    %123 = vector.broadcast %cst_40 : f32 to vector<32x32xf32>
    %124 = arith.mulf %122, %123 : vector<32x32xf32>
    %125 = tpu.iota {dimensions = array<i32: 1>} : vector<32x32xi32>
    %c17_i32_41 = arith.constant 17 : i32
    %126 = vector.broadcast %c17_i32_41 : i32 to vector<32x32xi32>
    %127 = arith.cmpi slt, %125, %126 : vector<32x32xi32>
    %cst_42 = arith.constant -1.000000e+30 : f32
    %128 = vector.broadcast %cst_42 : f32 to vector<32x32xf32>
    %129 = arith.select %127, %124, %128 : vector<32x32xi1>, vector<32x32xf32>
    %cst_43 = arith.constant dense<0xFF800000> : vector<32xf32>
    %130 = vector.multi_reduction <maximumf>, %129, %cst_43 [1] : vector<32x32xf32> to vector<32xf32>
    %131 = vector.shape_cast %130 : vector<32xf32> to vector<32x1xf32>
    %132 = vector.broadcast %131 : vector<32x1xf32> to vector<32x32xf32>
    %133 = arith.subf %129, %132 : vector<32x32xf32>
    %134 = math.exp %133 : vector<32x32xf32>
    %cst_44 = arith.constant dense<0.000000e+00> : vector<32xf32>
    %135 = vector.multi_reduction <add>, %134, %cst_44 [1] : vector<32x32xf32> to vector<32xf32>
    %136 = vector.shape_cast %135 : vector<32xf32> to vector<32x1xf32>
    %137 = vector.broadcast %136 : vector<32x1xf32> to vector<32x32xf32>
    %138 = arith.divf %134, %137 : vector<32x32xf32>
    %139 = arith.truncf %138 : vector<32x32xf32> to vector<32x32xbf16>
    %cst_45 = arith.constant dense<0.000000e+00> : vector<32x64xf32>
    %140 = tpu.matmul %139, %121, %cst_45 {dimension_numbers = #tpu.dot_dimension_numbers<[1], [0], [0], [1], [0, 0, 1, 1], [], []>} : vector<32x32xbf16>, vector<32x64xbf16>, vector<32x64xf32> -> vector<32x64xf32>
    %141 = tpu.concatenate %115, %140 in 1 : vector<32x64xf32>, vector<32x64xf32> -> vector<32x128xf32>
    %142 = tpu.concatenate %89, %141 in 0 : vector<32x128xf32>, vector<32x128xf32> -> vector<64x128xf32>
    %143 = arith.truncf %142 : vector<64x128xf32> to vector<64x128xbf16>
    %c0_46 = arith.constant 0 : index
    %c0_47 = arith.constant 0 : index
    %c0_48 = arith.constant 0 : index
    %144 = vector.load %arg6[%c0_46, %c0_47, %c0_48] : memref<1x128x128xbf16, #tpu.memory_space<vmem>>, vector<1x128x128xbf16>
    %145 = vector.shape_cast %144 : vector<1x128x128xbf16> to vector<128x128xbf16>
    %cst_49 = arith.constant dense<0.000000e+00> : vector<64x128xf32>
    %146 = tpu.matmul %143, %145, %cst_49 {dimension_numbers = #tpu.dot_dimension_numbers<[1], [0], [0], [1], [0, 0, 1, 1], [], []>} : vector<64x128xbf16>, vector<128x128xbf16>, vector<64x128xf32> -> vector<64x128xf32>
    %147 = arith.addf %3, %146 : vector<64x128xf32>
    %c0_50 = arith.constant 0 : index
    %c0_51 = arith.constant 0 : index
    %c0_52 = arith.constant 0 : index
    %148 = vector.load %arg7[%c0_50, %c0_51, %c0_52] : memref<1x1x128xf32, #tpu.memory_space<vmem>>, vector<1x1x128xf32>
    %149 = vector.shape_cast %148 : vector<1x1x128xf32> to vector<1x128xf32>
    %150 = vector.broadcast %149 : vector<1x128xf32> to vector<64x128xf32>
    %151 = arith.addf %147, %150 : vector<64x128xf32>
    %c0_53 = arith.constant 0 : index
    %c0_54 = arith.constant 0 : index
    %c0_55 = arith.constant 0 : index
    %152 = vector.load %arg8[%c0_53, %c0_54, %c0_55] : memref<1x1x128xf32, #tpu.memory_space<vmem>>, vector<1x1x128xf32>
    %153 = vector.shape_cast %152 : vector<1x1x128xf32> to vector<1x128xf32>
    %c0_56 = arith.constant 0 : index
    %c0_57 = arith.constant 0 : index
    %c0_58 = arith.constant 0 : index
    %154 = vector.load %arg9[%c0_56, %c0_57, %c0_58] : memref<1x1x128xf32, #tpu.memory_space<vmem>>, vector<1x1x128xf32>
    %155 = vector.shape_cast %154 : vector<1x1x128xf32> to vector<1x128xf32>
    %cst_59 = arith.constant dense<0.000000e+00> : vector<64xf32>
    %156 = vector.multi_reduction <add>, %151, %cst_59 [1] : vector<64x128xf32> to vector<64xf32>
    %157 = vector.shape_cast %156 : vector<64xf32> to vector<64x1xf32>
    %cst_60 = arith.constant 1.280000e+02 : f32
    %158 = vector.broadcast %cst_60 : f32 to vector<64x1xf32>
    %159 = arith.divf %157, %158 : vector<64x1xf32>
    %160 = vector.broadcast %159 : vector<64x1xf32> to vector<64x128xf32>
    %161 = arith.subf %151, %160 : vector<64x128xf32>
    %162 = arith.mulf %161, %161 : vector<64x128xf32>
    %cst_61 = arith.constant dense<0.000000e+00> : vector<64xf32>
    %163 = vector.multi_reduction <add>, %162, %cst_61 [1] : vector<64x128xf32> to vector<64xf32>
    %164 = vector.shape_cast %163 : vector<64xf32> to vector<64x1xf32>
    %cst_62 = arith.constant 1.280000e+02 : f32
    %165 = vector.broadcast %cst_62 : f32 to vector<64x1xf32>
    %166 = arith.divf %164, %165 : vector<64x1xf32>
    %167 = vector.broadcast %159 : vector<64x1xf32> to vector<64x128xf32>
    %168 = arith.subf %151, %167 : vector<64x128xf32>
    %cst_63 = arith.constant 9.99999997E-7 : f32
    %169 = vector.broadcast %cst_63 : f32 to vector<64x1xf32>
    %170 = arith.addf %166, %169 : vector<64x1xf32>
    %171 = math.rsqrt %170 : vector<64x1xf32>
    %172 = vector.broadcast %171 : vector<64x1xf32> to vector<64x128xf32>
    %173 = arith.mulf %168, %172 : vector<64x128xf32>
    %174 = vector.broadcast %153 : vector<1x128xf32> to vector<64x128xf32>
    %175 = arith.mulf %173, %174 : vector<64x128xf32>
    %176 = vector.broadcast %155 : vector<1x128xf32> to vector<64x128xf32>
    %177 = arith.addf %175, %176 : vector<64x128xf32>
    %178 = arith.truncf %177 : vector<64x128xf32> to vector<64x128xbf16>
    %c0_64 = arith.constant 0 : index
    %c0_65 = arith.constant 0 : index
    %c0_66 = arith.constant 0 : index
    %179 = vector.load %arg10[%c0_64, %c0_65, %c0_66] : memref<1x128x512xbf16, #tpu.memory_space<vmem>>, vector<1x128x512xbf16>
    %180 = vector.shape_cast %179 : vector<1x128x512xbf16> to vector<128x512xbf16>
    %cst_67 = arith.constant dense<0.000000e+00> : vector<64x512xf32>
    %181 = tpu.matmul %178, %180, %cst_67 {dimension_numbers = #tpu.dot_dimension_numbers<[1], [0], [0], [1], [0, 0, 1, 1], [], []>} : vector<64x128xbf16>, vector<128x512xbf16>, vector<64x512xf32> -> vector<64x512xf32>
    %c0_68 = arith.constant 0 : index
    %c0_69 = arith.constant 0 : index
    %c0_70 = arith.constant 0 : index
    %182 = vector.load %arg11[%c0_68, %c0_69, %c0_70] : memref<1x1x512xf32, #tpu.memory_space<vmem>>, vector<1x1x512xf32>
    %183 = vector.shape_cast %182 : vector<1x1x512xf32> to vector<1x512xf32>
    %184 = vector.broadcast %183 : vector<1x512xf32> to vector<64x512xf32>
    %185 = arith.addf %181, %184 : vector<64x512xf32>
    %186 = arith.mulf %185, %185 : vector<64x512xf32>
    %187 = arith.mulf %185, %186 : vector<64x512xf32>
    %cst_71 = arith.constant 4.471500e-02 : f32
    %188 = vector.broadcast %cst_71 : f32 to vector<64x512xf32>
    %189 = arith.mulf %188, %187 : vector<64x512xf32>
    %190 = arith.addf %185, %189 : vector<64x512xf32>
    %cst_72 = arith.constant 0.797884583 : f32
    %191 = vector.broadcast %cst_72 : f32 to vector<64x512xf32>
    %192 = arith.mulf %191, %190 : vector<64x512xf32>
    %193 = math.tanh %192 : vector<64x512xf32>
    %cst_73 = arith.constant 1.000000e+00 : f32
    %194 = vector.broadcast %cst_73 : f32 to vector<64x512xf32>
    %195 = arith.addf %194, %193 : vector<64x512xf32>
    %cst_74 = arith.constant 5.000000e-01 : f32
    %196 = vector.broadcast %cst_74 : f32 to vector<64x512xf32>
    %197 = arith.mulf %196, %195 : vector<64x512xf32>
    %198 = arith.mulf %185, %197 : vector<64x512xf32>
    %199 = arith.truncf %198 : vector<64x512xf32> to vector<64x512xbf16>
    %c0_75 = arith.constant 0 : index
    %c0_76 = arith.constant 0 : index
    %c0_77 = arith.constant 0 : index
    %200 = vector.load %arg12[%c0_75, %c0_76, %c0_77] : memref<1x512x128xbf16, #tpu.memory_space<vmem>>, vector<1x512x128xbf16>
    %201 = vector.shape_cast %200 : vector<1x512x128xbf16> to vector<512x128xbf16>
    %cst_78 = arith.constant dense<0.000000e+00> : vector<64x128xf32>
    %202 = tpu.matmul %199, %201, %cst_78 {dimension_numbers = #tpu.dot_dimension_numbers<[1], [0], [0], [1], [0, 0, 1, 1], [], []>} : vector<64x512xbf16>, vector<512x128xbf16>, vector<64x128xf32> -> vector<64x128xf32>
    %203 = arith.addf %151, %202 : vector<64x128xf32>
    %c0_79 = arith.constant 0 : index
    %c0_80 = arith.constant 0 : index
    %c0_81 = arith.constant 0 : index
    %204 = vector.load %arg13[%c0_79, %c0_80, %c0_81] : memref<1x1x128xf32, #tpu.memory_space<vmem>>, vector<1x1x128xf32>
    %205 = vector.shape_cast %204 : vector<1x1x128xf32> to vector<1x128xf32>
    %206 = vector.broadcast %205 : vector<1x128xf32> to vector<64x128xf32>
    %207 = arith.addf %203, %206 : vector<64x128xf32>
    %c0_82 = arith.constant 0 : index
    %c0_83 = arith.constant 0 : index
    %208 = vector.load %arg14[%c0_82, %c0_83] : memref<64x128xf32, #tpu.memory_space<vmem>>, vector<64x128xf32>
    tpu.vector_store %arg14[%c0_82, %c0_83], %207 {strides = array<i32>} : memref<64x128xf32, #tpu.memory_space<vmem>>, vector<64x128xf32>,
    return
  }
  func.func @transform_0(%arg0: i32) -> (i32, i32) {
    %c0_i32 = arith.constant 0 : i32
    %c0_i32_0 = arith.constant 0 : i32
    %c0_i32_1 = arith.constant 0 : i32
    return %c0_i32, %c0_i32_0 : i32, i32
  }
  func.func @transform_1(%arg0: i32) -> (i32, i32, i32) {
    %c0_i32 = arith.constant 0 : i32
    %c0_i32_0 = arith.constant 0 : i32
    %c0_i32_1 = arith.constant 0 : i32
    return %arg0, %c0_i32, %c0_i32_0 : i32, i32, i32
  }
  func.func @transform_2(%arg0: i32) -> (i32, i32, i32) {
    %c0_i32 = arith.constant 0 : i32
    %c0_i32_0 = arith.constant 0 : i32
    %c0_i32_1 = arith.constant 0 : i32
    return %arg0, %c0_i32, %c0_i32_0 : i32, i32, i32
  }
  func.func @transform_3(%arg0: i32) -> (i32, i32, i32) {
    %c0_i32 = arith.constant 0 : i32
    %c0_i32_0 = arith.constant 0 : i32
    %c0_i32_1 = arith.constant 0 : i32
    return %arg0, %c0_i32, %c0_i32_0 : i32, i32, i32
  }
  func.func @transform_4(%arg0: i32) -> (i32, i32, i32) {
    %c0_i32 = arith.constant 0 : i32
    %c0_i32_0 = arith.constant 0 : i32
    %c0_i32_1 = arith.constant 0 : i32
    return %arg0, %c0_i32, %c0_i32_0 : i32, i32, i32
  }
  func.func @transform_5(%arg0: i32) -> (i32, i32, i32) {
    %c0_i32 = arith.constant 0 : i32
    %c0_i32_0 = arith.constant 0 : i32
    %c0_i32_1 = arith.constant 0 : i32
    return %arg0, %c0_i32, %c0_i32_0 : i32, i32, i32
  }
  func.func @transform_6(%arg0: i32) -> (i32, i32, i32) {
    %c0_i32 = arith.constant 0 : i32
    %c0_i32_0 = arith.constant 0 : i32
    %c0_i32_1 = arith.constant 0 : i32
    return %arg0, %c0_i32, %c0_i32_0 : i32, i32, i32
  }
  func.func @transform_7(%arg0: i32) -> (i32, i32, i32) {
    %c0_i32 = arith.constant 0 : i32
    %c0_i32_0 = arith.constant 0 : i32
    %c0_i32_1 = arith.constant 0 : i32
    return %arg0, %c0_i32, %c0_i32_0 : i32, i32, i32
  }
  func.func @transform_8(%arg0: i32) -> (i32, i32, i32) {
    %c0_i32 = arith.constant 0 : i32
    %c0_i32_0 = arith.constant 0 : i32
    %c0_i32_1 = arith.constant 0 : i32
    return %arg0, %c0_i32, %c0_i32_0 : i32, i32, i32
  }
  func.func @transform_9(%arg0: i32) -> (i32, i32, i32) {
    %c0_i32 = arith.constant 0 : i32
    %c0_i32_0 = arith.constant 0 : i32
    %c0_i32_1 = arith.constant 0 : i32
    return %arg0, %c0_i32, %c0_i32_0 : i32, i32, i32
  }
  func.func @transform_10(%arg0: i32) -> (i32, i32, i32) {
    %c0_i32 = arith.constant 0 : i32
    %c0_i32_0 = arith.constant 0 : i32
    %c0_i32_1 = arith.constant 0 : i32
    return %arg0, %c0_i32, %c0_i32_0 : i32, i32, i32
  }
  func.func @transform_11(%arg0: i32) -> (i32, i32, i32) {
    %c0_i32 = arith.constant 0 : i32
    %c0_i32_0 = arith.constant 0 : i32
    %c0_i32_1 = arith.constant 0 : i32
    return %arg0, %c0_i32, %c0_i32_0 : i32, i32, i32
  }
  func.func @transform_12(%arg0: i32) -> (i32, i32, i32) {
    %c0_i32 = arith.constant 0 : i32
    %c0_i32_0 = arith.constant 0 : i32
    %c0_i32_1 = arith.constant 0 : i32
    return %arg0, %c0_i32, %c0_i32_0 : i32, i32, i32
  }
  func.func @transform_13(%arg0: i32) -> (i32, i32) {
    %c0_i32 = arith.constant 0 : i32
    %c0_i32_0 = arith.constant 0 : i32
    %c0_i32_1 = arith.constant 0 : i32
    return %c0_i32, %c0_i32_0 : i32, i32
  }
}

</mosaic_0001>

<bundles_post_ra>
// kernel: forward.3
= control target key start
LH: loop header
LB: loop body
LE: loop exit
PB: predicated region body
PF: predicated region fallthrough
CT: control target
= control target key end

     0   :  { %s1068_s1 = inlined_call_operand.vmem [shape: bf16[768,128], index: 1, kind: input, shape index: {}]   ;;  %s1069_s2 = inlined_call_operand.vmem [shape: f32[1,128], index: 2, kind: input, shape index: {}]   ;;  %s1070_s0 = inlined_call_operand.vmem [shape: f32[32,768], index: 0, kind: input, shape index: {}]   ;;  %s1071_s3 = inlined_call_operand.vmem [shape: f32[32,128], index: 3, kind: output, shape index: {}]  }
   0x1   :  { %v759_v0 = vld [vmem:[%s1068_s1 + $0x38] sm:$0xff]  ;;  %v758_v4 = vld [vmem:[%s1068_s1 + $0x30] sm:$0xff]  ;;  %v757_v8 = vld [vmem:[%s1068_s1 + $0x28] sm:$0xff] }
   0x2   :  { %v767_v1 = vld [vmem:[%s1068_s1 + $0x78] sm:$0xff]  ;;  %438 = vmatpush.bf16.msra.mxu0 %v759_v0  ;;  %v766_v5 = vld [vmem:[%s1068_s1 + $0x70] sm:$0xff]  ;;  %v765_v9 = vld [vmem:[%s1068_s1 + $0x68] sm:$0xff] }
   0x3   :  { %v775_v2 = vld [vmem:[%s1068_s1 + $0xb8] sm:$0xff]  ;;  %457 = vmatpush.bf16.msra.mxu1 %v767_v1  ;;  %v774_v6 = vld [vmem:[%s1068_s1 + $0xb0] sm:$0xff]  ;;  %v773_v10 = vld [vmem:[%s1068_s1 + $0xa8] sm:$0xff] }
   0x4   :  { %v783_v3 = vld [vmem:[%s1068_s1 + $0xf8] sm:$0xff]  ;;  %476 = vmatpush.bf16.msra.mxu2 %v775_v2  ;;  %v782_v7 = vld [vmem:[%s1068_s1 + $0xf0] sm:$0xff]  ;;  %v781_v11 = vld [vmem:[%s1068_s1 + $0xe8] sm:$0xff] }
   0x5   :  { %495 = vmatpush.bf16.msra.mxu3 %v783_v3  ;;  %v756_v12 = vld [vmem:[%s1068_s1 + $0x20] sm:$0xff]  ;;  %v755_v16 = vld [vmem:[%s1068_s1 + $0x18] sm:$0xff]  ;;  %v754_v20 = vld [vmem:[%s1068_s1 + $0x10] sm:$0xff] }
   0x6   :  { %439 = vmatpush.bf16.msra.mxu0 %v758_v4  ;;  %v764_v13 = vld [vmem:[%s1068_s1 + $0x60] sm:$0xff]  ;;  %v763_v17 = vld [vmem:[%s1068_s1 + $0x58] sm:$0xff]  ;;  %v762_v21 = vld [vmem:[%s1068_s1 + $0x50] sm:$0xff] }
   0x7   :  { %458 = vmatpush.bf16.msra.mxu1 %v766_v5  ;;  %v772_v14 = vld [vmem:[%s1068_s1 + $0xa0] sm:$0xff]  ;;  %v771_v18 = vld [vmem:[%s1068_s1 + $0x98] sm:$0xff]  ;;  %v770_v22 = vld [vmem:[%s1068_s1 + $0x90] sm:$0xff] }
   0x8   :  { %477 = vmatpush.bf16.msra.mxu2 %v774_v6  ;;  %v780_v15 = vld [vmem:[%s1068_s1 + $0xe0] sm:$0xff]  ;;  %v779_v19 = vld [vmem:[%s1068_s1 + $0xd8] sm:$0xff]  ;;  %v778_v23 = vld [vmem:[%s1068_s1 + $0xd0] sm:$0xff] }
   0x9   :  { %496 = vmatpush.bf16.msra.mxu3 %v782_v7  ;;  %v753_v24 = vld [vmem:[%s1068_s1 + $0x8] sm:$0xff]  ;;  %v752_v28 = vld [vmem:[%s1068_s1] sm:$0xff]  ;;  %v20_v33 = vld [vmem:[%s1070_s0 + $0x30] sm:$0xff] }
   0xa   :  { %440 = vmatpush.bf16.msra.mxu0 %v757_v8  ;;  %v761_v25 = vld [vmem:[%s1068_s1 + $0x48] sm:$0xff]  ;;  %v760_v29 = vld [vmem:[%s1068_s1 + $0x40] sm:$0xff]  ;;  %v21_v35 = vld [vmem:[%s1070_s0 + $0x38] sm:$0xff] }
   0xb   :  { %459 = vmatpush.bf16.msra.mxu1 %v765_v9  ;;  %v769_v26 = vld [vmem:[%s1068_s1 + $0x88] sm:$0xff]  ;;  %v768_v30 = vld [vmem:[%s1068_s1 + $0x80] sm:$0xff]  ;;  %v16_v36 = vld [vmem:[%s1070_s0 + $0x10] sm:$0xff] }
   0xc   :  { %478 = vmatpush.bf16.msra.mxu2 %v773_v10  ;;  %v777_v27 = vld [vmem:[%s1068_s1 + $0xc8] sm:$0xff]  ;;  %v776_v31 = vld [vmem:[%s1068_s1 + $0xc0] sm:$0xff]  ;;  %v17_v38 = vld [vmem:[%s1070_s0 + $0x18] sm:$0xff] }
   0xd   :  { %497 = vmatpush.bf16.msra.mxu3 %v781_v11  ;;  %v14_v32 = vld [vmem:[%s1070_s0] sm:$0xff]  ;;  %v15_v34 = vld [vmem:[%s1070_s0 + $0x8] sm:$0xff]  ;;  %v791_v40 = vld [vmem:[%s1068_s1 + $0x138] sm:$0xff] }
   0xe   :  { %441 = vmatpush.bf16.msra.mxu0 %v756_v12  ;;  %v22_v37 = vld [vmem:[%s1070_s0 + $0x40] sm:$0xff]  ;;  %v23_v39 = vld [vmem:[%s1070_s0 + $0x48] sm:$0xff]  ;;  %v38_v41 = vpack.c.bf16 %v20_v33, %v14_v32  ;;  %v39_v42 = vpack.c.bf16 %v21_v35, %v15_v34  ;;  %v799_v45 = vld [vmem:[%s1068_s1 + $0x178] sm:$0xff] }
   0xf   :  { %460 = vmatpush.bf16.msra.mxu1 %v764_v13  ;;  %v40_v43 = vpack.c.bf16 %v22_v37, %v16_v36  ;;  %v41_v44 = vpack.c.bf16 %v23_v39, %v17_v38  ;;  %v790_v46 = vld [vmem:[%s1068_s1 + $0x130] sm:$0xff]  ;;  %v789_v48 = vld [vmem:[%s1068_s1 + $0x128] sm:$0xff]  ;;  %v788_v50 = vld [vmem:[%s1068_s1 + $0x120] sm:$0xff] }
  0x10   :  { %479 = vmatpush.bf16.msra.mxu2 %v772_v14  ;;  %v798_v47 = vld [vmem:[%s1068_s1 + $0x170] sm:$0xff]  ;;  %v797_v49 = vld [vmem:[%s1068_s1 + $0x168] sm:$0xff]  ;;  %v796_v51 = vld [vmem:[%s1068_s1 + $0x160] sm:$0xff] }
  0x11   :  { %498 = vmatpush.bf16.msra.mxu3 %v780_v15  ;;  %v26_v52 = vld [vmem:[%s1070_s0 + $0x60] sm:$0xff]  ;;  %v32_v53 = vld [vmem:[%s1070_s0 + $0x90] sm:$0xff]  ;;  %v27_v54 = vld [vmem:[%s1070_s0 + $0x68] sm:$0xff] }
  0x12   :  { %442 = vmatpush.bf16.msra.mxu0 %v755_v16  ;;  %v33_v55 = vld [vmem:[%s1070_s0 + $0x98] sm:$0xff]  ;;  %v28_v56 = vld [vmem:[%s1070_s0 + $0x70] sm:$0xff]  ;;  %v34_v57 = vld [vmem:[%s1070_s0 + $0xa0] sm:$0xff]  ;;  %v44_v61 = vpack.c.bf16 %v32_v53, %v26_v52 }
  0x13   :  { %461 = vmatpush.bf16.msra.mxu1 %v763_v17  ;;  %v29_v58 = vld [vmem:[%s1070_s0 + $0x78] sm:$0xff]  ;;  %v35_v59 = vld [vmem:[%s1070_s0 + $0xa8] sm:$0xff]  ;;  %v45_v62 = vpack.c.bf16 %v33_v55, %v27_v54  ;;  %v46_v63 = vpack.c.bf16 %v34_v57, %v28_v56  ;;  %v786_v2 = vld [vmem:[%s1068_s1 + $0x110] sm:$0xff] }
  0x14   :  { %480 = vmatpush.bf16.msra.mxu2 %v771_v18  ;;  %v787_v60 = vld [vmem:[%s1068_s1 + $0x118] sm:$0xff]  ;;  %v47_v0 = vpack.c.bf16 %v35_v59, %v29_v58  ;;  %v794_v3 = vld [vmem:[%s1068_s1 + $0x150] sm:$0xff]  ;;  %v785_v4 = vld [vmem:[%s1068_s1 + $0x108] sm:$0xff] }
  0x15   :  { %499 = vmatpush.bf16.msra.mxu3 %v779_v19  ;;  %v795_v1 = vld [vmem:[%s1068_s1 + $0x158] sm:$0xff]  ;;  %v793_v5 = vld [vmem:[%s1068_s1 + $0x148] sm:$0xff]  ;;  %v784_v6 = vld [vmem:[%s1068_s1 + $0x100] sm:$0xff] }
  0x16   :  { %443 = vmatpush.bf16.msra.mxu0 %v754_v20  ;;  %v792_v7 = vld [vmem:[%s1068_s1 + $0x140] sm:$0xff]  ;;  %v24_v9 = vld [vmem:[%s1070_s0 + $0x50] sm:$0xff]  ;;  %v19_v12 = vld [vmem:[%s1070_s0 + $0x28] sm:$0xff] }
  0x17   :  { %462 = vmatpush.bf16.msra.mxu1 %v762_v21  ;;  %v18_v8 = vld [vmem:[%s1070_s0 + $0x20] sm:$0xff]  ;;  %v36_v11 = vld [vmem:[%s1070_s0 + $0xb0] sm:$0xff]  ;;  %v25_v13 = vld [vmem:[%s1070_s0 + $0x58] sm:$0xff] }
  0x18   :  { %481 = vmatpush.bf16.msra.mxu2 %v770_v22  ;;  %v30_v10 = vld [vmem:[%s1070_s0 + $0x80] sm:$0xff]  ;;  %v31_v14 = vld [vmem:[%s1070_s0 + $0x88] sm:$0xff]  ;;  %v37_v15 = vld [vmem:[%s1070_s0 + $0xb8] sm:$0xff]  ;;  %v42_v16 = vpack.c.bf16 %v24_v9, %v18_v8  ;;  %v43_v18 = vpack.c.bf16 %v25_v13, %v19_v12 }
  0x19   :  { %500 = vmatpush.bf16.msra.mxu3 %v778_v23  ;;  %v48_v17 = vpack.c.bf16 %v36_v11, %v30_v10  ;;  %v49_v19 = vpack.c.bf16 %v37_v15, %v31_v14 }
  0x1a   :  { %444 = vmatpush.bf16.msra.mxu0 %v753_v24 }
  0x1b   :  { %463 = vmatpush.bf16.msra.mxu1 %v761_v25 }
  0x1c   :  { %482 = vmatpush.bf16.msra.mxu2 %v769_v26  ;;  %v816_v26 = vld [vmem:[%s1069_s2] ss:$0 sm:$0xff] }
  0x1d   :  { %501 = vmatpush.bf16.msra.mxu3 %v777_v27 }
  0x1e   :  { %445 = vmatpush.bf16.msra.mxu0 %v752_v28 }
  0x1f   :  { %464 = vmatpush.bf16.msra.mxu1 %v760_v29 }
  0x20   :  { %483 = vmatpush.bf16.msra.mxu2 %v768_v30 }
  0x21   :  { %502 = vmatpush.bf16.msra.mxu3 %v776_v31  ;;  %446 = vmatmul.bf16.vlgmr.msra.gmra.mxu0 %v38_v41 }
  0x22   :  { %514 = vmatpush.bf16.msrb.mxu0 %v791_v40  ;;  %465 = vmatmul.bf16.vlgmr.msra.gmra.mxu1 %v39_v42 }
  0x23   :  { %484 = vmatmul.bf16.vlgmr.msra.gmra.mxu2 %v40_v43  ;;  %533 = vmatpush.bf16.msrb.mxu1 %v799_v45 }
  0x24   :  { %800 = vmatpush.bf16.msrb.mxu2 %v791_v40  ;;  %503 = vmatmul.bf16.vlgmr.msra.gmra.mxu3 %v41_v44 }
  0x25   :  { %808 = vmatpush.bf16.msrb.mxu3 %v799_v45 }
  0x26   :  { %515 = vmatpush.bf16.msrb.mxu0 %v790_v46 }
  0x27   :  { %534 = vmatpush.bf16.msrb.mxu1 %v798_v47 }
  0x28   :  { %801 = vmatpush.bf16.msrb.mxu2 %v790_v46 }
  0x29   :  { %809 = vmatpush.bf16.msrb.mxu3 %v798_v47 }
  0x2a   :  { %516 = vmatpush.bf16.msrb.mxu0 %v789_v48 }
  0x2b   :  { %535 = vmatpush.bf16.msrb.mxu1 %v797_v49 }
  0x2c   :  { %802 = vmatpush.bf16.msrb.mxu2 %v789_v48 }
  0x2d   :  { %810 = vmatpush.bf16.msrb.mxu3 %v797_v49 }
  0x2e   :  { %517 = vmatpush.bf16.msrb.mxu0 %v788_v50 }
  0x2f   :  { %536 = vmatpush.bf16.msrb.mxu1 %v796_v51 }
  0x30   :  { %803 = vmatpush.bf16.msrb.mxu2 %v788_v50 }
  0x31   :  { %811 = vmatpush.bf16.msrb.mxu3 %v796_v51  ;;  %451 = vmatmul.bf16.gmra.mxu0 %v44_v61 }
  0x32   :  { %518 = vmatpush.bf16.msrb.mxu0 %v787_v60  ;;  %470 = vmatmul.bf16.gmra.mxu1 %v45_v62 }
  0x33   :  { %489 = vmatmul.bf16.gmra.mxu2 %v46_v63  ;;  %537 = vmatpush.bf16.msrb.mxu1 %v795_v1 }
  0x34   :  { %804 = vmatpush.bf16.msrb.mxu2 %v787_v60  ;;  %508 = vmatmul.bf16.gmra.mxu3 %v47_v0 }
  0x35   :  { %812 = vmatpush.bf16.msrb.mxu3 %v795_v1 }
  0x36   :  { %519 = vmatpush.bf16.msrb.mxu0 %v786_v2 }
  0x37   :  { %538 = vmatpush.bf16.msrb.mxu1 %v794_v3 }
  0x38   :  { %805 = vmatpush.bf16.msrb.mxu2 %v786_v2 }
  0x39   :  { %813 = vmatpush.bf16.msrb.mxu3 %v794_v3 }
  0x3a   :  { %520 = vmatpush.bf16.msrb.mxu0 %v785_v4 }
  0x3b   :  { %539 = vmatpush.bf16.msrb.mxu1 %v793_v5 }
  0x3c   :  { %806 = vmatpush.bf16.msrb.mxu2 %v785_v4 }
  0x3d   :  { %814 = vmatpush.bf16.msrb.mxu3 %v793_v5 }
  0x3e   :  { %521 = vmatpush.bf16.msrb.mxu0 %v784_v6 }
  0x3f   :  { %540 = vmatpush.bf16.msrb.mxu1 %v792_v7 }
  0x40   :  { %807 = vmatpush.bf16.msrb.mxu2 %v784_v6 }
  0x41   :  { %815 = vmatpush.bf16.msrb.mxu3 %v792_v7  ;;  %522 = vmatmul.bf16.vlgmr.msrb.gmra.mxu0 %v42_v16 }
  0x42   :  { %541 = vmatmul.bf16.vlgmr.msrb.gmra.mxu1 %v43_v18 }
  0x43   :  { %527 = vmatmul.bf16.vlgmr.msrb.gmra.mxu2 %v48_v17 }
  0x44   :  { %546 = vmatmul.bf16.vlgmr.msrb.gmra.mxu3 %v49_v19 }
  0x9e   :  { %v447_v20 = vpop.f32.mrf.mxu0 }
  0x9f   :  { %v466_v21 = vpop.f32.mrf.mxu1  ;;  %v448_v31 = vadd.f32 %v816_v26, %v447_v20 }
  0xa1   :  { %v467_v32 = vadd.f32 %v466_v21, %v448_v31 }
  0xa6   :  { %v485_v22 = vpop.f32.mrf.mxu2  ;;  %v449_v24 = vpop.f32.mrf.mxu0 }
  0xa7   :  { %v504_v23 = vpop.f32.mrf.mxu3  ;;  %v468_v25 = vpop.f32.mrf.mxu1  ;;  %v486_v38 = vadd.f32 %v485_v22, %v467_v32  ;;  %v450_v39 = vadd.f32 %v816_v26, %v449_v24 }
  0xa9   :  { %v505_v41 = vadd.f32 %v504_v23, %v486_v38  ;;  %v469_v45 = vadd.f32 %v468_v25, %v450_v39 }
  0xae   :  { %v487_v27 = vpop.f32.mrf.mxu2  ;;  %v452_v29 = vpop.f32.mrf.mxu0 }
  0xaf   :  { %v506_v28 = vpop.f32.mrf.mxu3  ;;  %v471_v30 = vpop.f32.mrf.mxu1  ;;  %v453_v37 = vadd.f32 %v816_v26, %v452_v29  ;;  %v488_v49 = vadd.f32 %v487_v27, %v469_v45 }
  0xb1   :  { %v472_v40 = vadd.f32 %v471_v30, %v453_v37  ;;  %v507_v53 = vadd.f32 %v506_v28, %v488_v49 }
  0xb6   :  { %v490_v33 = vpop.f32.mrf.mxu2  ;;  %v454_v35 = vpop.f32.mrf.mxu0 }
  0xb7   :  { %v509_v34 = vpop.f32.mrf.mxu3  ;;  %v473_v36 = vpop.f32.mrf.mxu1  ;;  %v491_v48 = vadd.f32 %v490_v33, %v472_v40  ;;  %v455_v51 = vadd.f32 %v816_v26, %v454_v35 }
  0xb9   :  { %v510_v52 = vadd.f32 %v509_v34, %v491_v48  ;;  %v474_v55 = vadd.f32 %v473_v36, %v455_v51 }
  0xbe   :  { %v492_v42 = vpop.f32.mrf.mxu2  ;;  %v523_v44 = vpop.f32.mrf.mxu0 }
  0xbf   :  { %v511_v43 = vpop.f32.mrf.mxu3  ;;  %v524_v46 = vadd.f32 %v523_v44, %v505_v41  ;;  %v542_v47 = vpop.f32.mrf.mxu1  ;;  %v493_v60 = vadd.f32 %v492_v42, %v474_v55 }
  0xc1   :  { %v543_v50 = vadd.f32 %v542_v47, %v524_v46  ;;  %v512_v0 = vadd.f32 %v511_v43, %v493_v60 }
  0xc3   :  { %552 = vst [vmem:[%s1071_s3] sm:$0xff] %v543_v50 }
  0xc6   :  { %v528_v54 = vpop.f32.mrf.mxu2  ;;  %v525_v58 = vpop.f32.mrf.mxu0 }
  0xc7   :  { %v529_v56 = vadd.f32 %v528_v54, %v510_v52  ;;  %v547_v57 = vpop.f32.mrf.mxu3  ;;  %v526_v59 = vadd.f32 %v525_v58, %v507_v53  ;;  %v544_v62 = vpop.f32.mrf.mxu1 }
  0xc9   :  { %v548_v61 = vadd.f32 %v547_v57, %v529_v56  ;;  %v545_v63 = vadd.f32 %v544_v62, %v526_v59 }
  0xcb   :  { %554 = vst [vmem:[%s1071_s3 + $0x10] sm:$0xff] %v548_v61 }
  0xcc   :  { %553 = vst [vmem:[%s1071_s3 + $0x8] sm:$0xff] %v545_v63 }
  0xce   :  { %v530_v1 = vpop.f32.mrf.mxu2 }
  0xcf   :  { %v531_v2 = vadd.f32 %v530_v1, %v512_v0  ;;  %v549_v3 = vpop.f32.mrf.mxu3 }
  0xd1   :  { %v550_v4 = vadd.f32 %v549_v3, %v531_v2 }
  0xd3   :  { %555 = vst [vmem:[%s1071_s3 + $0x18] sm:$0xff] %v550_v4 }

// kernel: forward.5
= control target key start
LH: loop header
LB: loop body
LE: loop exit
PB: predicated region body
PF: predicated region fallthrough
CT: control target
= control target key end

     0   :  { %vm24_vm0 = vcmask 1041408   ;;  %s309_s0 = inlined_call_operand.vmem [shape: f32[2,128], index: 0, kind: input, shape index: {}]   ;;  %s310_s1 = inlined_call_operand.vmem [shape: f32[1,128], index: 1, kind: input, shape index: {}]   ;;  %s311_s2 = inlined_call_operand.vmem [shape: f32[1,128], index: 2, kind: input, shape index: {}]   ;;  %s312_s3 = inlined_call_operand.vmem [shape: bf16[128,128], index: 3, kind: input, shape index: {}]   ;;  %s313_s4 = inlined_call_operand.vmem [shape: f32[1,128], index: 4, kind: input, shape index: {}]   ;;  %s314_s5 = inlined_call_operand.hbm [shape: f32[2,128], index: 5, kind: output, shape index: {}]  }
   0x1   :  { %v21_v0 = vld [vmem:[%s309_s0] sm:$0x3] }
   0x2   :  { %v25_v1 = vsel %vm24_vm0, %v21_v0, 0.0 }
   0x3   :  { %26 = vadd.xlane.f32.xlu0 %v25_v1 }
   0x4   :  { %10 = vsyncpa [#allocation3], 0  ;;  %v236_v2 = vmov 128.0   ;;  %v200_v3 = vld [vmem:[%s312_s3 + $0x38] sm:$0xff]  ;;  %v199_v15 = vld [vmem:[%s312_s3 + $0x30] sm:$0xff]  ;;  %s237_s15 = smov [#allocation2]  }
   0x5   :  { %206 = vrcp.f32 %v236_v2  ;;  %131 = vmatpush.bf16.msra.mxu0 %v200_v3  ;;  %v198_v16 = vld [vmem:[%s312_s3 + $0x28] sm:$0xff]  ;;  %v197_v17 = vld [vmem:[%s312_s3 + $0x20] sm:$0xff]  ;;  %v196_v18 = vld [vmem:[%s312_s3 + $0x18] sm:$0xff]  ;;  %s150_s16 = sshll.u32 %s237_s15, 4  ;;  %s151_s16 = int_to_ptr.vmem [resolvable:$true] %s150_s16 }
   0x6   :  { %v195_v19 = vld [vmem:[%s312_s3 + $0x10] sm:$0xff]  ;;  %v194_v20 = vld [vmem:[%s312_s3 + $0x8] sm:$0xff]  ;;  %v193_v21 = vld [vmem:[%s312_s3] sm:$0xff] }
   0x7   :  { %v203_v31 = vld [vmem:[%s310_s1] ss:$0 sm:$0xff]  ;;  %s152_s1 = sshll.u32 %s314_s5, 4  ;;  %s153_s1 = int_to_ptr.hbm [resolvable:$true] %s152_s1 }
   0x8   :  { %v204_v34 = vld [vmem:[%s311_s2] ss:$0 sm:$0xff] }
   0x9   :  { %132 = vmatpush.bf16.msra.mxu0 %v199_v15  ;;  %v205_v38 = vld [vmem:[%s313_s4] ss:$0 sm:$0xff] }
   0xb   :  { %v207_v4 = vpop.eup %206 }
   0xc   :  { %v29_v5 = vmul.f32 128.0, %v207_v4  ;;  %vm33_vm1 = vweird.f32 %v207_v4 }
   0xd   :  { %133 = vmatpush.bf16.msra.mxu0 %v198_v16 }
   0xe   :  { %v30_v6 = vsub.f32 1.0, %v29_v5 }
  0x10   :  { %v31_v7 = vmul.f32 %v207_v4, %v30_v6 }
  0x11   :  { %134 = vmatpush.bf16.msra.mxu0 %v197_v17 }
  0x12   :  { %v32_v8 = vadd.f32 %v207_v4, %v31_v7 }
  0x14   :  { %v34_v9 = vsel %vm33_vm1, %v207_v4, %v32_v8 }
  0x15   :  { %135 = vmatpush.bf16.msra.mxu0 %v196_v18 }
  0x19   :  { %136 = vmatpush.bf16.msra.mxu0 %v195_v19 }
  0x1d   :  { %137 = vmatpush.bf16.msra.mxu0 %v194_v20 }
  0x21   :  { %138 = vmatpush.bf16.msra.mxu0 %v193_v21 }
  0x76   :  { %v27_v10 = vpop.xlane.xlu0 %26 }
  0x77   :  { %v35_v11 = vmul.f32 %v34_v9, %v27_v10 }
  0x79   :  { %v36_v12 = vsub.f32 %v21_v0, %v35_v11 }
  0x7b   :  { %v37_v13 = vmul.f32 %v36_v12, %v36_v12 }
  0x7d   :  { %v38_v14 = vsel %vm24_vm0, %v37_v13, 0.0 }
  0x7e   :  { %39 = vadd.xlane.f32.xlu0 %v38_v14 }
  0xf1   :  { %v40_v22 = vpop.xlane.xlu0 %39 }
  0xf2   :  { %v41_v23 = vmul.f32 %v40_v22, %v34_v9 }
  0xf4   :  { %v42_v24 = vadd.f32 1e-06, %v41_v23 }
  0xf6   :  { %208 = vrsqrt.f32 %v42_v24  ;;  %vm49_vm3 = vweird.f32 %v42_v24 }
  0xfc   :  { %v209_v25 = vpop.eup %208 }
  0xfd   :  { %v44_v26 = vmul.f32 %v209_v25, %v42_v24  ;;  %vm50_vm2 = vweird.f32 %v209_v25 }
  0xfe   :  { %vm51_vm4 = vmor %vm49_vm3, %vm50_vm2 }
  0xff   :  { %v45_v27 = vmul.f32 %v209_v25, %v44_v26 }
 0x101   :  { %v46_v28 = vmul.f32 0.5, %v45_v27 }
 0x103   :  { %v47_v29 = vsub.f32 1.5, %v46_v28 }
 0x105   :  { %v48_v30 = vmul.f32 %v209_v25, %v47_v29 }
 0x107   :  { %v52_v32 = vsel %vm51_vm4, %v209_v25, %v48_v30 }
 0x108   :  { %v53_v33 = vmul.f32 %v52_v32, %v36_v12 }
 0x10a   :  { %v57_v35 = vmul.f32 %v203_v31, %v53_v33 }
 0x10c   :  { %v61_v36 = vadd.f32 %v204_v34, %v57_v35 }
 0x10e   :  { %v62_v37 = vpack.c.bf16 %v61_v36, %v61_v36 }
 0x110   :  { %139 = vmatmul.bf16.vlgmr.msra.gmra.mxu0 %v62_v37 }
 0x18d   :  { %v140_v39 = vpop.f32.mrf.mxu0 }
 0x18e   :  { %v141_v40 = vadd.f32 %v205_v38, %v140_v39 }
 0x190   :  { %144 = vst [vmem:[#allocation2] sm:$0x3] %v141_v40 }
 0x191   :  { %155 = dma.vmem_to_hbm [thread:$0]  %s151_s16, 32, %s153_s1, [#allocation3]  }
 0x195   :  { %v142_v41 = vpop.f32.mrf.mxu0 }
 0x196   :  { %234 = dma.done.wait [#allocation3], 32  }
 0x197   :  { %235 = vsyncadd [#allocation3], 4294967264 }
 0x198   :  { %160 = vsyncpa [#allocation3], 1 }

// kernel: forward.4
= control target key start
LH: loop header
LB: loop body
LE: loop exit
PB: predicated region body
PF: predicated region fallthrough
CT: control target
= control target key end

     0   :  { %s4107_s25 = smov 0   ;;  %s5310_s0 = inlined_call_operand.vmem [shape: f32[64,128], index: 0, kind: input, shape index: {}]   ;;  %s5311_s1 = inlined_call_operand.vmem [shape: f32[2,1,128], index: 1, kind: input, shape index: {}]   ;;  %s5312_s2 = inlined_call_operand.vmem [shape: f32[2,1,128], index: 2, kind: input, shape index: {}]   ;;  %s5313_s3 = inlined_call_operand.vmem [shape: bf16[2,128,384], index: 3, kind: input, shape index: {}]   ;;  %s5314_s4 = inlined_call_operand.vmem [shape: f32[2,1,384], index: 4, kind: input, shape index: {}]   ;;  %s5315_s5 = inlined_call_operand.vmem [shape: bf16[2,128,128], index: 5, kind: input, shape index: {}]   ;;  %s5316_s6 = inlined_call_operand.vmem [shape: f32[2,1,128], index: 6, kind: input, shape index: {}]   ;;  %s5317_s7 = inlined_call_operand.vmem [shape: f32[2,1,128], index: 7, kind: input, shape index: {}]   ;;  %s5318_s8 = inlined_call_operand.vmem [shape: f32[2,1,128], index: 8, kind: input, shape index: {}]   ;;  %s5319_s9 = inlined_call_operand.vmem [shape: bf16[2,128,512], index: 9, kind: input, shape index: {}]   ;;  %s5320_s10 = inlined_call_operand.vmem [shape: f32[2,1,512], index: 10, kind: input, shape index: {}]   ;;  %s5321_s11 = inlined_call_operand.vmem [shape: bf16[2,512,128], index: 11, kind: input, shape index: {}]   ;;  %s5322_s12 = inlined_call_operand.vmem [shape: f32[2,1,128], index: 12, kind: input, shape index: {}]   ;;  %s5323_s13 = inlined_call_operand.vmem [shape: f32[64,128], index: 13, kind: output, shape index: {}]  }
   0x1   :  { %5325 = sst [smem:[#allocation3_spill]] %s5311_s1 }
   0x2   :  { %5326 = sst [smem:[#allocation4_spill]] %s5312_s2 }
   0x3   :  { %5327 = sst [smem:[#allocation5_spill]] %s5313_s3 }
   0x4   :  { %5328 = sst [smem:[#allocation6_spill]] %s5315_s5 }
   0x5 LB: > { %5329 = sst [smem:[#allocation2_spill]] %s4033_s25  ;;  %s3297_s26 = sadd.s32 4294967295, %s4033_s25   ;;  %s4033_s25 = sphi %s4107_s25, %s23_s25  }
   0x6   : > { %p3300_p0 = scmp.ge.s32.totalorder %s4033_s25, 1  ;;  %p478_p1 = scmp.lt.s32.totalorder %s4033_s25, 3 }
   0x8   : > { %p479_p2 = pnand %p3300_p0, %p478_p1 }
   0x9   : > { %p558_p3 = scmp.lt.s32.totalorder (!%p479_p2), %s3297_s26, 1  ;;  %s5332_s5 = sld [smem:[#allocation6_spill]] (!%p479_p2) }
   0xa   : > { %482 = sbr.rel (%p479_p2) target bundleno = 2405 (0x965), region = 72  ;;  %s5333_s3 = sld [smem:[#allocation5_spill]] (!%p479_p2) }
   0xb   : > { %p3309_p4 = scmp.ne.s32.totalorder (!%p479_p2), %s3297_s26, 0 }
   0xf   : > { %s4115_s27 = scalar_select %p558_p3, %s3297_s26, 1 }
  0x11   : > { %s3819_s17 = smul.u32 192, %s4115_s27  ;;  %s3712_s18 = sshll.u32 %s4115_s27, 6 }
  0x12   : > { %s3820_s19 = smul.u32 3, %s4115_s27  ;;  %s4131_s22 = scalar_lea.vmem %s5332_s5, %s3712_s18 }
  0x13   : > { %s4136_s28 = scalar_lea.vmem %s5333_s3, %s3819_s17  ;;  %s3713_s23 = sshll.u32 %s4115_s27, 8 }
  0x14   : > { %s4145_s16 = scalar_lea.vmem %s5314_s4, %s3820_s19  ;;  %s4159_s3 = scalar_lea.vmem %s5319_s9, %s3713_s23 }
  0x15   : > { %s3306_s30 = sshll.u32 %s4115_s27, 2  ;;  %s4170_s1 = scalar_lea.vmem %s5321_s11, %s3713_s23 }
  0x16   : > { %s4165_s19 = scalar_lea.vmem %s5320_s10, %s3306_s30  ;;  %s603_s21 = scalar_lea.vmem %s5322_s12, %s4115_s27 }
  0x17   : > { %608 = sbr.rel (%p3309_p4) target bundleno = 37 (0x25), region = 76 }
  0x1c   : > { %v609_v0 = vld [vmem:[%s5310_s0] sm:$0xff]  ;;  %v610_v1 = vld [vmem:[%s5310_s0 + $0x8] sm:$0xff]  ;;  %v611_v2 = vld [vmem:[%s5310_s0 + $0x10] sm:$0xff] }
  0x1d   : > { %617 = vst [vmem:[%s5323_s13] sm:$0xff] %v609_v0  ;;  %v612_v3 = vld [vmem:[%s5310_s0 + $0x18] sm:$0xff]  ;;  %v613_v4 = vld [vmem:[%s5310_s0 + $0x20] sm:$0xff]  ;;  %v614_v5 = vld [vmem:[%s5310_s0 + $0x28] sm:$0xff] }
  0x1e   : > { %618 = vst [vmem:[%s5323_s13 + $0x8] sm:$0xff] %v610_v1  ;;  %v615_v6 = vld [vmem:[%s5310_s0 + $0x30] sm:$0xff]  ;;  %v616_v7 = vld [vmem:[%s5310_s0 + $0x38] sm:$0xff] }
  0x1f   : > { %619 = vst [vmem:[%s5323_s13 + $0x10] sm:$0xff] %v611_v2 }
  0x20   : > { %620 = vst [vmem:[%s5323_s13 + $0x18] sm:$0xff] %v612_v3 }
  0x21   : > { %621 = vst [vmem:[%s5323_s13 + $0x20] sm:$0xff] %v613_v4 }
  0x22   : > { %622 = vst [vmem:[%s5323_s13 + $0x28] sm:$0xff] %v614_v5 }
  0x23   : > { %623 = vst [vmem:[%s5323_s13 + $0x30] sm:$0xff] %v615_v6 }
  0x24   : > { %624 = vst [vmem:[%s5323_s13 + $0x38] sm:$0xff] %v616_v7 }
  0x25 PF: > { %v625_v9 = vld [vmem:[%s5323_s13] sm:$0xff]  ;;  %v626_v11 = vld [vmem:[%s5323_s13 + $0x8] sm:$0xff]  ;;  %v4035_v12 = vmov 128.0   ;;  %v3737_v40 = vld [vmem:[%s4136_s28 + $0xb0] sm:$0xf0]  ;;  %s5334_s2 = sld [smem:[#allocation3_spill]]  ;;  %s5344_s25 = scalar_lea.vmem %s5316_s6, %s4115_s27 }
  0x26   : > { %v627_v8 = vld [vmem:[%s5323_s13 + $0x10] sm:$0xff]  ;;  %635 = vadd.xlane.f32.xlu0 %v625_v9  ;;  %3857 = vrcp.f32 %v4035_v12  ;;  %v3396_v39 = vld [vmem:[%s4136_s28 + $0xa8] sm:$0xf]  ;;  %v3736_v41 = vld [vmem:[%s4136_s28 + $0xac] sm:$0xf]  ;;  %s5336_s20 = sld [smem:[#allocation4_spill]]  ;;  %s5345_s23 = scalar_lea.vmem %s5317_s7, %s4115_s27 }
  0x27   : > { %639 = vadd.xlane.f32.xlu1 %v627_v8  ;;  %v628_v10 = vld [vmem:[%s5323_s13 + $0x18] sm:$0xff]  ;;  %v3397_v42 = vor.u32 %v3737_v40, %v3396_v39  ;;  %v3384_v45 = vld [vmem:[%s4136_s28 + $0x90] sm:$0xf]  ;;  %v3733_v47 = vld [vmem:[%s4136_s28 + $0x94] sm:$0xf]  ;;  %s5346_s15 = scalar_lea.vmem %s5318_s8, %s4115_s27 }
  0x28   : > { %v4267_v36 = vld [vmem:[%s5323_s13 + $0x20] sm:$0xff]  ;;  %v3398_v43 = vld [vmem:[%s4136_s28 + $0xb4] sm:$0xf0]  ;;  %v3734_v46 = vld [vmem:[%s4136_s28 + $0x98] sm:$0xf0] }
  0x29   : > { %v4261_v35 = vld [vmem:[%s5323_s13 + $0x28] sm:$0xff]  ;;  %v3401_v44 = vor.u32 %v3736_v41, %v3398_v43  ;;  %996 = vmatpush.bf16.msra.mxu0 %v3397_v42  ;;  %v3385_v48 = vor.u32 %v3734_v46, %v3384_v45  ;;  %v3386_v49 = vld [vmem:[%s4136_s28 + $0x9c] sm:$0xf0]  ;;  %v3372_v51 = vld [vmem:[%s4136_s28 + $0x78] sm:$0xf] }
  0x2a   : > { %v4272_v37 = vld [vmem:[%s5323_s13 + $0x30] sm:$0xff]  ;;  %v3389_v50 = vor.u32 %v3733_v47, %v3386_v49  ;;  %v3731_v52 = vld [vmem:[%s4136_s28 + $0x80] sm:$0xf0]  ;;  %v3730_v53 = vld [vmem:[%s4136_s28 + $0x7c] sm:$0xf] }
  0x2b   : > { %v4279_v38 = vld [vmem:[%s5323_s13 + $0x38] sm:$0xff]  ;;  %1025 = vmatpush.bf16.msra.mxu1 %v3401_v44  ;;  %3811 = vmatpush.bf16.msra.mxu2 %v3401_v44  ;;  %v3373_v54 = vor.u32 %v3731_v52, %v3372_v51  ;;  %v3374_v55 = vld [vmem:[%s4136_s28 + $0x84] sm:$0xf0]  ;;  %v3360_v57 = vld [vmem:[%s4136_s28 + $0x60] sm:$0xf]  ;;  %s5335_s18 = scalar_lea.vmem %s5334_s2, %s4115_s27 }
  0x2c   : > { %v3858_v13 = vpop.eup %3857  ;;  %v3377_v56 = vor.u32 %v3730_v53, %v3374_v55  ;;  %v3728_v58 = vld [vmem:[%s4136_s28 + $0x68] sm:$0xf0]  ;;  %v3727_v59 = vld [vmem:[%s4136_s28 + $0x64] sm:$0xf]  ;;  %v3362_v61 = vld [vmem:[%s4136_s28 + $0x6c] sm:$0xf0]  ;;  %s5337_s24 = scalar_lea.vmem %s5336_s20, %s4115_s27 }
  0x2d   : > { %v652_v14 = vmul.f32 128.0, %v3858_v13  ;;  %vm656_vm0 = vweird.f32 %v3858_v13  ;;  %997 = vmatpush.bf16.msra.mxu0 %v3385_v48  ;;  %v3361_v60 = vor.u32 %v3728_v58, %v3360_v57  ;;  %v3365_v62 = vor.u32 %v3727_v59, %v3362_v61  ;;  %v3348_v63 = vld [vmem:[%s4136_s28 + $0x48] sm:$0xf]  ;;  %v3725_v0 = vld [vmem:[%s4136_s28 + $0x50] sm:$0xf0] }
  0x2e   : > { %637 = vadd.xlane.f32.xlu0 %v626_v11  ;;  %v3724_v1 = vld [vmem:[%s4136_s28 + $0x4c] sm:$0xf]  ;;  %v3349_v2 = vor.u32 %v3725_v0, %v3348_v63  ;;  %v3350_v3 = vld [vmem:[%s4136_s28 + $0x54] sm:$0xf0]  ;;  %v3336_v5 = vld [vmem:[%s4136_s28 + $0x30] sm:$0xf] }
  0x2f   : > { %641 = vadd.xlane.f32.xlu1 %v628_v10  ;;  %v653_v15 = vsub.f32 1.0, %v652_v14  ;;  %1026 = vmatpush.bf16.msra.mxu1 %v3389_v50  ;;  %v3353_v4 = vor.u32 %v3724_v1, %v3350_v3  ;;  %v3722_v6 = vld [vmem:[%s4136_s28 + $0x38] sm:$0xf0]  ;;  %v3721_v7 = vld [vmem:[%s4136_s28 + $0x34] sm:$0xf] }
  0x30   : > { %3812 = vmatpush.bf16.msra.mxu2 %v3389_v50  ;;  %v3719_v12 = vld [vmem:[%s4136_s28 + $0x20] sm:$0xf0] }
  0x31   : > { %v654_v16 = vmul.f32 %v3858_v13, %v653_v15  ;;  %998 = vmatpush.bf16.msra.mxu0 %v3373_v54  ;;  %v3326_v15 = vld [vmem:[%s4136_s28 + $0x24] sm:$0xf0] }
  0x33   : > { %v655_v17 = vadd.f32 %v3858_v13, %v654_v16  ;;  %1027 = vmatpush.bf16.msra.mxu1 %v3377_v56 }
  0x34   : > { %3813 = vmatpush.bf16.msra.mxu2 %v3377_v56 }
  0x35   : > { %v4236_v18 = vsel %vm656_vm0, %v3858_v13, %v655_v17  ;;  %999 = vmatpush.bf16.msra.mxu0 %v3361_v60  ;;  %v3718_v13 = vld [vmem:[%s4136_s28 + $0x1c] sm:$0xf] }
  0x36   : > { %v3329_v17 = vor.u32 %v3718_v13, %v3326_v15 }
  0x37   : > { %1028 = vmatpush.bf16.msra.mxu1 %v3365_v62 }
  0x38   : > { %3814 = vmatpush.bf16.msra.mxu2 %v3365_v62 }
  0x39   : > { %1000 = vmatpush.bf16.msra.mxu0 %v3349_v2 }
  0x3b   : > { %1029 = vmatpush.bf16.msra.mxu1 %v3353_v4 }
  0x3c   : > { %3815 = vmatpush.bf16.msra.mxu2 %v3353_v4 }
  0x99   : > { %v636_v20 = vpop.xlane.xlu0 %635 }
  0x9a   : > { %v640_v19 = vpop.xlane.xlu1 %639  ;;  %v658_v22 = vmul.f32 %v4236_v18, %v636_v20  ;;  %v3716_v20 = vld [vmem:[%s4136_s28 + $0x8] sm:$0xf0] }
  0x9b   : > { %v660_v21 = vmul.f32 %v4236_v18, %v640_v19  ;;  %v3312_v19 = vld [vmem:[%s4136_s28] sm:$0xf] }
  0x9c   : > { %v4242_v24 = vsub.f32 %v625_v9, %v658_v22  ;;  %v3338_v9 = vld [vmem:[%s4136_s28 + $0x3c] sm:$0xf0] }
  0x9d   : > { %v4240_v23 = vsub.f32 %v627_v8, %v660_v21  ;;  %v3337_v8 = vor.u32 %v3722_v6, %v3336_v5  ;;  %v3715_v21 = vld [vmem:[%s4136_s28 + $0x4] sm:$0xf] }
  0x9e   : > { %v674_v26 = vmul.f32 %v4242_v24, %v4242_v24 }
  0x9f   : > { %v676_v25 = vmul.f32 %v4240_v23, %v4240_v23  ;;  %1001 = vmatpush.bf16.msra.mxu0 %v3337_v8 }
  0xa0   : > { %682 = vadd.xlane.f32.xlu2 %v674_v26  ;;  %v3313_v26 = vor.u32 %v3716_v20, %v3312_v19  ;;  %v4365_v19 = vld [vmem:[%s5337_s24] ss:$0 sm:$0xff] }
  0xa1   : > { %686 = vadd.xlane.f32.xlu0 %v676_v25  ;;  %v638_v28 = vpop.xlane.xlu0 %637 }
  0xa2   : > { %v642_v27 = vpop.xlane.xlu1 %641  ;;  %v659_v30 = vmul.f32 %v4236_v18, %v638_v28 }
  0xa3   : > { %v661_v29 = vmul.f32 %v4236_v18, %v642_v27  ;;  %v3314_v27 = vld [vmem:[%s4136_s28 + $0xc] sm:$0xf0] }
  0xa4   : > { %v4252_v32 = vsub.f32 %v626_v11, %v659_v30  ;;  %v3324_v11 = vld [vmem:[%s4136_s28 + $0x18] sm:$0xf]  ;;  %v3317_v28 = vor.u32 %v3715_v21, %v3314_v27 }
  0xa5   : > { %v4250_v31 = vsub.f32 %v628_v10, %v661_v29  ;;  %v3341_v10 = vor.u32 %v3721_v7, %v3338_v9  ;;  %v3325_v14 = vor.u32 %v3719_v12, %v3324_v11  ;;  %v4354_v12 = vld [vmem:[%s5335_s18] ss:$0 sm:$0xff] }
  0xa6   : > { %v675_v34 = vmul.f32 %v4252_v32, %v4252_v32 }
  0xa7   : > { %v677_v33 = vmul.f32 %v4250_v31, %v4250_v31  ;;  %1030 = vmatpush.bf16.msra.mxu1 %v3341_v10  ;;  %3816 = vmatpush.bf16.msra.mxu2 %v3341_v10 }
  0xa8   : > { %684 = vadd.xlane.f32.xlu2 %v675_v34  ;;  %1002 = vmatpush.bf16.msra.mxu0 %v3325_v14 }
  0xa9   : > { %688 = vadd.xlane.f32.xlu1 %v677_v33  ;;  %645 = vadd.xlane.f32.xlu0 %v4261_v35 }
  0xab   : > { %1031 = vmatpush.bf16.msra.mxu1 %v3329_v17  ;;  %3817 = vmatpush.bf16.msra.mxu2 %v3329_v17 }
  0xac   : > { %1003 = vmatpush.bf16.msra.mxu0 %v3313_v26 }
  0xaf   : > { %1032 = vmatpush.bf16.msra.mxu1 %v3317_v28  ;;  %3818 = vmatpush.bf16.msra.mxu2 %v3317_v28 }
  0xb0   : > { %643 = vadd.xlane.f32.xlu2 %v4267_v36 }
  0xb1   : > { %647 = vadd.xlane.f32.xlu1 %v4272_v37 }
  0xb8   : > { %649 = vadd.xlane.f32.xlu2 %v4279_v38 }
 0x113   : > { %v683_v16 = vpop.xlane.xlu2 %682 }
 0x114   : > { %v698_v22 = vmul.f32 %v683_v16, %v4236_v18  ;;  %v687_v25 = vpop.xlane.xlu0 %686 }
 0x115   : > { %v700_v30 = vmul.f32 %v687_v25, %v4236_v18 }
 0x116   : > { %v706_v29 = vadd.f32 1e-06, %v698_v22 }
 0x117   : > { %v4316_v33 = vadd.f32 1e-06, %v700_v30 }
 0x118   : > { %3859 = vrsqrt.f32 %v706_v29  ;;  %vm720_vm2 = vweird.f32 %v706_v29 }
 0x119   : > { %3861 = vrsqrt.f32 %v4316_v33  ;;  %vm740_vm9 = vweird.f32 %v4316_v33 }
 0x11b   : > { %v685_v39 = vpop.xlane.xlu2 %684 }
 0x11c   : > { %v689_v34 = vpop.xlane.xlu1 %688  ;;  %v699_v41 = vmul.f32 %v685_v39, %v4236_v18  ;;  %v646_v42 = vpop.xlane.xlu0 %645 }
 0x11d   : > { %v701_v40 = vmul.f32 %v689_v34, %v4236_v18  ;;  %v663_v43 = vmul.f32 %v4236_v18, %v646_v42 }
 0x11e   : > { %v3860_v44 = vpop.eup %3859  ;;  %v707_v46 = vadd.f32 1e-06, %v699_v41 }
 0x11f   : > { %v4321_v45 = vadd.f32 1e-06, %v701_v40  ;;  %v715_v47 = vmul.f32 %v3860_v44, %v706_v29  ;;  %v4325_v48 = vsub.f32 %v4261_v35, %v663_v43  ;;  %v3862_v56 = vpop.eup %3861  ;;  %vm721_vm1 = vweird.f32 %v3860_v44 }
 0x120   : > { %v735_v63 = vmul.f32 %v3862_v56, %v4316_v33  ;;  %vm722_vm3 = vmor %vm720_vm2, %vm721_vm1  ;;  %vm730_vm5 = vweird.f32 %v707_v46  ;;  %vm741_vm10 = vweird.f32 %v3862_v56 }
 0x121   : > { %3863 = vrsqrt.f32 %v4321_v45  ;;  %v716_v49 = vmul.f32 %v3860_v44, %v715_v47  ;;  %v679_v50 = vmul.f32 %v4325_v48, %v4325_v48  ;;  %vm750_vm7 = vweird.f32 %v4321_v45  ;;  %vm742_vm12 = vmor %vm740_vm9, %vm741_vm10 }
 0x122   : > { %3865 = vrsqrt.f32 %v707_v46  ;;  %v736_v5 = vmul.f32 %v3862_v56, %v735_v63  ;;  %vm1089_vm9 = vcmask 523264  }
 0x123   : > { %v717_v51 = vmul.f32 0.5, %v716_v49  ;;  %v644_v52 = vpop.xlane.xlu2 %643  ;;  %692 = vadd.xlane.f32.xlu1 %v679_v50 }
 0x124   : > { %v648_v53 = vpop.xlane.xlu1 %647  ;;  %v662_v54 = vmul.f32 %v4236_v18, %v644_v52  ;;  %v737_v13 = vmul.f32 0.5, %v736_v5  ;;  %v3392_v52 = vld [vmem:[%s4136_s28 + $0x98] sm:$0xf] }
 0x125   : > { %v664_v55 = vmul.f32 %v4236_v18, %v648_v53  ;;  %v718_v57 = vsub.f32 1.5, %v717_v51  ;;  %v3735_v53 = vld [vmem:[%s4136_s28 + $0xa0] sm:$0xf0] }
 0x126   : > { %v4333_v35 = vsub.f32 %v4267_v36, %v662_v54  ;;  %v738_v20 = vsub.f32 1.5, %v737_v13 }
 0x127   : > { %v3864_v58 = vpop.eup %3863  ;;  %v4336_v59 = vsub.f32 %v4272_v37, %v664_v55  ;;  %v719_v62 = vmul.f32 %v3860_v44, %v718_v57  ;;  %v3393_v55 = vor.u32 %v3735_v53, %v3392_v52 }
 0x128   : > { %v3866_v60 = vpop.eup %3865  ;;  %v745_v61 = vmul.f32 %v3864_v58, %v4321_v45  ;;  %v678_v1 = vmul.f32 %v4333_v35, %v4333_v35  ;;  %vm751_vm8 = vweird.f32 %v3864_v58  ;;  %v739_v26 = vmul.f32 %v3862_v56, %v738_v20  ;;  %v3738_v45 = vld [vmem:[%s4136_s28 + $0xb8] sm:$0xf0] }
 0x129   : > { %v725_v0 = vmul.f32 %v3866_v60, %v707_v46  ;;  %v680_v2 = vmul.f32 %v4336_v59, %v4336_v59  ;;  %v723_v4 = vsel %vm722_vm3, %v3860_v44, %v719_v62  ;;  %vm731_vm4 = vweird.f32 %v3866_v60  ;;  %vm752_vm11 = vmor %vm750_vm7, %vm751_vm8  ;;  %v3404_v44 = vld [vmem:[%s4136_s28 + $0xb0] sm:$0xf] }
 0x12a   : > { %v746_v36 = vmul.f32 %v3864_v58, %v745_v61  ;;  %690 = vadd.xlane.f32.xlu0 %v678_v1  ;;  %v794_v11 = vmul.f32 %v723_v4, %v4242_v24  ;;  %vm732_vm6 = vmor %vm730_vm5, %vm731_vm4  ;;  %v743_v29 = vsel %vm742_vm12, %v3862_v56, %v739_v26  ;;  %v3405_v46 = vor.u32 %v3738_v45, %v3404_v44  ;;  %v3732_v61 = vld [vmem:[%s4136_s28 + $0x88] sm:$0xf0] }
 0x12b   : > { %v726_v3 = vmul.f32 %v3866_v60, %v725_v0  ;;  %v650_v37 = vpop.xlane.xlu2 %649  ;;  %694 = vadd.xlane.f32.xlu2 %v680_v2  ;;  %v796_v33 = vmul.f32 %v743_v29, %v4240_v23 }
 0x12c   : > { %v665_v7 = vmul.f32 %v4236_v18, %v650_v37  ;;  %v747_v8 = vmul.f32 0.5, %v746_v36  ;;  %v805_v24 = vmul.f32 %v4354_v12, %v794_v11  ;;  %1054 = vmatpush.bf16.msrb.mxu2 %v3405_v46  ;;  %v3368_v36 = vld [vmem:[%s4136_s28 + $0x68] sm:$0xf] }
 0x12d   : > { %v727_v6 = vmul.f32 0.5, %v726_v3  ;;  %v807_v39 = vmul.f32 %v4354_v12, %v796_v33  ;;  %v3729_v3 = vld [vmem:[%s4136_s28 + $0x70] sm:$0xf0] }
 0x12e   : > { %v4346_v10 = vsub.f32 %v4279_v38, %v665_v7  ;;  %v748_v16 = vsub.f32 1.5, %v747_v8 }
 0x12f   : > { %v728_v9 = vsub.f32 1.5, %v727_v6  ;;  %v818_v41 = vadd.f32 %v4365_v19, %v807_v39  ;;  %v3369_v6 = vor.u32 %v3729_v3, %v3368_v36  ;;  %v4430_v3 = vld [vmem:[%s4145_s16] sm:$0x7]  ;;  %s4036_s16 = smov 64  }
 0x130   : > { %v681_v15 = vmul.f32 %v4346_v10, %v4346_v10  ;;  %v749_v22 = vmul.f32 %v3864_v58, %v748_v16  ;;  %1055 = vmatpush.bf16.msrb.mxu2 %v3393_v55 }
 0x131   : > { %v729_v14 = vmul.f32 %v3866_v60, %v728_v9 }
 0x132   : > { %696 = vadd.xlane.f32.xlu0 %v681_v15  ;;  %v753_v28 = vsel %vm752_vm11, %v3864_v58, %v749_v22  ;;  %v3726_v15 = vld [vmem:[%s4136_s28 + $0x58] sm:$0xf0]  ;;  %vm1132_vm11 = vcmask 261120  }
 0x133   : > { %v733_v17 = vsel %vm732_vm6, %v3866_v60, %v729_v14  ;;  %v797_v30 = vmul.f32 %v753_v28, %v4250_v31  ;;  %v3380_v60 = vld [vmem:[%s4136_s28 + $0x80] sm:$0xf]  ;;  %v3356_v14 = vld [vmem:[%s4136_s28 + $0x50] sm:$0xf] }
 0x134   : > { %v795_v38 = vmul.f32 %v733_v17, %v4252_v32  ;;  %v816_v32 = vadd.f32 %v4365_v19, %v805_v24  ;;  %v3381_v63 = vor.u32 %v3732_v61, %v3380_v60 }
 0x135   : > { %v808_v34 = vmul.f32 %v4354_v12, %v797_v30 }
 0x136   : > { %v806_v21 = vmul.f32 %v4354_v12, %v795_v38  ;;  %1056 = vmatpush.bf16.msrb.mxu2 %v3381_v63  ;;  %v3357_v38 = vor.u32 %v3726_v15, %v3356_v14 }
 0x137   : > { %v819_v40 = vadd.f32 %v4365_v19, %v808_v34 }
 0x138   : > { %v817_v25 = vadd.f32 %v4365_v19, %v806_v21 }
 0x139   : > { %v4382_v42 = vpack.c.bf16 %v819_v40, %v818_v41  ;;  %v3332_v40 = vld [vmem:[%s4136_s28 + $0x20] sm:$0xf]  ;;  %v3720_v41 = vld [vmem:[%s4136_s28 + $0x28] sm:$0xf0] }
 0x13a   : > { %v4372_v27 = vpack.c.bf16 %v817_v25, %v816_v32  ;;  %1057 = vmatpush.bf16.msrb.mxu2 %v3369_v6  ;;  %v3344_v32 = vld [vmem:[%s4136_s28 + $0x38] sm:$0xf]  ;;  %v3723_v25 = vld [vmem:[%s4136_s28 + $0x40] sm:$0xf0] }
 0x13b   : > { %v3345_v28 = vor.u32 %v3723_v25, %v3344_v32 }
 0x13c   : > { %1004 = vmatmul.bf16.vlgmr.msra.gmra.mxu0 %v4372_v27  ;;  %1033 = vmatmul.bf16.vlgmr.msra.gmra.mxu1 %v4372_v27 }
 0x13e   : > { %1058 = vmatpush.bf16.msrb.mxu2 %v3357_v38 }
 0x142   : > { %1059 = vmatpush.bf16.msrb.mxu2 %v3345_v28  ;;  %v1125_v28 = vlaneseq }
 0x14c   : > { %1009 = vmatmul.bf16.gmra.mxu0 %v4382_v42  ;;  %1038 = vmatmul.bf16.gmra.mxu1 %v4382_v42 }
 0x196   : > { %v693_v43 = vpop.xlane.xlu1 %692 }
 0x197   : > { %v703_v31 = vmul.f32 %v693_v43, %v4236_v18 }
 0x199   : > { %v711_v23 = vadd.f32 1e-06, %v703_v31  ;;  %v3333_v31 = vor.u32 %v3720_v41, %v3332_v40 }
 0x19b   : > { %3867 = vrsqrt.f32 %v711_v23  ;;  %vm770_vm13 = vweird.f32 %v711_v23  ;;  %1060 = vmatpush.bf16.msrb.mxu2 %v3333_v31 }
 0x19d   : > { %v691_v47 = vpop.xlane.xlu0 %690 }
 0x19e   : > { %v702_v49 = vmul.f32 %v691_v47, %v4236_v18  ;;  %v695_v50 = vpop.xlane.xlu2 %694 }
 0x19f   : > { %v704_v51 = vmul.f32 %v695_v50, %v4236_v18  ;;  %v3717_v50 = vld [vmem:[%s4136_s28 + $0x10] sm:$0xf0] }
 0x1a0   : > { %v710_v54 = vadd.f32 1e-06, %v702_v49  ;;  %v3320_v49 = vld [vmem:[%s4136_s28 + $0x8] sm:$0xf] }
 0x1a1   : > { %v3868_v56 = vpop.eup %3867  ;;  %v4393_v57 = vadd.f32 1e-06, %v704_v51  ;;  %v3321_v52 = vor.u32 %v3717_v50, %v3320_v49 }
 0x1a2   : > { %v765_v58 = vmul.f32 %v3868_v56, %v711_v23  ;;  %3869 = vrsqrt.f32 %v710_v54  ;;  %vm771_vm14 = vweird.f32 %v3868_v56  ;;  %vm760_vm0 = vweird.f32 %v710_v54 }
 0x1a3   : > { %3871 = vrsqrt.f32 %v4393_v57  ;;  %vm772_vm15 = vmor %vm770_vm13, %vm771_vm14  ;;  %vm780_vm3 = vweird.f32 %v4393_v57  ;;  %1061 = vmatpush.bf16.msrb.mxu2 %v3321_v52 }
 0x1a4   : > { %v766_v62 = vmul.f32 %v3868_v56, %v765_v58 }
 0x1a5   : > { %v697_v0 = vpop.xlane.xlu0 %696 }
 0x1a6   : > { %v767_v1 = vmul.f32 0.5, %v766_v62  ;;  %v705_v2 = vmul.f32 %v697_v0, %v4236_v18 }
 0x1a8   : > { %v3870_v37 = vpop.eup %3869  ;;  %v768_v4 = vsub.f32 1.5, %v767_v1  ;;  %v713_v5 = vadd.f32 1e-06, %v705_v2 }
 0x1a9   : > { %v3872_v7 = vpop.eup %3871  ;;  %v755_v8 = vmul.f32 %v3870_v37, %v710_v54  ;;  %vm761_vm1 = vweird.f32 %v3870_v37 }
 0x1aa   : > { %v769_v9 = vmul.f32 %v3868_v56, %v768_v4  ;;  %v775_v11 = vmul.f32 %v3872_v7, %v4393_v57  ;;  %3873 = vrsqrt.f32 %v713_v5  ;;  %vm762_vm2 = vmor %vm760_vm0, %vm761_vm1  ;;  %vm781_vm4 = vweird.f32 %v3872_v7 }
 0x1ab   : > { %v756_v13 = vmul.f32 %v3870_v37, %v755_v8  ;;  %vm790_vm5 = vweird.f32 %v713_v5  ;;  %vm4412_vm7 = vmor %vm780_vm3, %vm781_vm4 }
 0x1ac   : > { %v773_v16 = vsel %vm772_vm15, %v3868_v56, %v769_v9  ;;  %v776_v17 = vmul.f32 %v3872_v7, %v775_v11  ;;  %v4441_v11 = vperm.slane %v4430_v3, 0 }
 0x1ad   : > { %v757_v24 = vmul.f32 0.5, %v756_v13  ;;  %v799_v20 = vmul.f32 %v773_v16, %v4325_v48 }
 0x1ae   : > { %v777_v21 = vmul.f32 0.5, %v776_v17 }
 0x1af   : > { %v758_v22 = vsub.f32 1.5, %v757_v24  ;;  %v810_v34 = vmul.f32 %v4354_v12, %v799_v20 }
 0x1b0   : > { %v3874_v26 = vpop.eup %3873  ;;  %v778_v30 = vsub.f32 1.5, %v777_v21 }
 0x1b1   : > { %v759_v29 = vmul.f32 %v3870_v37, %v758_v22  ;;  %v785_v33 = vmul.f32 %v3874_v26, %v713_v5  ;;  %vm791_vm6 = vweird.f32 %v3874_v26  ;;  %v821_v47 = vadd.f32 %v4365_v19, %v810_v34 }
 0x1b2   : > { %v779_v23 = vmul.f32 %v3872_v7, %v778_v30  ;;  %vm792_vm8 = vmor %vm790_vm5, %vm791_vm6 }
 0x1b3   : > { %v763_v39 = vsel %vm762_vm2, %v3870_v37, %v759_v29  ;;  %v786_v48 = vmul.f32 %v3874_v26, %v785_v33 }
 0x1b4   : > { %v798_v43 = vmul.f32 %v763_v39, %v4333_v35  ;;  %v783_v54 = vsel %vm4412_vm7, %v3872_v7, %v779_v23 }
 0x1b5   : > { %v787_v44 = vmul.f32 0.5, %v786_v48  ;;  %v800_v58 = vmul.f32 %v783_v54, %v4336_v59 }
 0x1b6   : > { %v809_v46 = vmul.f32 %v4354_v12, %v798_v43 }
 0x1b7   : > { %v788_v51 = vsub.f32 1.5, %v787_v44  ;;  %v811_v62 = vmul.f32 %v4354_v12, %v800_v58 }
 0x1b8   : > { %v820_v53 = vadd.f32 %v4365_v19, %v809_v46 }
 0x1b9   : > { %v1034_v35 = vpop.f32.mrf.mxu1  ;;  %v789_v55 = vmul.f32 %v3874_v26, %v788_v51  ;;  %v822_v0 = vadd.f32 %v4365_v19, %v811_v62  ;;  %v1005_v59 = vpop.f32.mrf.mxu0 }
 0x1ba   : > { %v826_v56 = vpack.c.bf16 %v821_v47, %v820_v53  ;;  %v1006_v15 = vadd.f32 %v1005_v59, %v4441_v11 }
 0x1bb   : > { %v793_v57 = vsel %vm792_vm8, %v3874_v26, %v789_v55 }
 0x1bc   : > { %v801_v60 = vmul.f32 %v793_v57, %v4346_v10  ;;  %1043 = vmatmul.bf16.vlgmr.msra.gmra.mxu2 %v826_v56  ;;  %1014 = vmatmul.bf16.gmra.mxu0 %v826_v56  ;;  %v863_v10 = vperm.slane %v4430_v3, 1  ;;  %v864_v57 = vperm.slane %v4430_v3, 2 }
 0x1be   : > { %v812_v63 = vmul.f32 %v4354_v12, %v801_v60 }
 0x1c0   : > { %v823_v1 = vadd.f32 %v4365_v19, %v812_v63  ;;  %v1035_v19 = vadd.f32 %v1034_v35, %v863_v10 }
 0x1c1   : > { %v1036_v61 = vpop.f32.mrf.mxu1  ;;  %v1007_v8 = vpop.f32.mrf.mxu0 }
 0x1c2   : > { %v827_v36 = vpack.c.bf16 %v823_v1, %v822_v0  ;;  %v1037_v12 = vadd.f32 %v1036_v61, %v863_v10  ;;  %v1008_v14 = vadd.f32 %v1007_v8, %v4441_v11 }
 0x1c4   : > { %v4437_v9 = vpack.c.bf16 %v1037_v12, %v1035_v19  ;;  %v4447_v17 = vpack.c.bf16 %v1008_v14, %v1006_v15 }
 0x1c6   : > { %v1097_v13 = vsel %vm1089_vm9, %v4437_v9, 0 }
 0x1c9   : > { %v1039_v2 = vpop.f32.mrf.mxu1  ;;  %v1010_v16 = vpop.f32.mrf.mxu0 }
 0x1ca   : > { %v1040_v4 = vadd.f32 %v1039_v2, %v863_v10  ;;  %v1011_v24 = vadd.f32 %v1010_v16, %v4441_v11 }
 0x1cc   : > { %1048 = vmatmul.bf16.gmra.mxu2 %v827_v36  ;;  %1019 = vmatmul.bf16.gmra.mxu0 %v827_v36 }
 0x1d1   : > { %v1041_v37 = vpop.f32.mrf.mxu1  ;;  %v1012_v38 = vpop.f32.mrf.mxu0 }
 0x1d2   : > { %v1042_v5 = vadd.f32 %v1041_v37, %v863_v10 }
 0x1d4   : > { %v4433_v6 = vpack.c.bf16 %v1042_v5, %v1040_v4 }
 0x1d6   : > { %v1100_v7 = vsel %vm1089_vm9, %v4433_v6, 0 }
 0x1d7   : > { %1108 = vmatpush.bf16.xpose.msra.mxu3 %v1100_v7 }
 0x1dc   : > { %1062 = vmatmul.bf16.vlgmr.msrb.gmra.mxu2 %v4372_v27  ;;  %v1013_v27 = vadd.f32 %v1012_v38, %v4441_v11 }
 0x1de   : > { %v4454_v20 = vpack.c.bf16 %v1013_v27, %v1011_v24 }
 0x1df   : > { %1109 = vmatpush.bf16.xpose.msra.mxu3 %v1097_v13 }
 0x1e6   : > { %3406 = vmatmul.msk.bf16.vlgmr.msra.gmra.mxu3 %vm1089_vm9, %v4447_v17 }
 0x1ec   : > { %1067 = vmatmul.bf16.gmra.mxu2 %v4382_v42  ;;  %v4458_v42 = vand.u32 127, %v1125_v28 }
 0x1ee   : > { %vm1127_vm10 = vcmp.lt.s32.totalorder %v4458_v42, 17 }
 0x1f6   : > { %3407 = vmatmul.msk.bf16.gmra.mxu3 %vm1089_vm9, %v4454_v20 }
 0x1fc   : > { %1072 = vmatmul.bf16.gmra.mxu2 %v826_v56 }
 0x20c   : > { %1077 = vmatmul.bf16.gmra.mxu2 %v827_v36 }
 0x239   : > { %v1015_v34 = vpop.f32.mrf.mxu0 }
 0x23a   : > { %v1016_v50 = vadd.f32 %v1015_v34, %v4441_v11 }
 0x23f   : > { %v1044_v21 = vpop.f32.mrf.mxu2 }
 0x240   : > { %v1045_v39 = vadd.f32 %v1044_v21, %v863_v10 }
 0x241   : > { %v1017_v47 = vpop.f32.mrf.mxu0 }
 0x242   : > { %v1018_v51 = vadd.f32 %v1017_v47, %v4441_v11 }
 0x244   : > { %v4476_v54 = vpack.c.bf16 %v1018_v51, %v1016_v50 }
 0x247   : > { %v1046_v22 = vpop.f32.mrf.mxu2 }
 0x248   : > { %v1047_v48 = vadd.f32 %v1046_v22, %v863_v10 }
 0x249   : > { %v1020_v56 = vpop.f32.mrf.mxu0 }
 0x24a   : > { %v4465_v23 = vpack.c.bf16 %v1047_v48, %v1045_v39  ;;  %v1021_v4 = vadd.f32 %v1020_v56, %v4441_v11 }
 0x24c   : > { %v1471_v46 = vsel %vm1089_vm9, %v4465_v23, 0 }
 0x24f   : > { %v1049_v32 = vpop.f32.mrf.mxu2 }
 0x250   : > { %v1050_v29 = vadd.f32 %v1049_v32, %v863_v10 }
 0x251   : > { %v1022_v3 = vpop.f32.mrf.mxu0 }
 0x252   : > { %v1023_v5 = vadd.f32 %v1022_v3, %v4441_v11 }
 0x254   : > { %v1459_v8 = vpack.c.bf16 %v1023_v5, %v1021_v4 }
 0x257   : > { %v1051_v25 = vpop.f32.mrf.mxu2 }
 0x258   : > { %v1052_v30 = vadd.f32 %v1051_v25, %v863_v10 }
 0x25a   : > { %v4460_v33 = vpack.c.bf16 %v1052_v30, %v1050_v29 }
 0x25c   : > { %v1474_v41 = vsel %vm1089_vm9, %v4460_v33, 0 }
 0x25d   : > { %1482 = vmatpush.bf16.xpose.msrb.mxu1 %v1474_v41 }
 0x25f   : > { %v1063_v26 = vpop.f32.mrf.mxu2 }
 0x260   : > { %v1064_v36 = vadd.f32 %v1063_v26, %v864_v57 }
 0x265   : > { %1483 = vmatpush.bf16.xpose.msrb.mxu1 %v1471_v46 }
 0x267   : > { %v1065_v40 = vpop.f32.mrf.mxu2 }
 0x268   : > { %v1066_v0 = vadd.f32 %v1065_v40, %v864_v57 }
 0x269   : > { %v1111_v43 = vpop.f32.mrf.mxu3 }
 0x26a   : > { %v1121_v31 = vmul.f32 0.125, %v1111_v43  ;;  %v4488_v10 = vpack.c.bf16 %v1066_v0, %v1064_v36 }
 0x26c   : > { %v1128_v44 = vsel %vm1127_vm10, %v1121_v31, -1e+30  ;;  %3414 = vmatmul.msk.bf16.vlgmr.msrb.gmra.mxu1 %vm1089_vm9, %v4476_v54 }
 0x26d   : > { %v1133_v45 = vsel %vm1132_vm11, %v1128_v44, -inf }
 0x26e   : > { %1134 = vmax.xlane.f32.xlu1 %v1133_v45 }
 0x26f   : > { %v1068_v49 = vpop.f32.mrf.mxu2 }
 0x270   : > { %v1069_v60 = vadd.f32 %v1068_v49, %v864_v57 }
 0x271   : > { %v1113_v52 = vpop.f32.mrf.mxu3 }
 0x272   : > { %v1122_v35 = vmul.f32 0.125, %v1113_v52 }
 0x274   : > { %v1129_v53 = vsel %vm1127_vm10, %v1122_v35, -1e+30 }
 0x275   : > { %v1136_v55 = vsel %vm1132_vm11, %v1129_v53, -inf }
 0x276   : > { %1137 = vmax.xlane.f32.xlu2 %v1136_v55 }
 0x277   : > { %v1070_v58 = vpop.f32.mrf.mxu2 }
 0x278   : > { %v1071_v61 = vadd.f32 %v1070_v58, %v864_v57 }
 0x279   : > { %v1116_v62 = vpop.f32.mrf.mxu3 }
 0x27a   : > { %v1123_v63 = vmul.f32 0.125, %v1116_v62  ;;  %v4482_v1 = vpack.c.bf16 %v1071_v61, %v1069_v60 }
 0x27c   : > { %v1130_v2 = vsel %vm1127_vm10, %v1123_v63, -1e+30  ;;  %1243 = vmatpush.bf16.msrb.mxu3 %v4482_v1  ;;  %3415 = vmatmul.msk.bf16.gmra.mxu1 %vm1089_vm9, %v1459_v8 }
 0x27d   : > { %v1139_v59 = vsel %vm1132_vm11, %v1130_v2, -inf }
 0x27e   : > { %1140 = vmax.xlane.f32.xlu0 %v1139_v59 }
 0x27f   : > { %v1073_v37 = vpop.f32.mrf.mxu2 }
 0x280   : > { %1244 = vmatpush.bf16.msrb.mxu3 %v4488_v10  ;;  %v1074_v27 = vadd.f32 %v1073_v37, %v864_v57 }
 0x281   : > { %v1118_v12 = vpop.f32.mrf.mxu3 }
 0x282   : > { %v1124_v7 = vmul.f32 0.125, %v1118_v12 }
 0x284   : > { %v1131_v19 = vsel %vm1127_vm10, %v1124_v7, -1e+30 }
 0x285   : > { %v1142_v13 = vsel %vm1132_vm11, %v1131_v19, -inf }
 0x286   : > { %1143 = vmax.xlane.f32.xlu1 %v1142_v13 }
 0x287   : > { %v1075_v14 = vpop.f32.mrf.mxu2 }
 0x288   : > { %v1076_v24 = vadd.f32 %v1075_v14, %v864_v57 }
 0x28a   : > { %v4499_v22 = vpack.c.bf16 %v1076_v24, %v1074_v27 }
 0x28f   : > { %v1078_v15 = vpop.f32.mrf.mxu2 }
 0x290   : > { %v1079_v16 = vadd.f32 %v1078_v15, %v864_v57 }
 0x297   : > { %v1080_v38 = vpop.f32.mrf.mxu2 }
 0x298   : > { %v1081_v11 = vadd.f32 %v1080_v38, %v864_v57 }
 0x29a   : > { %v4497_v21 = vpack.c.bf16 %v1081_v11, %v1079_v16 }
 0x29c   : > { %1613 = vmatpush.bf16.msra.mxu2 %v4497_v21 }
 0x2a0   : > { %1614 = vmatpush.bf16.msra.mxu2 %v4499_v22 }
 0x2e1   : > { %v1135_v32 = vpop.xlane.xlu1 %1134 }
 0x2e2   : > { %v1145_v25 = vsub.f32 %v1128_v44, %v1135_v32 }
 0x2e4   : > { %v1149_v26 = vmul.f32 1.442695, %v1145_v25 }
 0x2e6   : > { %3875 = vpow2.f32 %v1149_v26 }
 0x2e9   : > { %v1138_v28 = vpop.xlane.xlu2 %1137 }
 0x2ea   : > { %v1146_v29 = vsub.f32 %v1129_v53, %v1138_v28 }
 0x2ec   : > { %v4503_v30 = vpop.eup %3875  ;;  %v1151_v34 = vmul.f32 1.442695, %v1146_v29 }
 0x2ed   : > { %v1157_v39 = vsel %vm1132_vm11, %v4503_v30, 0.0 }
 0x2ee   : > { %3877 = vpow2.f32 %v1151_v34  ;;  %1158 = vadd.xlane.f32.xlu2 %v1157_v39 }
 0x2f1   : > { %v1141_v48 = vpop.xlane.xlu0 %1140 }
 0x2f2   : > { %v1147_v40 = vsub.f32 %v1130_v2, %v1141_v48 }
 0x2f4   : > { %v4507_v41 = vpop.eup %3877  ;;  %v1153_v43 = vmul.f32 1.442695, %v1147_v40 }
 0x2f5   : > { %v1160_v31 = vsel %vm1132_vm11, %v4507_v41, 0.0 }
 0x2f6   : > { %3879 = vpow2.f32 %v1153_v43  ;;  %1161 = vadd.xlane.f32.xlu0 %v1160_v31 }
 0x2f9   : > { %v1144_v44 = vpop.xlane.xlu1 %1143 }
 0x2fa   : > { %v1148_v45 = vsub.f32 %v1131_v19, %v1144_v44 }
 0x2fc   : > { %v4511_v46 = vpop.eup %3879  ;;  %v1155_v47 = vmul.f32 1.442695, %v1148_v45 }
 0x2fd   : > { %v1163_v49 = vsel %vm1132_vm11, %v4511_v46, 0.0 }
 0x2fe   : > { %3881 = vpow2.f32 %v1155_v47  ;;  %1164 = vadd.xlane.f32.xlu1 %v1163_v49 }
 0x304   : > { %v4515_v50 = vpop.eup %3881 }
 0x305   : > { %v1166_v51 = vsel %vm1132_vm11, %v4515_v50, 0.0 }
 0x306   : > { %1167 = vadd.xlane.f32.xlu2 %v1166_v51 }
 0x30a   : > { %1266 = vrot.lane.b32.xlu0 %v4433_v6, %s4036_s16  ;;  %v1485_v6 = vpop.f32.mrf.mxu1 }
 0x30b   : > { %v1495_v52 = vmul.f32 0.125, %v1485_v6 }
 0x312   : > { %1260 = vrot.lane.b32.xlu0 %v4454_v20, %s4036_s16  ;;  %v4536_v20 = vsel %vm1127_vm10, %v1495_v52, -1e+30  ;;  %v1487_v35 = vpop.f32.mrf.mxu1 }
 0x317   : > { %1264 = vrot.lane.b32.xlu1 %v4437_v9, %s4036_s16  ;;  %v1503_v9 = vsel %vm1132_vm11, %v4536_v20, -inf }
 0x31a   : > { %1628 = vrot.lane.b32.xlu0 %v4476_v54, %s4036_s16 }
 0x31e   : > { %1258 = vrot.lane.b32.xlu2 %v4447_v17, %s4036_s16  ;;  %v1496_v17 = vmul.f32 0.125, %v1487_v35 }
 0x31f   : > { %1634 = vrot.lane.b32.xlu1 %v4465_v23, %s4036_s16 }
 0x320   : > { %v4542_v23 = vsel %vm1127_vm10, %v1496_v17, -1e+30 }
 0x326   : > { %1636 = vrot.lane.b32.xlu2 %v4460_v33, %s4036_s16  ;;  %v1506_v33 = vsel %vm1132_vm11, %v4542_v23, -inf }
 0x32e   : > { %1630 = vrot.lane.b32.xlu2 %v1459_v8, %s4036_s16 }
 0x344   : > { %1504 = vmax.xlane.f32.xlu0 %v1503_v9 }
 0x357   : > { %1507 = vmax.xlane.f32.xlu2 %v1506_v33 }
 0x361   : > { %v1159_v53 = vpop.xlane.xlu2 %1158 }
 0x362   : > { %3883 = vrcp.f32 %v1159_v53  ;;  %v1180_v0 = vand.u32 2147483648, %v1159_v53  ;;  %vm1174_vm13 = vweird.f32 %v1159_v53  ;;  %v1178_v36 = vand.u32 2147483647, %v1159_v53 }
 0x364   : > { %v1181_v12 = vor.u32 1.1754944e-38, %v1180_v0  ;;  %vm1179_vm1 = vcmp.eq.f32.partialorder %v1178_v36, 8.507059e+37 }
 0x368   : > { %v3884_v54 = vpop.eup %3883 }
 0x369   : > { %v1170_v55 = vmul.f32 %v3884_v54, %v1159_v53  ;;  %v1162_v56 = vpop.xlane.xlu0 %1161  ;;  %vm1175_vm12 = vweird.f32 %v3884_v54 }
 0x36a   : > { %3885 = vrcp.f32 %v1162_v56  ;;  %vm4546_vm14 = vmor %vm1174_vm13, %vm1175_vm12  ;;  %v1195_v37 = vand.u32 2147483648, %v1162_v56  ;;  %v1193_v5 = vand.u32 2147483647, %v1162_v56  ;;  %vm1189_vm0 = vweird.f32 %v1162_v56 }
 0x36b   : > { %v1171_v57 = vsub.f32 1.0, %v1170_v55 }
 0x36c   : > { %v1196_v13 = vor.u32 1.1754944e-38, %v1195_v37  ;;  %vm1194_vm3 = vcmp.eq.f32.partialorder %v1193_v5, 8.507059e+37 }
 0x36d   : > { %v1172_v58 = vmul.f32 %v3884_v54, %v1171_v57 }
 0x36f   : > { %v1173_v63 = vadd.f32 %v3884_v54, %v1172_v58 }
 0x370   : > { %v3886_v60 = vpop.eup %3885 }
 0x371   : > { %v1185_v61 = vmul.f32 %v3886_v60, %v1162_v56  ;;  %v1165_v62 = vpop.xlane.xlu1 %1164  ;;  %vm1190_vm15 = vweird.f32 %v3886_v60  ;;  %v1177_v4 = vsel %vm4546_vm14, %v3884_v54, %v1173_v63 }
 0x372   : > { %3887 = vrcp.f32 %v1165_v62  ;;  %vm1191_vm2 = vmor %vm1189_vm0, %vm1190_vm15  ;;  %v1182_v16 = vsel %vm1179_vm1, %v1181_v12, %v1177_v4  ;;  %v1210_v40 = vand.u32 2147483648, %v1165_v62  ;;  %vm1204_vm5 = vweird.f32 %v1165_v62 }
 0x373   : > { %v1186_v2 = vsub.f32 1.0, %v1185_v61  ;;  %v1183_v11 = vmul.f32 %v4503_v30, %v1182_v16  ;;  %v1208_v43 = vand.u32 2147483647, %v1165_v62 }
 0x374   : > { %v1211_v47 = vor.u32 1.1754944e-38, %v1210_v40 }
 0x375   : > { %v1187_v3 = vmul.f32 %v3886_v60, %v1186_v2  ;;  %vm1209_vm8 = vcmp.eq.f32.partialorder %v1208_v43, 8.507059e+37 }
 0x377   : > { %v1188_v7 = vadd.f32 %v3886_v60, %v1187_v3 }
 0x378   : > { %v3888_v19 = vpop.eup %3887 }
 0x379   : > { %v1192_v8 = vsel %vm1191_vm2, %v3886_v60, %v1188_v7  ;;  %v1200_v14 = vmul.f32 %v3888_v19, %v1165_v62  ;;  %v1168_v15 = vpop.xlane.xlu2 %1167  ;;  %vm1205_vm4 = vweird.f32 %v3888_v19 }
 0x37a   : > { %3889 = vrcp.f32 %v1168_v15  ;;  %v1197_v27 = vsel %vm1194_vm3, %v1196_v13, %v1192_v8  ;;  %vm1206_vm6 = vmor %vm1204_vm5, %vm1205_vm4  ;;  %v1225_v30 = vand.u32 2147483648, %v1168_v15  ;;  %vm1219_vm12 = vweird.f32 %v1168_v15 }
 0x37b   : > { %v1201_v38 = vsub.f32 1.0, %v1200_v14  ;;  %v1198_v32 = vmul.f32 %v4507_v41, %v1197_v27  ;;  %v1223_v41 = vand.u32 2147483647, %v1168_v15 }
 0x37c   : > { %v1267_v24 = vpop.permute.xlu0 %1266  ;;  %v1226_v51 = vor.u32 1.1754944e-38, %v1225_v30 }
 0x37d   : > { %v1202_v25 = vmul.f32 %v3888_v19, %v1201_v38  ;;  %v1278_v26 = vsel %vm1089_vm9, %v1267_v24, 0  ;;  %v1229_v28 = vpack.c.bf16 %v1198_v32, %v1183_v11  ;;  %vm1224_vm14 = vcmp.eq.f32.partialorder %v1223_v41, 8.507059e+37 }
 0x37e   : > { %1286 = vmatpush.bf16.xpose.msra.mxu3 %v1278_v26 }
 0x37f   : > { %3408 = vmatmul.msk.bf16.vlgmr.msrb.gmra.mxu3 %vm1132_vm11, %v1229_v28  ;;  %v1203_v34 = vadd.f32 %v3888_v19, %v1202_v25 }
 0x380   : > { %v3890_v29 = vpop.eup %3889 }
 0x381   : > { %v1215_v39 = vmul.f32 %v3890_v29, %v1168_v15  ;;  %v1259_v48 = vpop.permute.xlu2 %1258  ;;  %vm1220_vm7 = vweird.f32 %v3890_v29  ;;  %v1207_v45 = vsel %vm1206_vm6, %v3888_v19, %v1203_v34 }
 0x382   : > { %vm1221_vm13 = vmor %vm1219_vm12, %vm1220_vm7  ;;  %v1212_v6 = vsel %vm1209_vm8, %v1211_v47, %v1207_v45 }
 0x383   : > { %v1216_v31 = vsub.f32 1.0, %v1215_v39  ;;  %v1213_v54 = vmul.f32 %v4511_v46, %v1212_v6 }
 0x384   : > { %v1261_v60 = vpop.permute.xlu0 %1260 }
 0x385   : > { %v1217_v44 = vmul.f32 %v3890_v29, %v1216_v31 }
 0x387   : > { %v1218_v49 = vadd.f32 %v3890_v29, %v1217_v44 }
 0x389   : > { %v1637_v52 = vpop.permute.xlu2 %1636  ;;  %v1265_v9 = vpop.permute.xlu1 %1264  ;;  %v1222_v35 = vsel %vm1221_vm13, %v3890_v29, %v1218_v49 }
 0x38a   : > { %v1648_v17 = vsel %vm1089_vm9, %v1637_v52, 0  ;;  %v1275_v33 = vsel %vm1089_vm9, %v1265_v9, 0  ;;  %v1227_v53 = vsel %vm1224_vm14, %v1226_v51, %v1222_v35  ;;  %v1490_v51 = vpop.f32.mrf.mxu1 }
 0x38b   : > { %1287 = vmatpush.bf16.xpose.msra.mxu3 %v1275_v33  ;;  %v1228_v55 = vmul.f32 %v4515_v50, %v1227_v53  ;;  %v1497_v53 = vmul.f32 0.125, %v1490_v51 }
 0x38c   : > { %v1629_v61 = vpop.permute.xlu0 %1628 }
 0x38d   : > { %v1230_v56 = vpack.c.bf16 %v1228_v55, %v1213_v54  ;;  %v4616_v55 = vsel %vm1127_vm10, %v1497_v53, -1e+30 }
 0x38f   : > { %3409 = vmatmul.msk.bf16.gmra.mxu3 %vm1132_vm11, %v1230_v56 }
 0x391   : > { %v1635_v57 = vpop.permute.xlu1 %1634  ;;  %v1631_v62 = vpop.permute.xlu2 %1630 }
 0x392   : > { %v1645_v58 = vsel %vm1089_vm9, %v1635_v57, 0  ;;  %v1492_v56 = vpop.f32.mrf.mxu1 }
 0x393   : > { %1656 = vmatpush.bf16.xpose.msrb.mxu3 %v1648_v17 }
 0x39b   : > { %1657 = vmatpush.bf16.xpose.msrb.mxu3 %v1645_v58 }
 0x39f   : > { %3410 = vmatmul.msk.bf16.vlgmr.msra.gmra.mxu3 %vm1089_vm9, %v1259_v48 }
 0x3af   : > { %3411 = vmatmul.msk.bf16.gmra.mxu3 %vm1089_vm9, %v1261_v60  ;;  %v1509_v60 = vsel %vm1132_vm11, %v4616_v55, -inf }
 0x3b7   : > { %v4606_v41 = vpop.xlane.xlu0 %1504 }
 0x3bf   : > { %3418 = vmatmul.msk.bf16.vlgmr.msrb.gmra.mxu3 %vm1089_vm9, %v1629_v61 }
 0x3ca   : > { %v4608_v6 = vpop.xlane.xlu2 %1507 }
 0x3cf   : > { %3419 = vmatmul.msk.bf16.gmra.mxu3 %vm1089_vm9, %v1631_v62  ;;  %v1498_v62 = vmul.f32 0.125, %v1492_v56 }
 0x402   : > { %v4566_v46 = vpop.f32.mrf.mxu3 }
 0x40a   : > { %v4568_v50 = vpop.f32.mrf.mxu3 }
 0x412   : > { %v4570_v63 = vpop.f32.mrf.mxu3 }
 0x41a   : > { %v4572_v0 = vpop.f32.mrf.mxu3 }
 0x422   : > { %v1289_v2 = vpop.f32.mrf.mxu3 }
 0x423   : > { %v1299_v36 = vmul.f32 0.125, %v1289_v2 }
 0x425   : > { %v1303_v59 = vsel %vm1127_vm10, %v1299_v36, -1e+30 }
 0x426   : > { %v1307_v3 = vsel %vm1132_vm11, %v1303_v59, -inf }
 0x427   : > { %1308 = vmax.xlane.f32.xlu1 %v1307_v3 }
 0x42a   : > { %v1291_v37 = vpop.f32.mrf.mxu3 }
 0x42b   : > { %v1300_v4 = vmul.f32 0.125, %v1291_v37 }
 0x42d   : > { %v1304_v5 = vsel %vm1127_vm10, %v1300_v4, -1e+30 }
 0x42e   : > { %v1310_v12 = vsel %vm1132_vm11, %v1304_v5, -inf }
 0x42f   : > { %1311 = vmax.xlane.f32.xlu0 %v1310_v12 }
 0x432   : > { %v1294_v7 = vpop.f32.mrf.mxu3 }
 0x433   : > { %v1301_v19 = vmul.f32 0.125, %v1294_v7 }
 0x435   : > { %v1305_v8 = vsel %vm1127_vm10, %v1301_v19, -1e+30 }
 0x436   : > { %v1313_v13 = vsel %vm1132_vm11, %v1305_v8, -inf }
 0x437   : > { %1314 = vmax.xlane.f32.xlu2 %v1313_v13 }
 0x43a   : > { %v1296_v14 = vpop.f32.mrf.mxu3 }
 0x43b   : > { %v1302_v15 = vmul.f32 0.125, %v1296_v14 }
 0x43d   : > { %v1306_v16 = vsel %vm1127_vm10, %v1302_v15, -1e+30 }
 0x43e   : > { %v1316_v38 = vsel %vm1132_vm11, %v1306_v16, -inf }
 0x43f   : > { %1317 = vmax.xlane.f32.xlu1 %v1316_v38 }
 0x442   : > { %v1659_v27 = vpop.f32.mrf.mxu3 }
 0x443   : > { %v1669_v24 = vmul.f32 0.125, %v1659_v27 }
 0x445   : > { %v4588_v11 = vsel %vm1127_vm10, %v1669_v24, -1e+30 }
 0x446   : > { %v1677_v32 = vsel %vm1132_vm11, %v4588_v11, -inf }
 0x447   : > { %1678 = vmax.xlane.f32.xlu0 %v1677_v32 }
 0x44a   : > { %v1661_v25 = vpop.f32.mrf.mxu3 }
 0x44b   : > { %v1670_v26 = vmul.f32 0.125, %v1661_v25 }
 0x44d   : > { %v1674_v28 = vsel %vm1127_vm10, %v1670_v26, -1e+30 }
 0x44e   : > { %v1680_v29 = vsel %vm1132_vm11, %v1674_v28, -inf }
 0x44f   : > { %1681 = vmax.xlane.f32.xlu2 %v1680_v29  ;;  %v1515_v29 = vsub.f32 %v4536_v20, %v4606_v41 }
 0x452   : > { %v1664_v34 = vpop.f32.mrf.mxu3 }
 0x453   : > { %v1671_v39 = vmul.f32 0.125, %v1664_v34  ;;  %v1519_v34 = vmul.f32 1.442695, %v1515_v29 }
 0x455   : > { %v1675_v48 = vsel %vm1127_vm10, %v1671_v39, -1e+30 }
 0x456   : > { %v1683_v40 = vsel %vm1132_vm11, %v1675_v48, -inf }
 0x457   : > { %1684 = vmax.xlane.f32.xlu1 %v1683_v40 }
 0x45a   : > { %v1666_v43 = vpop.f32.mrf.mxu3 }
 0x45b   : > { %v1672_v31 = vmul.f32 0.125, %v1666_v43 }
 0x45d   : > { %v4600_v30 = vsel %vm1127_vm10, %v1672_v31, -1e+30 }
 0x45e   : > { %v1686_v44 = vsel %vm1132_vm11, %v4600_v30, -inf }
 0x45f   : > { %1687 = vmax.xlane.f32.xlu0 %v1686_v44 }
 0x473   : > { %1407 = vrot.lane.b32.xlu0 %v4488_v10, %s4036_s16 }
 0x49a   : > { %v1309_v45 = vpop.xlane.xlu1 %1308 }
 0x49b   : > { %v1319_v47 = vsub.f32 %v1303_v59, %v1309_v45  ;;  %v4626_v59 = vsel %vm1127_vm10, %v1498_v62, -1e+30 }
 0x49c   : > { %v1512_v4 = vsel %vm1132_vm11, %v4626_v59, -inf }
 0x49d   : > { %v1323_v49 = vmul.f32 1.442695, %v1319_v47 }
 0x49f   : > { %3891 = vpow2.f32 %v1323_v49 }
 0x4a2   : > { %v1312_v52 = vpop.xlane.xlu0 %1311 }
 0x4a3   : > { %v1320_v9 = vsub.f32 %v1304_v5, %v1312_v52 }
 0x4a5   : > { %v4610_v35 = vpop.eup %3891  ;;  %v1325_v17 = vmul.f32 1.442695, %v1320_v9 }
 0x4a6   : > { %v1331_v33 = vsel %vm1132_vm11, %v4610_v35, 0.0 }
 0x4a7   : > { %3893 = vpow2.f32 %v1325_v17  ;;  %1332 = vadd.xlane.f32.xlu2 %v1331_v33 }
 0x4aa   : > { %v1315_v10 = vpop.xlane.xlu2 %1314 }
 0x4ab   : > { %v1321_v54 = vsub.f32 %v1305_v8, %v1315_v10 }
 0x4ad   : > { %v4618_v57 = vpop.eup %3893  ;;  %v1327_v58 = vmul.f32 1.442695, %v1321_v54 }
 0x4ae   : > { %v1334_v61 = vsel %vm1132_vm11, %v4618_v57, 0.0 }
 0x4af   : > { %3895 = vpow2.f32 %v1327_v58  ;;  %1510 = vmax.xlane.f32.xlu2 %v1509_v60  ;;  %1335 = vadd.xlane.f32.xlu1 %v1334_v61 }
 0x4b2   : > { %v1318_v2 = vpop.xlane.xlu1 %1317 }
 0x4b3   : > { %v1322_v36 = vsub.f32 %v1306_v16, %v1318_v2 }
 0x4b5   : > { %v4628_v3 = vpop.eup %3895  ;;  %v1329_v37 = vmul.f32 1.442695, %v1322_v36 }
 0x4b6   : > { %v1337_v5 = vsel %vm1132_vm11, %v4628_v3, 0.0 }
 0x4b7   : > { %3897 = vpow2.f32 %v1329_v37  ;;  %1513 = vmax.xlane.f32.xlu2 %v1512_v4  ;;  %1338 = vadd.xlane.f32.xlu0 %v1337_v5 }
 0x4bd   : > { %v4634_v12 = vpop.eup %3897 }
 0x4be   : > { %v1340_v7 = vsel %vm1132_vm11, %v4634_v12, 0.0 }
 0x4bf   : > { %1341 = vadd.xlane.f32.xlu2 %v1340_v7 }
 0x4c2   : > { %v1682_v42 = vpop.xlane.xlu2 %1681 }
 0x4c3   : > { %v1690_v19 = vsub.f32 %v1674_v28, %v1682_v42 }
 0x4c5   : > { %v1695_v8 = vmul.f32 1.442695, %v1690_v19 }
 0x4c7   : > { %3899 = vpow2.f32 %v1695_v8 }
 0x4c8   : > { %1409 = vrot.lane.b32.xlu1 %v4482_v1, %s4036_s16  ;;  %v1679_v1 = vpop.xlane.xlu0 %1678 }
 0x4c9   : > { %v1689_v32 = vsub.f32 %v4588_v11, %v1679_v1 }
 0x4ca   : > { %v1685_v13 = vpop.xlane.xlu1 %1684 }
 0x4cb   : > { %v1691_v14 = vsub.f32 %v1675_v48, %v1685_v13  ;;  %1779 = vrot.lane.b32.xlu0 %v4497_v21, %s4036_s16  ;;  %v1693_v26 = vmul.f32 1.442695, %v1689_v32 }
 0x4cd   : > { %v4642_v15 = vpop.eup %3899  ;;  %v1697_v16 = vmul.f32 1.442695, %v1691_v14 }
 0x4ce   : > { %v1704_v38 = vsel %vm1132_vm11, %v4642_v15, 0.0 }
 0x4cf   : > { %3901 = vpow2.f32 %v1697_v16  ;;  %1705 = vadd.xlane.f32.xlu2 %v1704_v38 }
 0x4d0   : > { %3903 = vpow2.f32 %v1693_v26 }
 0x4d2   : > { %v1688_v25 = vpop.xlane.xlu0 %1687 }
 0x4d3   : > { %v1692_v21 = vsub.f32 %v4600_v30, %v1688_v25 }
 0x4d5   : > { %v4646_v27 = vpop.eup %3901  ;;  %v1699_v28 = vmul.f32 1.442695, %v1692_v21 }
 0x4d6   : > { %v1707_v24 = vsel %vm1132_vm11, %v4646_v27, 0.0  ;;  %v4654_v39 = vpop.eup %3903 }
 0x4d7   : > { %1708 = vadd.xlane.f32.xlu2 %v1707_v24  ;;  %3905 = vpow2.f32 %v1699_v28  ;;  %v1701_v11 = vsel %vm1132_vm11, %v4654_v39, 0.0 }
 0x4d8   : > { %3907 = vpow2.f32 %v1519_v34 }
 0x4dd   : > { %v4658_v48 = vpop.eup %3905 }
 0x4de   : > { %v1710_v40 = vsel %vm1132_vm11, %v4658_v48, 0.0  ;;  %v4664_v20 = vpop.eup %3907 }
 0x4df   : > { %v1527_v43 = vsel %vm1132_vm11, %v4664_v20, 0.0 }
 0x4e5   : > { %v1408_v49 = vpop.permute.xlu0 %1407 }
 0x4ef   : > { %1777 = vrot.lane.b32.xlu2 %v4499_v22, %s4036_s16  ;;  %v1516_v22 = vsub.f32 %v4542_v23, %v4608_v6 }
 0x4f1   : > { %v1521_v31 = vmul.f32 1.442695, %v1516_v22 }
 0x4f2   : > { %1702 = vadd.xlane.f32.xlu1 %v1701_v11 }
 0x4f3   : > { %3909 = vpow2.f32 %v1521_v31 }
 0x4f5   : > { %1711 = vadd.xlane.f32.xlu0 %v1710_v40 }
 0x4f9   : > { %v4670_v30 = vpop.eup %3909 }
 0x4fa   : > { %1528 = vadd.xlane.f32.xlu1 %v1527_v43  ;;  %v1530_v44 = vsel %vm1132_vm11, %v4670_v30, 0.0 }
 0x518   : > { %1531 = vadd.xlane.f32.xlu2 %v1530_v44 }
 0x51a   : > { %v1333_v41 = vpop.xlane.xlu2 %1332 }
 0x51b   : > { %3911 = vrcp.f32 %v1333_v41  ;;  %v1354_v42 = vand.u32 2147483648, %v1333_v41  ;;  %vm1348_vm2 = vweird.f32 %v1333_v41  ;;  %v1352_v19 = vand.u32 2147483647, %v1333_v41 }
 0x51d   : > { %v1355_v1 = vor.u32 1.1754944e-38, %v1354_v42  ;;  %vm1353_vm5 = vcmp.eq.f32.partialorder %v1352_v19, 8.507059e+37 }
 0x521   : > { %v3912_v52 = vpop.eup %3911 }
 0x522   : > { %v1511_v45 = vpop.xlane.xlu2 %1510  ;;  %v1336_v47 = vpop.xlane.xlu1 %1335  ;;  %v1344_v23 = vmul.f32 %v3912_v52, %v1333_v41  ;;  %vm1349_vm15 = vweird.f32 %v3912_v52 }
 0x523   : > { %v1517_v51 = vsub.f32 %v4616_v55, %v1511_v45  ;;  %3913 = vrcp.f32 %v1336_v47  ;;  %vm1363_vm0 = vweird.f32 %v1336_v47  ;;  %v1367_v5 = vand.u32 2147483647, %v1336_v47  ;;  %vm1350_vm3 = vmor %vm1348_vm2, %vm1349_vm15 }
 0x524   : > { %v1345_v54 = vsub.f32 1.0, %v1344_v23 }
 0x525   : > { %v1523_v9 = vmul.f32 1.442695, %v1517_v51  ;;  %vm1368_vm4 = vcmp.eq.f32.partialorder %v1367_v5, 8.507059e+37 }
 0x526   : > { %v1346_v62 = vmul.f32 %v3912_v52, %v1345_v54 }
 0x527   : > { %3915 = vpow2.f32 %v1523_v9 }
 0x528   : > { %v1347_v4 = vadd.f32 %v3912_v52, %v1346_v62 }
 0x529   : > { %v3914_v6 = vpop.eup %3913 }
 0x52a   : > { %v1359_v17 = vmul.f32 %v3914_v6, %v1336_v47  ;;  %v1514_v33 = vpop.xlane.xlu2 %1513  ;;  %v4676_v10 = vpop.xlane.xlu0 %1338  ;;  %vm1364_vm10 = vweird.f32 %v3914_v6  ;;  %v1351_v16 = vsel %vm1350_vm3, %v3912_v52, %v1347_v4 }
 0x52b   : > { %v1518_v53 = vsub.f32 %v4626_v59, %v1514_v33  ;;  %3917 = vrcp.f32 %v4676_v10  ;;  %v1369_v59 = vand.u32 2147483648, %v1336_v47  ;;  %vm1365_vm1 = vmor %vm1363_vm0, %vm1364_vm10  ;;  %v1356_v26 = vsel %vm1353_vm5, %v1355_v1, %v1351_v16 }
 0x52c   : > { %v1360_v56 = vsub.f32 1.0, %v1359_v17  ;;  %v1357_v40 = vmul.f32 %v4610_v35, %v1356_v26  ;;  %vm1378_vm13 = vweird.f32 %v4676_v10  ;;  %v1382_v35 = vand.u32 2147483647, %v4676_v10 }
 0x52d   : > { %v4678_v58 = vpop.eup %3915  ;;  %v1525_v60 = vmul.f32 1.442695, %v1518_v53  ;;  %v1370_v14 = vor.u32 1.1754944e-38, %v1369_v59 }
 0x52e   : > { %v1361_v61 = vmul.f32 %v3914_v6, %v1360_v56  ;;  %v1533_v55 = vsel %vm1132_vm11, %v4678_v58, 0.0  ;;  %vm1383_vm15 = vcmp.eq.f32.partialorder %v1382_v35, 8.507059e+37 }
 0x52f   : > { %3919 = vpow2.f32 %v1525_v60  ;;  %1534 = vadd.xlane.f32.xlu1 %v1533_v55 }
 0x530   : > { %v1362_v2 = vadd.f32 %v3914_v6, %v1361_v61 }
 0x531   : > { %v3918_v37 = vpop.eup %3917 }
 0x532   : > { %v1342_v36 = vpop.xlane.xlu2 %1341  ;;  %v1366_v8 = vsel %vm1365_vm1, %v3914_v6, %v1362_v2  ;;  %v1374_v38 = vmul.f32 %v3918_v37, %v4676_v10  ;;  %vm1379_vm7 = vweird.f32 %v3918_v37 }
 0x533   : > { %3921 = vrcp.f32 %v1342_v36  ;;  %v1371_v32 = vsel %vm1368_vm4, %v1370_v14, %v1366_v8  ;;  %v1399_v45 = vand.u32 2147483648, %v1342_v36  ;;  %vm1393_vm8 = vweird.f32 %v1342_v36  ;;  %vm1380_vm14 = vmor %vm1378_vm13, %vm1379_vm7 }
 0x534   : > { %v1375_v28 = vsub.f32 1.0, %v1374_v38  ;;  %v1372_v34 = vmul.f32 %v4618_v57, %v1371_v32  ;;  %v1397_v51 = vand.u32 2147483647, %v1342_v36  ;;  %v1384_v57 = vand.u32 2147483648, %v4676_v10 }
 0x535   : > { %v4683_v7 = vpop.eup %3919  ;;  %v1400_v52 = vor.u32 1.1754944e-38, %v1399_v45 }
 0x536   : > { %v1536_v13 = vsel %vm1132_vm11, %v4683_v7, 0.0  ;;  %v1376_v22 = vmul.f32 %v3918_v37, %v1375_v28  ;;  %v1403_v31 = vpack.c.bf16 %v1372_v34, %v1357_v40  ;;  %vm1398_vm10 = vcmp.eq.f32.partialorder %v1397_v51, 8.507059e+37 }
 0x537   : > { %1537 = vadd.xlane.f32.xlu0 %v1536_v13  ;;  %v1385_v23 = vor.u32 1.1754944e-38, %v1384_v57 }
 0x538   : > { %v1377_v47 = vadd.f32 %v3918_v37, %v1376_v22 }
 0x539   : > { %v3922_v24 = vpop.eup %3921 }
 0x53a   : > { %v1389_v25 = vmul.f32 %v3922_v24, %v1342_v36  ;;  %v1410_v21 = vpop.permute.xlu1 %1409  ;;  %vm1394_vm6 = vweird.f32 %v3922_v24  ;;  %v1381_v9 = vsel %vm1380_vm14, %v3918_v37, %v1377_v47 }
 0x53b   : > { %1425 = vmatpush.bf16.msrb.mxu0 %v1410_v21  ;;  %vm1395_vm12 = vmor %vm1393_vm8, %vm1394_vm6  ;;  %v1386_v33 = vsel %vm1383_vm15, %v1385_v23, %v1381_v9 }
 0x53c   : > { %v1390_v29 = vsub.f32 1.0, %v1389_v25  ;;  %v1387_v54 = vmul.f32 %v4628_v3, %v1386_v33 }
 0x53d   : > { %v1780_v43 = vpop.permute.xlu0 %1779 }
 0x53e   : > { %v1391_v11 = vmul.f32 %v3922_v24, %v1390_v29 }
 0x53f   : > { %1426 = vmatpush.bf16.msrb.mxu0 %v1408_v49 }
 0x540   : > { %v1392_v44 = vadd.f32 %v3922_v24, %v1391_v11 }
 0x542   : > { %v1706_v41 = vpop.xlane.xlu2 %1705  ;;  %3412 = vmatmul.msk.bf16.vlgmr.msrb.gmra.mxu0 %vm1132_vm11, %v1403_v31  ;;  %v1396_v49 = vsel %vm1395_vm12, %v3922_v24, %v1392_v44 }
 0x543   : > { %1795 = vmatpush.bf16.msra.mxu0 %v1780_v43  ;;  %v1401_v6 = vsel %vm1398_vm10, %v1400_v52, %v1396_v49  ;;  %3923 = vrcp.f32 %v1706_v41  ;;  %vm1733_vm1 = vweird.f32 %v1706_v41  ;;  %v1739_v4 = vand.u32 2147483648, %v1706_v41 }
 0x544   : > { %v1402_v53 = vmul.f32 %v4634_v12, %v1401_v6  ;;  %v1737_v19 = vand.u32 2147483647, %v1706_v41 }
 0x545   : > { %v1740_v32 = vor.u32 1.1754944e-38, %v1739_v4 }
 0x546   : > { %v1404_v56 = vpack.c.bf16 %v1402_v53, %v1387_v54  ;;  %vm1738_vm4 = vcmp.eq.f32.partialorder %v1737_v19, 8.507059e+37 }
 0x549   : > { %v3924_v10 = vpop.eup %3923 }
 0x54a   : > { %v4694_v17 = vpop.xlane.xlu2 %1708  ;;  %v1729_v61 = vmul.f32 %v3924_v10, %v1706_v41  ;;  %vm1734_vm0 = vweird.f32 %v3924_v10 }
 0x54b   : > { %vm4700_vm2 = vmor %vm1733_vm1, %vm1734_vm0  ;;  %v1754_v35 = vand.u32 2147483648, %v4694_v17  ;;  %vm1748_vm10 = vweird.f32 %v4694_v17 }
 0x54c   : > { %v1730_v55 = vsub.f32 1.0, %v1729_v61 }
 0x54d   : > { %v1755_v9 = vor.u32 1.1754944e-38, %v1754_v35 }
 0x54e   : > { %v1731_v2 = vmul.f32 %v3924_v10, %v1730_v55 }
 0x550   : > { %v1732_v12 = vadd.f32 %v3924_v10, %v1731_v2 }
 0x552   : > { %v1778_v60 = vpop.permute.xlu2 %1777  ;;  %3413 = vmatmul.msk.bf16.gmra.mxu0 %vm1132_vm11, %v1404_v56  ;;  %v1736_v13 = vsel %vm4700_vm2, %v3924_v10, %v1732_v12 }
 0x553   : > { %1796 = vmatpush.bf16.msra.mxu0 %v1778_v60  ;;  %v1741_v26 = vsel %vm1738_vm4, %v1740_v32, %v1736_v13 }
 0x554   : > { %v1742_v40 = vmul.f32 %v4642_v15, %v1741_v26  ;;  %v1752_v15 = vand.u32 2147483647, %v4694_v17 }
 0x556   : > { %vm1753_vm1 = vcmp.eq.f32.partialorder %v1752_v15, 8.507059e+37 }
 0x565   : > { %v1703_v62 = vpop.xlane.xlu1 %1702 }
 0x566   : > { %3925 = vrcp.f32 %v1703_v62  ;;  %v1724_v14 = vand.u32 2147483648, %v1703_v62  ;;  %v1722_v1 = vand.u32 2147483647, %v1703_v62  ;;  %vm1718_vm5 = vweird.f32 %v1703_v62 }
 0x567   : > { %3927 = vrcp.f32 %v4694_v17 }
 0x568   : > { %v1712_v36 = vpop.xlane.xlu0 %1711  ;;  %v1725_v28 = vor.u32 1.1754944e-38, %v1724_v14  ;;  %vm1723_vm7 = vcmp.eq.f32.partialorder %v1722_v1, 8.507059e+37 }
 0x569   : > { %3929 = vrcp.f32 %v1712_v36  ;;  %v1769_v47 = vand.u32 2147483648, %v1712_v36  ;;  %vm1763_vm13 = vweird.f32 %v1712_v36  ;;  %v1767_v57 = vand.u32 2147483647, %v1712_v36 }
 0x56b   : > { %v1770_v49 = vor.u32 1.1754944e-38, %v1769_v47  ;;  %vm1768_vm0 = vcmp.eq.f32.partialorder %v1767_v57, 8.507059e+37 }
 0x56c   : > { %v3926_v59 = vpop.eup %3925 }
 0x56d   : > { %v1714_v3 = vmul.f32 %v3926_v59, %v1703_v62  ;;  %v3928_v37 = vpop.eup %3927  ;;  %vm1719_vm3 = vweird.f32 %v3926_v59  ;;  %v1529_v45 = vpop.xlane.xlu1 %1528 }
 0x56e   : > { %v1744_v38 = vmul.f32 %v3928_v37, %v4694_v17  ;;  %vm1720_vm6 = vmor %vm1718_vm5, %vm1719_vm3  ;;  %vm1749_vm12 = vweird.f32 %v3928_v37  ;;  %3931 = vrcp.f32 %v1529_v45  ;;  %vm1544_vm3 = vweird.f32 %v1529_v45 }
 0x56f   : > { %v3930_v5 = vpop.eup %3929  ;;  %v1715_v8 = vsub.f32 1.0, %v1714_v3  ;;  %vm1750_vm15 = vmor %vm1748_vm10, %vm1749_vm12 }
 0x570   : > { %v1759_v16 = vmul.f32 %v3930_v5, %v1712_v36  ;;  %v1745_v29 = vsub.f32 1.0, %v1744_v38  ;;  %vm1764_vm8 = vweird.f32 %v3930_v5  ;;  %v1550_v36 = vand.u32 2147483648, %v1529_v45 }
 0x571   : > { %v1716_v24 = vmul.f32 %v3926_v59, %v1715_v8  ;;  %vm1765_vm14 = vmor %vm1763_vm13, %vm1764_vm8 }
 0x572   : > { %v1760_v21 = vsub.f32 1.0, %v1759_v16  ;;  %v1746_v31 = vmul.f32 %v3928_v37, %v1745_v29  ;;  %v1551_v4 = vor.u32 1.1754944e-38, %v1550_v36  ;;  %v3740_v36 = vld [vmem:[%s4131_s22 + $0x8] sm:$0xff] }
 0x573   : > { %v1717_v25 = vadd.f32 %v3926_v59, %v1716_v24 }
 0x574   : > { %v1761_v22 = vmul.f32 %v3930_v5, %v1760_v21  ;;  %v1747_v51 = vadd.f32 %v3928_v37, %v1746_v31  ;;  %v3932_v6 = vpop.eup %3931 }
 0x575   : > { %v1721_v34 = vsel %vm1720_vm6, %v3926_v59, %v1717_v25  ;;  %v1540_v54 = vmul.f32 %v3932_v6, %v1529_v45  ;;  %vm1545_vm2 = vweird.f32 %v3932_v6  ;;  %v1548_v59 = vand.u32 2147483647, %v1529_v45 }
 0x576   : > { %v1726_v11 = vsel %vm1723_vm7, %v1725_v28, %v1721_v34  ;;  %v1762_v41 = vadd.f32 %v3930_v5, %v1761_v22  ;;  %v1751_v52 = vsel %vm1750_vm15, %v3928_v37, %v1747_v51  ;;  %vm1546_vm4 = vmor %vm1544_vm3, %vm1545_vm2 }
 0x577   : > { %v1727_v43 = vmul.f32 %v4654_v39, %v1726_v11  ;;  %v1756_v33 = vsel %vm1753_vm1, %v1755_v9, %v1751_v52  ;;  %v1541_v10 = vsub.f32 1.0, %v1540_v54  ;;  %vm1549_vm6 = vcmp.eq.f32.partialorder %v1548_v59, 8.507059e+37  ;;  %v3739_v59 = vld [vmem:[%s4131_s22] sm:$0xff] }
 0x578   : > { %v1766_v39 = vsel %vm1765_vm14, %v3930_v5, %v1762_v41  ;;  %v1757_v56 = vmul.f32 %v4646_v27, %v1756_v33 }
 0x579   : > { %v1773_v44 = vpack.c.bf16 %v1742_v40, %v1727_v43  ;;  %v1771_v23 = vsel %vm1768_vm0, %v1770_v49, %v1766_v39  ;;  %v1542_v17 = vmul.f32 %v3932_v6, %v1541_v10 }
 0x57a   : > { %v1772_v53 = vmul.f32 %v4658_v48, %v1771_v23 }
 0x57b   : > { %3420 = vmatmul.msk.bf16.vlgmr.msra.gmra.mxu0 %vm1132_vm11, %v1773_v44  ;;  %v1543_v62 = vadd.f32 %v3932_v6, %v1542_v17  ;;  %v3742_v17 = vld [vmem:[%s4131_s22 + $0x18] sm:$0xff] }
 0x57c   : > { %v1774_v60 = vpack.c.bf16 %v1772_v53, %v1757_v56  ;;  %v3745_v56 = vld [vmem:[%s4131_s22 + $0x30] sm:$0xff] }
 0x57d   : > { %v1547_v3 = vsel %vm1546_vm4, %v3932_v6, %v1543_v62 }
 0x57e   : > { %v1552_v42 = vsel %vm1549_vm6, %v1551_v4, %v1547_v3 }
 0x57f   : > { %v1553_v14 = vmul.f32 %v4664_v20, %v1552_v42 }
 0x58b   : > { %v1532_v61 = vpop.xlane.xlu2 %1531  ;;  %3421 = vmatmul.msk.bf16.gmra.mxu0 %vm1132_vm11, %v1774_v60  ;;  %v3744_v60 = vld [vmem:[%s4131_s22 + $0x28] sm:$0xff] }
 0x58c   : > { %3933 = vrcp.f32 %v1532_v61  ;;  %v1565_v48 = vand.u32 2147483648, %v1532_v61  ;;  %v1563_v27 = vand.u32 2147483647, %v1532_v61  ;;  %vm1559_vm7 = vweird.f32 %v1532_v61 }
 0x58e   : > { %v1566_v19 = vor.u32 1.1754944e-38, %v1565_v48  ;;  %vm1564_vm12 = vcmp.eq.f32.partialorder %v1563_v27, 8.507059e+37 }
 0x592   : > { %v3934_v55 = vpop.eup %3933 }
 0x593   : > { %v1555_v2 = vmul.f32 %v3934_v55, %v1532_v61  ;;  %vm1560_vm5 = vweird.f32 %v3934_v55  ;;  %v3743_v61 = vld [vmem:[%s4131_s22 + $0x20] sm:$0xff] }
 0x594   : > { %vm1561_vm8 = vmor %vm1559_vm7, %vm1560_vm5 }
 0x595   : > { %v1556_v12 = vsub.f32 1.0, %v1555_v2  ;;  %v3741_v2 = vld [vmem:[%s4131_s22 + $0x10] sm:$0xff] }
 0x597   : > { %v1557_v37 = vmul.f32 %v3934_v55, %v1556_v12 }
 0x599   : > { %v1558_v5 = vadd.f32 %v3934_v55, %v1557_v37 }
 0x59b   : > { %v1562_v8 = vsel %vm1561_vm8, %v3934_v55, %v1558_v5 }
 0x59c   : > { %v1567_v13 = vsel %vm1564_vm12, %v1566_v19, %v1562_v8 }
 0x59d   : > { %v1568_v16 = vmul.f32 %v4670_v30, %v1567_v13 }
 0x59f   : > { %v1599_v38 = vpack.c.bf16 %v1568_v16, %v1553_v14 }
 0x5a1   : > { %3416 = vmatmul.msk.bf16.vlgmr.msra.gmra.mxu2 %vm1132_vm11, %v1599_v38 }
 0x5a2   : > { %v1535_v24 = vpop.xlane.xlu1 %1534 }
 0x5a3   : > { %3935 = vrcp.f32 %v1535_v24  ;;  %v1580_v11 = vand.u32 2147483648, %v1535_v24  ;;  %vm1574_vm14 = vweird.f32 %v1535_v24  ;;  %v1578_v20 = vand.u32 2147483647, %v1535_v24 }
 0x5a5   : > { %v1581_v44 = vor.u32 1.1754944e-38, %v1580_v11  ;;  %vm1579_vm0 = vcmp.eq.f32.partialorder %v1578_v20, 8.507059e+37  ;;  %v3853_v20 = vld [vmem:[%s5344_s25] ss:$0 sm:$0xff] }
 0x5a9   : > { %v3936_v1 = vpop.eup %3935 }
 0x5aa   : > { %v1570_v32 = vmul.f32 %v3936_v1, %v1535_v24  ;;  %v1538_v25 = vpop.xlane.xlu0 %1537  ;;  %vm1575_vm13 = vweird.f32 %v3936_v1 }
 0x5ab   : > { %3937 = vrcp.f32 %v1538_v25  ;;  %vm1576_vm10 = vmor %vm1574_vm14, %vm1575_vm13  ;;  %v1595_v30 = vand.u32 2147483648, %v1538_v25  ;;  %v1593_v22 = vand.u32 2147483647, %v1538_v25  ;;  %vm1589_vm1 = vweird.f32 %v1538_v25 }
 0x5ac   : > { %v1571_v21 = vsub.f32 1.0, %v1570_v32 }
 0x5ad   : > { %v1596_v45 = vor.u32 1.1754944e-38, %v1595_v30  ;;  %vm1594_vm3 = vcmp.eq.f32.partialorder %v1593_v22, 8.507059e+37  ;;  %v4019_v30 = vld [vmem:[%s5323_s13] sm:$0xff] }
 0x5ae   : > { %v1572_v26 = vmul.f32 %v3936_v1, %v1571_v21 }
 0x5b0   : > { %v1573_v29 = vadd.f32 %v3936_v1, %v1572_v26 }
 0x5b1   : > { %v3938_v28 = vpop.eup %3937 }
 0x5b2   : > { %v1585_v34 = vmul.f32 %v3938_v28, %v1538_v25  ;;  %vm1590_vm15 = vweird.f32 %v3938_v28  ;;  %v1577_v31 = vsel %vm1576_vm10, %v3936_v1, %v1573_v29 }
 0x5b3   : > { %vm1591_vm2 = vmor %vm1589_vm1, %vm1590_vm15  ;;  %v1582_v47 = vsel %vm1579_vm0, %v1581_v44, %v1577_v31  ;;  %v4020_v44 = vld [vmem:[%s5323_s13 + $0x8] sm:$0xff] }
 0x5b4   : > { %v1586_v40 = vsub.f32 1.0, %v1585_v34  ;;  %v1583_v35 = vmul.f32 %v4678_v58, %v1582_v47  ;;  %v3746_v58 = vld [vmem:[%s4131_s22 + $0x38] sm:$0xff] }
 0x5b5   : > { %1896 = vmatpush.bf16.msra.mxu1 %v3746_v58 }
 0x5b6   : > { %v1587_v43 = vmul.f32 %v3938_v28, %v1586_v40 }
 0x5b8   : > { %v1588_v41 = vadd.f32 %v3938_v28, %v1587_v43 }
 0x5b9   : > { %1897 = vmatpush.bf16.msra.mxu1 %v3745_v56 }
 0x5ba   : > { %v1592_v51 = vsel %vm1591_vm2, %v3938_v28, %v1588_v41 }
 0x5bb   : > { %v1597_v57 = vsel %vm1594_vm3, %v1596_v45, %v1592_v51  ;;  %v4021_v51 = vld [vmem:[%s5323_s13 + $0x10] sm:$0xff] }
 0x5bc   : > { %v1598_v15 = vmul.f32 %v4683_v7, %v1597_v57 }
 0x5bd   : > { %1898 = vmatpush.bf16.msra.mxu1 %v3744_v60  ;;  %v4025_v60 = vld [vmem:[%s5323_s13 + $0x30] sm:$0xff] }
 0x5be   : > { %v1600_v39 = vpack.c.bf16 %v1598_v15, %v1583_v35 }
 0x5bf   : > { %v1428_v49 = vpop.f32.mrf.mxu0 }
 0x5c0   : > { %3417 = vmatmul.msk.bf16.gmra.mxu2 %vm1132_vm11, %v1600_v39  ;;  %v4022_v39 = vld [vmem:[%s5323_s13 + $0x18] sm:$0xff] }
 0x5c1   : > { %1899 = vmatpush.bf16.msra.mxu1 %v3743_v61 }
 0x5c5   : > { %1900 = vmatpush.bf16.msra.mxu1 %v3742_v17 }
 0x5c7   : > { %v1430_v52 = vpop.f32.mrf.mxu0 }
 0x5c8   : > { %v3831_v9 = vpack.i.bf16 %v1430_v52, %v1428_v49 }
 0x5c9   : > { %1901 = vmatpush.bf16.msra.mxu1 %v3741_v2 }
 0x5ca   : > { %3832 = vrot.lane.b32.xlu1 %v3831_v9, %s4036_s16 }
 0x5cd   : > { %1902 = vmatpush.bf16.msra.mxu1 %v3740_v36 }
 0x5cf   : > { %v1433_v23 = vpop.f32.mrf.mxu0 }
 0x5d1   : > { %1903 = vmatpush.bf16.msra.mxu1 %v3739_v59 }
 0x5d7   : > { %v1435_v6 = vpop.f32.mrf.mxu0 }
 0x5d8   : > { %v3836_v33 = vpack.i.bf16 %v1435_v6, %v1433_v23  ;;  %v4023_v23 = vld [vmem:[%s5323_s13 + $0x20] sm:$0xff] }
 0x5da   : > { %3837 = vrot.lane.b32.xlu0 %v3836_v33, %s4036_s16 }
 0x5f8   : > { %v1798_v7 = vpop.f32.mrf.mxu0 }
 0x600   : > { %v1800_v53 = vpop.f32.mrf.mxu0 }
 0x601   : > { %v3841_v54 = vpack.i.bf16 %v1800_v53, %v1798_v7  ;;  %v4024_v7 = vld [vmem:[%s5323_s13 + $0x28] sm:$0xff] }
 0x603   : > { %3842 = vrot.lane.b32.xlu1 %v3841_v54, %s4036_s16 }
 0x608   : > { %v1803_v10 = vpop.f32.mrf.mxu0 }
 0x610   : > { %v1805_v55 = vpop.f32.mrf.mxu0 }
 0x611   : > { %v3846_v62 = vpack.i.bf16 %v1805_v55, %v1803_v10  ;;  %v4026_v55 = vld [vmem:[%s5323_s13 + $0x38] sm:$0xff] }
 0x613   : > { %3847 = vrot.lane.b32.xlu0 %v3846_v62, %s4036_s16 }
 0x624   : > { %v1616_v16 = vpop.f32.mrf.mxu2 }
 0x62c   : > { %v1618_v38 = vpop.f32.mrf.mxu2 }
 0x63c   : > { %v3833_v12 = vpop.permute.xlu1 %3832 }
 0x63d   : > { %v3835_v48 = vunpack.i.h.bf16 %v3833_v12  ;;  %v3834_v3 = vunpack.i.l.bf16 %v3833_v12 }
 0x63f   : > { %v1455_v37 = vsel %vm1089_vm9, %v4568_v50, %v3835_v48  ;;  %v1454_v27 = vsel %vm1089_vm9, %v4566_v46, %v3834_v3 }
 0x640   : > { %v1828_v4 = vpack.c.bf16 %v1455_v37, %v1454_v27 }
 0x642   : > { %1904 = vmatmul.bf16.vlgmr.msra.gmra.mxu1 %v1828_v4 }
 0x643   : > { %v1621_v21 = vpop.f32.mrf.mxu2 }
 0x64b   : > { %v1623_v29 = vpop.f32.mrf.mxu2 }
 0x64c   : > { %v3838_v5 = vpop.permute.xlu0 %3837 }
 0x64d   : > { %v3840_v42 = vunpack.i.h.bf16 %v3838_v5  ;;  %v3839_v19 = vunpack.i.l.bf16 %v3838_v5 }
 0x64f   : > { %v1456_v8 = vsel %vm1089_vm9, %v4570_v63, %v3839_v19  ;;  %v1457_v13 = vsel %vm1089_vm9, %v4572_v0, %v3840_v42 }
 0x650   : > { %v1829_v14 = vpack.c.bf16 %v1457_v13, %v1456_v8 }
 0x652   : > { %1909 = vmatmul.bf16.gmra.mxu1 %v1829_v14 }
 0x675   : > { %v3843_v24 = vpop.permute.xlu1 %3842 }
 0x676   : > { %v3845_v50 = vunpack.i.h.bf16 %v3843_v24  ;;  %v3844_v1 = vunpack.i.l.bf16 %v3843_v24 }
 0x678   : > { %v1824_v46 = vsel %vm1089_vm9, %v1616_v16, %v3844_v1  ;;  %v1825_v32 = vsel %vm1089_vm9, %v1618_v38, %v3845_v50 }
 0x679   : > { %v1830_v25 = vpack.c.bf16 %v1825_v32, %v1824_v46 }
 0x67b   : > { %1914 = vmatmul.bf16.gmra.mxu1 %v1830_v25 }
 0x685   : > { %v3848_v26 = vpop.permute.xlu0 %3847 }
 0x686   : > { %v3850_v63 = vunpack.i.h.bf16 %v3848_v26  ;;  %v3849_v28 = vunpack.i.l.bf16 %v3848_v26 }
 0x688   : > { %v1826_v0 = vsel %vm1089_vm9, %v1621_v21, %v3849_v28  ;;  %v1827_v34 = vsel %vm1089_vm9, %v1623_v29, %v3850_v63 }
 0x689   : > { %v1831_v11 = vpack.c.bf16 %v1827_v34, %v1826_v0 }
 0x68b   : > { %1919 = vmatmul.bf16.gmra.mxu1 %v1831_v11 }
 0x6bf   : > { %v1905_v40 = vpop.f32.mrf.mxu1 }
 0x6c0   : > { %v1925_v43 = vadd.f32 %v4019_v30, %v1905_v40  ;;  %v3568_v30 = vld [vmem:[%s4159_s3 + $0xe0] sm:$0xf] }
 0x6c2   : > { %v4754_v22 = vadd.f32 %v3853_v20, %v1925_v43  ;;  %v3777_v43 = vld [vmem:[%s4159_s3 + $0xec] sm:$0xf0] }
 0x6c4   : > { %1947 = vadd.xlane.f32.xlu2 %v4754_v22 }
 0x6c7   : > { %v1907_v31 = vpop.f32.mrf.mxu1 }
 0x6c8   : > { %v1926_v41 = vadd.f32 %v4020_v44, %v1907_v31  ;;  %v3775_v31 = vld [vmem:[%s4159_s3 + $0xe4] sm:$0xf]  ;;  %v3569_v44 = vor.u32 %v3777_v43, %v3568_v30  ;;  %v3504_v43 = vld [vmem:[%s4159_s3 + $0x60] sm:$0xf] }
 0x6ca   : > { %v4760_v45 = vadd.f32 %v3853_v20, %v1926_v41  ;;  %v3570_v41 = vld [vmem:[%s4159_s3 + $0xf0] sm:$0xf0]  ;;  %2335 = vmatpush.bf16.msrb.mxu2 %v3569_v44  ;;  %v3759_v44 = vld [vmem:[%s4159_s3 + $0x64] sm:$0xf] }
 0x6cc   : > { %1949 = vadd.xlane.f32.xlu1 %v4760_v45 }
 0x6cf   : > { %v1910_v47 = vpop.f32.mrf.mxu1 }
 0x6d0   : > { %v1927_v57 = vadd.f32 %v4021_v51, %v1910_v47  ;;  %v3576_v47 = vld [vmem:[%s4159_s3 + $0xe8] sm:$0xf]  ;;  %v3778_v51 = vld [vmem:[%s4159_s3 + $0xf4] sm:$0xf0] }
 0x6d2   : > { %v4766_v35 = vadd.f32 %v3853_v20, %v1927_v57  ;;  %v3573_v57 = vor.u32 %v3775_v31, %v3570_v41  ;;  %v3761_v31 = vld [vmem:[%s4159_s3 + $0x6c] sm:$0xf0] }
 0x6d3   : > { %v3505_v41 = vor.u32 %v3761_v31, %v3504_v43  ;;  %v3748_v43 = vld [vmem:[%s4159_s3 + $0xc] sm:$0xf]  ;;  %v3466_v31 = vld [vmem:[%s4159_s3 + $0x18] sm:$0xf0] }
 0x6d4   : > { %1951 = vadd.xlane.f32.xlu0 %v4766_v35  ;;  %2364 = vmatpush.bf16.msra.mxu3 %v3573_v57  ;;  %v3762_v57 = vld [vmem:[%s4159_s3 + $0x74] sm:$0xf0] }
 0x6d7   : > { %v1912_v15 = vpop.f32.mrf.mxu1 }
 0x6d8   : > { %v1928_v49 = vadd.f32 %v4022_v39, %v1912_v15  ;;  %v3577_v15 = vor.u32 %v3778_v51, %v3576_v47  ;;  %v3776_v39 = vld [vmem:[%s4159_s3 + $0xec] sm:$0xf]  ;;  %v3506_v47 = vld [vmem:[%s4159_s3 + $0x70] sm:$0xf0]  ;;  %v3512_v51 = vld [vmem:[%s4159_s3 + $0x68] sm:$0xf] }
 0x6da   : > { %v4772_v52 = vadd.f32 %v3853_v20, %v1928_v49  ;;  %v3578_v49 = vld [vmem:[%s4159_s3 + $0xf8] sm:$0xf0]  ;;  %2393 = vmatpush.bf16.msrb.mxu0 %v3577_v15  ;;  %v3509_v15 = vor.u32 %v3759_v44, %v3506_v47 }
 0x6dc   : > { %1953 = vadd.xlane.f32.xlu2 %v4772_v52 }
 0x6f8   : > { %v1915_v9 = vpop.f32.mrf.mxu1 }
 0x6f9   : > { %v1929_v6 = vadd.f32 %v4023_v23, %v1915_v9  ;;  %v3581_v9 = vor.u32 %v3776_v39, %v3578_v49  ;;  %v3552_v23 = vld [vmem:[%s4159_s3 + $0xc0] sm:$0xf]  ;;  %v3513_v39 = vor.u32 %v3762_v57, %v3512_v51  ;;  %v3760_v49 = vld [vmem:[%s4159_s3 + $0x6c] sm:$0xf] }
 0x6fb   : > { %v4778_v33 = vadd.f32 %v3853_v20, %v1929_v6  ;;  %v3773_v6 = vld [vmem:[%s4159_s3 + $0xcc] sm:$0xf0]  ;;  %2422 = vmatpush.bf16.msrb.mxu1 %v3581_v9  ;;  %v3514_v9 = vld [vmem:[%s4159_s3 + $0x78] sm:$0xf0] }
 0x6fd   : > { %1955 = vadd.xlane.f32.xlu2 %v4778_v33 }
 0x700   : > { %v1917_v58 = vpop.f32.mrf.mxu1 }
 0x701   : > { %v1930_v53 = vadd.f32 %v4024_v7, %v1917_v58  ;;  %v3771_v58 = vld [vmem:[%s4159_s3 + $0xc4] sm:$0xf]  ;;  %v3553_v7 = vor.u32 %v3773_v6, %v3552_v23  ;;  %v3517_v23 = vor.u32 %v3760_v49, %v3514_v9  ;;  %v3488_v6 = vld [vmem:[%s4159_s3 + $0x40] sm:$0xf] }
 0x703   : > { %v4784_v54 = vadd.f32 %v3853_v20, %v1930_v53  ;;  %v3554_v53 = vld [vmem:[%s4159_s3 + $0xd0] sm:$0xf0]  ;;  %2336 = vmatpush.bf16.msrb.mxu2 %v3553_v7  ;;  %v3755_v7 = vld [vmem:[%s4159_s3 + $0x44] sm:$0xf] }
 0x705   : > { %1957 = vadd.xlane.f32.xlu2 %v4784_v54 }
 0x708   : > { %v1920_v56 = vpop.f32.mrf.mxu1 }
 0x709   : > { %v1931_v10 = vadd.f32 %v4025_v60, %v1920_v56  ;;  %v3560_v56 = vld [vmem:[%s4159_s3 + $0xc8] sm:$0xf]  ;;  %v3774_v60 = vld [vmem:[%s4159_s3 + $0xd4] sm:$0xf0] }
 0x70b   : > { %v4790_v61 = vadd.f32 %v3853_v20, %v1931_v10  ;;  %v3557_v10 = vor.u32 %v3771_v58, %v3554_v53  ;;  %v3757_v58 = vld [vmem:[%s4159_s3 + $0x4c] sm:$0xf0] }
 0x70c   : > { %v3489_v53 = vor.u32 %v3757_v58, %v3488_v6 }
 0x70d   : > { %1959 = vadd.xlane.f32.xlu1 %v4790_v61  ;;  %2365 = vmatpush.bf16.msra.mxu3 %v3557_v10  ;;  %v3758_v10 = vld [vmem:[%s4159_s3 + $0x54] sm:$0xf0] }
 0x710   : > { %v1922_v17 = vpop.f32.mrf.mxu1 }
 0x711   : > { %v1932_v62 = vadd.f32 %v4026_v55, %v1922_v17  ;;  %v3561_v17 = vor.u32 %v3774_v60, %v3560_v56  ;;  %v3772_v55 = vld [vmem:[%s4159_s3 + $0xcc] sm:$0xf]  ;;  %v3490_v56 = vld [vmem:[%s4159_s3 + $0x50] sm:$0xf0]  ;;  %v3496_v60 = vld [vmem:[%s4159_s3 + $0x48] sm:$0xf] }
 0x713   : > { %v4796_v2 = vadd.f32 %v3853_v20, %v1932_v62  ;;  %v3562_v62 = vld [vmem:[%s4159_s3 + $0xd8] sm:$0xf0]  ;;  %2394 = vmatpush.bf16.msrb.mxu0 %v3561_v17  ;;  %v3493_v17 = vor.u32 %v3755_v7, %v3490_v56 }
 0x715   : > { %1961 = vadd.xlane.f32.xlu0 %v4796_v2 }
 0x737   : > { %v1948_v36 = vpop.xlane.xlu2 %1947 }
 0x738   : > { %v1963_v59 = vmul.f32 %v1948_v36, %v4236_v18  ;;  %v3565_v36 = vor.u32 %v3772_v55, %v3562_v62  ;;  %v3497_v55 = vor.u32 %v3758_v10, %v3496_v60  ;;  %v3756_v62 = vld [vmem:[%s4159_s3 + $0x4c] sm:$0xf] }
 0x73a   : > { %v4801_v12 = vsub.f32 %v4754_v22, %v1963_v59  ;;  %v3536_v59 = vld [vmem:[%s4159_s3 + $0xa0] sm:$0xf]  ;;  %2423 = vmatpush.bf16.msrb.mxu1 %v3565_v36  ;;  %v3498_v36 = vld [vmem:[%s4159_s3 + $0x58] sm:$0xf0] }
 0x73c   : > { %v1979_v48 = vmul.f32 %v4801_v12, %v4801_v12 }
 0x73e   : > { %1987 = vadd.xlane.f32.xlu2 %v1979_v48  ;;  %v3769_v48 = vld [vmem:[%s4159_s3 + $0xac] sm:$0xf0] }
 0x73f   : > { %v1950_v3 = vpop.xlane.xlu1 %1949 }
 0x740   : > { %v1964_v37 = vmul.f32 %v1950_v3, %v4236_v18  ;;  %v3767_v3 = vld [vmem:[%s4159_s3 + $0xa4] sm:$0xf] }
 0x742   : > { %v4807_v27 = vsub.f32 %v4760_v45, %v1964_v37  ;;  %v3537_v37 = vor.u32 %v3769_v48, %v3536_v59  ;;  %v3501_v59 = vor.u32 %v3756_v62, %v3498_v36  ;;  %v3472_v48 = vld [vmem:[%s4159_s3 + $0x20] sm:$0xf] }
 0x744   : > { %v1980_v4 = vmul.f32 %v4807_v27, %v4807_v27  ;;  %2337 = vmatpush.bf16.msrb.mxu2 %v3537_v37  ;;  %v3751_v37 = vld [vmem:[%s4159_s3 + $0x24] sm:$0xf] }
 0x746   : > { %1989 = vadd.xlane.f32.xlu2 %v1980_v4  ;;  %v3538_v4 = vld [vmem:[%s4159_s3 + $0xb0] sm:$0xf0] }
 0x747   : > { %v1952_v5 = vpop.xlane.xlu0 %1951 }
 0x748   : > { %v1965_v42 = vmul.f32 %v1952_v5, %v4236_v18  ;;  %v3544_v5 = vld [vmem:[%s4159_s3 + $0xa8] sm:$0xf] }
 0x74a   : > { %v4813_v19 = vsub.f32 %v4766_v35, %v1965_v42  ;;  %v3770_v42 = vld [vmem:[%s4159_s3 + $0xb4] sm:$0xf0] }
 0x74c   : > { %v1981_v8 = vmul.f32 %v4813_v19, %v4813_v19 }
 0x74e   : > { %1991 = vadd.xlane.f32.xlu2 %v1981_v8  ;;  %v3541_v8 = vor.u32 %v3767_v3, %v3538_v4  ;;  %v3753_v3 = vld [vmem:[%s4159_s3 + $0x2c] sm:$0xf0] }
 0x74f   : > { %v1954_v13 = vpop.xlane.xlu2 %1953  ;;  %v3473_v4 = vor.u32 %v3753_v3, %v3472_v48 }
 0x750   : > { %v1966_v14 = vmul.f32 %v1954_v13, %v4236_v18  ;;  %v3545_v13 = vor.u32 %v3770_v42, %v3544_v5  ;;  %2366 = vmatpush.bf16.msra.mxu3 %v3541_v8  ;;  %v3474_v5 = vld [vmem:[%s4159_s3 + $0x30] sm:$0xf0]  ;;  %v3480_v42 = vld [vmem:[%s4159_s3 + $0x28] sm:$0xf]  ;;  %v3754_v8 = vld [vmem:[%s4159_s3 + $0x34] sm:$0xf0] }
 0x752   : > { %v4819_v16 = vsub.f32 %v4772_v52, %v1966_v14  ;;  %v3768_v14 = vld [vmem:[%s4159_s3 + $0xac] sm:$0xf]  ;;  %2395 = vmatpush.bf16.msrb.mxu0 %v3545_v13 }
 0x754   : > { %v1982_v38 = vmul.f32 %v4819_v16, %v4819_v16 }
 0x756   : > { %1993 = vadd.xlane.f32.xlu1 %v1982_v38  ;;  %v3546_v38 = vld [vmem:[%s4159_s3 + $0xb8] sm:$0xf0] }
 0x770   : > { %v1956_v24 = vpop.xlane.xlu2 %1955 }
 0x771   : > { %v1967_v50 = vmul.f32 %v1956_v24, %v4236_v18  ;;  %v3549_v24 = vor.u32 %v3768_v14, %v3546_v38  ;;  %v3477_v14 = vor.u32 %v3751_v37, %v3474_v5  ;;  %v3481_v38 = vor.u32 %v3754_v8, %v3480_v42 }
 0x773   : > { %v4825_v1 = vsub.f32 %v4778_v33, %v1967_v50  ;;  %v3520_v50 = vld [vmem:[%s4159_s3 + $0x80] sm:$0xf]  ;;  %2424 = vmatpush.bf16.msrb.mxu1 %v3549_v24  ;;  %v3752_v24 = vld [vmem:[%s4159_s3 + $0x2c] sm:$0xf] }
 0x775   : > { %v1983_v46 = vmul.f32 %v4825_v1, %v4825_v1 }
 0x777   : > { %1995 = vadd.xlane.f32.xlu0 %v1983_v46  ;;  %v3765_v46 = vld [vmem:[%s4159_s3 + $0x8c] sm:$0xf0] }
 0x778   : > { %v1958_v32 = vpop.xlane.xlu2 %1957 }
 0x779   : > { %v1968_v25 = vmul.f32 %v1958_v32, %v4236_v18  ;;  %v3763_v32 = vld [vmem:[%s4159_s3 + $0x84] sm:$0xf] }
 0x77b   : > { %v4831_v21 = vsub.f32 %v4784_v54, %v1968_v25  ;;  %v3521_v25 = vor.u32 %v3765_v46, %v3520_v50  ;;  %v3482_v50 = vld [vmem:[%s4159_s3 + $0x38] sm:$0xf0] }
 0x77d   : > { %v1984_v26 = vmul.f32 %v4831_v21, %v4831_v21  ;;  %2338 = vmatpush.bf16.msrb.mxu2 %v3521_v25  ;;  %v3456_v25 = vld [vmem:[%s4159_s3] sm:$0xf] }
 0x77f   : > { %1997 = vadd.xlane.f32.xlu2 %v1984_v26  ;;  %v3522_v26 = vld [vmem:[%s4159_s3 + $0x90] sm:$0xf0] }
 0x780   : > { %v1960_v63 = vpop.xlane.xlu1 %1959 }
 0x781   : > { %v1969_v28 = vmul.f32 %v1960_v63, %v4236_v18  ;;  %v3528_v63 = vld [vmem:[%s4159_s3 + $0x88] sm:$0xf]  ;;  %2339 = vmatpush.bf16.msrb.mxu2 %v3505_v41  ;;  %v3469_v41 = vor.u32 %v3748_v43, %v3466_v31 }
 0x783   : > { %v4837_v29 = vsub.f32 %v4790_v61, %v1969_v28  ;;  %v3766_v28 = vld [vmem:[%s4159_s3 + $0x94] sm:$0xf0] }
 0x785   : > { %v1985_v0 = vmul.f32 %v4837_v29, %v4837_v29  ;;  %2340 = vmatpush.bf16.msrb.mxu2 %v3489_v53 }
 0x787   : > { %1999 = vadd.xlane.f32.xlu1 %v1985_v0  ;;  %v3525_v0 = vor.u32 %v3763_v32, %v3522_v26  ;;  %v3485_v32 = vor.u32 %v3752_v24, %v3482_v50  ;;  %v3749_v26 = vld [vmem:[%s4159_s3 + $0xc] sm:$0xf0] }
 0x788   : > { %v1962_v34 = vpop.xlane.xlu0 %1961 }
 0x789   : > { %v1970_v11 = vmul.f32 %v1962_v34, %v4236_v18  ;;  %v3529_v34 = vor.u32 %v3766_v28, %v3528_v63  ;;  %2367 = vmatpush.bf16.msra.mxu3 %v3525_v0  ;;  %2341 = vmatpush.bf16.msrb.mxu2 %v3473_v4  ;;  %v3747_v63 = vld [vmem:[%s4159_s3 + $0x4] sm:$0xf]  ;;  %v3457_v0 = vor.u32 %v3749_v26, %v3456_v25  ;;  %v4921_v4 = vld [vmem:[%s5345_s23] ss:$0 sm:$0xff] }
 0x78b   : > { %v4843_v20 = vsub.f32 %v4796_v2, %v1970_v11  ;;  %v3764_v11 = vld [vmem:[%s4159_s3 + $0x8c] sm:$0xf]  ;;  %2396 = vmatpush.bf16.msrb.mxu0 %v3529_v34  ;;  %v3458_v34 = vld [vmem:[%s4159_s3 + $0x10] sm:$0xf0] }
 0x78d   : > { %v1986_v40 = vmul.f32 %v4843_v20, %v4843_v20  ;;  %2368 = vmatpush.bf16.msra.mxu3 %v3509_v15  ;;  %2342 = vmatpush.bf16.msrb.mxu2 %v3457_v0 }
 0x78f   : > { %2001 = vadd.xlane.f32.xlu0 %v1986_v40  ;;  %v3530_v40 = vld [vmem:[%s4159_s3 + $0x98] sm:$0xf0]  ;;  %2397 = vmatpush.bf16.msrb.mxu0 %v3513_v39 }
 0x790   : > { %v3533_v30 = vor.u32 %v3764_v11, %v3530_v40  ;;  %v3464_v11 = vld [vmem:[%s4159_s3 + $0x8] sm:$0xf]  ;;  %v3461_v40 = vor.u32 %v3747_v63, %v3458_v34 }
 0x791   : > { %2369 = vmatpush.bf16.msra.mxu3 %v3493_v17 }
 0x792   : > { %2425 = vmatpush.bf16.msrb.mxu1 %v3533_v30  ;;  %v3750_v30 = vld [vmem:[%s4159_s3 + $0x14] sm:$0xf0] }
 0x793   : > { %2398 = vmatpush.bf16.msrb.mxu0 %v3497_v55  ;;  %v3465_v44 = vor.u32 %v3750_v30, %v3464_v11 }
 0x795   : > { %2370 = vmatpush.bf16.msra.mxu3 %v3477_v14 }
 0x796   : > { %2426 = vmatpush.bf16.msrb.mxu1 %v3517_v23 }
 0x797   : > { %2399 = vmatpush.bf16.msrb.mxu0 %v3481_v38 }
 0x799   : > { %2371 = vmatpush.bf16.msra.mxu3 %v3461_v40 }
 0x79a   : > { %2427 = vmatpush.bf16.msrb.mxu1 %v3501_v59 }
 0x79b   : > { %2400 = vmatpush.bf16.msrb.mxu0 %v3465_v44 }
 0x79e   : > { %2428 = vmatpush.bf16.msrb.mxu1 %v3485_v32 }
 0x7a2   : > { %2429 = vmatpush.bf16.msrb.mxu1 %v3469_v41 }
 0x7b1   : > { %v1988_v13 = vpop.xlane.xlu2 %1987 }
 0x7b2   : > { %v2003_v46 = vmul.f32 %v1988_v13, %v4236_v18 }
 0x7b4   : > { %v2011_v28 = vadd.f32 1e-06, %v2003_v46 }
 0x7b6   : > { %3939 = vrsqrt.f32 %v2011_v28  ;;  %vm2025_vm11 = vweird.f32 %v2011_v28 }
 0x7b9   : > { %v1990_v47 = vpop.xlane.xlu2 %1989 }
 0x7ba   : > { %v2004_v51 = vmul.f32 %v1990_v47, %v4236_v18 }
 0x7bc   : > { %v3940_v57 = vpop.eup %3939  ;;  %v2012_v15 = vadd.f32 1e-06, %v2004_v51 }
 0x7bd   : > { %v2020_v39 = vmul.f32 %v3940_v57, %v2011_v28  ;;  %vm2026_vm9 = vweird.f32 %v3940_v57 }
 0x7be   : > { %3941 = vrsqrt.f32 %v2012_v15  ;;  %vm2027_vm4 = vmor %vm2025_vm11, %vm2026_vm9  ;;  %vm2035_vm6 = vweird.f32 %v2012_v15 }
 0x7bf   : > { %v2021_v49 = vmul.f32 %v3940_v57, %v2020_v39 }
 0x7c1   : > { %v2022_v9 = vmul.f32 0.5, %v2021_v49  ;;  %v1992_v23 = vpop.xlane.xlu2 %1991 }
 0x7c2   : > { %v2005_v6 = vmul.f32 %v1992_v23, %v4236_v18 }
 0x7c3   : > { %v2023_v58 = vsub.f32 1.5, %v2022_v9 }
 0x7c4   : > { %v3942_v7 = vpop.eup %3941  ;;  %v2013_v53 = vadd.f32 1e-06, %v2005_v6 }
 0x7c5   : > { %v2024_v56 = vmul.f32 %v3940_v57, %v2023_v58  ;;  %v2030_v60 = vmul.f32 %v3942_v7, %v2012_v15  ;;  %vm2036_vm5 = vweird.f32 %v3942_v7 }
 0x7c6   : > { %3943 = vrsqrt.f32 %v2013_v53  ;;  %vm2037_vm7 = vmor %vm2035_vm6, %vm2036_vm5  ;;  %vm2045_vm12 = vweird.f32 %v2013_v53 }
 0x7c7   : > { %v2031_v10 = vmul.f32 %v3942_v7, %v2030_v60  ;;  %v2028_v17 = vsel %vm2027_vm4, %v3940_v57, %v2024_v56 }
 0x7c8   : > { %v2099_v3 = vmul.f32 %v2028_v17, %v4801_v12  ;;  %v4930_v12 = vld [vmem:[%s5346_s15] ss:$0 sm:$0xff] }
 0x7c9   : > { %v2032_v55 = vmul.f32 0.5, %v2031_v10  ;;  %v1994_v62 = vpop.xlane.xlu1 %1993 }
 0x7ca   : > { %v2006_v36 = vmul.f32 %v1994_v62, %v4236_v18  ;;  %v2110_v38 = vmul.f32 %v4921_v4, %v2099_v3 }
 0x7cb   : > { %v2033_v59 = vsub.f32 1.5, %v2032_v55 }
 0x7cc   : > { %v3944_v48 = vpop.eup %3943  ;;  %v2014_v37 = vadd.f32 1e-06, %v2006_v36  ;;  %v2121_v25 = vadd.f32 %v4930_v12, %v2110_v38 }
 0x7cd   : > { %v2034_v5 = vmul.f32 %v3942_v7, %v2033_v59  ;;  %v2040_v42 = vmul.f32 %v3944_v48, %v2013_v53  ;;  %vm2046_vm8 = vweird.f32 %v3944_v48 }
 0x7ce   : > { %3945 = vrsqrt.f32 %v2014_v37  ;;  %vm2047_vm13 = vmor %vm2045_vm12, %vm2046_vm8  ;;  %vm2055_vm10 = vweird.f32 %v2014_v37 }
 0x7cf   : > { %v2038_v8 = vsel %vm2037_vm7, %v3942_v7, %v2034_v5  ;;  %v2041_v13 = vmul.f32 %v3944_v48, %v2040_v42 }
 0x7d0   : > { %v2100_v14 = vmul.f32 %v2038_v8, %v4807_v27 }
 0x7d1   : > { %v2042_v24 = vmul.f32 0.5, %v2041_v13 }
 0x7d2   : > { %v2111_v50 = vmul.f32 %v4921_v4, %v2100_v14 }
 0x7d3   : > { %v2043_v46 = vsub.f32 1.5, %v2042_v24 }
 0x7d4   : > { %v3946_v32 = vpop.eup %3945  ;;  %v2122_v26 = vadd.f32 %v4930_v12, %v2111_v50 }
 0x7d5   : > { %v2044_v63 = vmul.f32 %v3944_v48, %v2043_v46  ;;  %v2050_v27 = vmul.f32 %v3946_v32, %v2014_v37  ;;  %vm2056_vm14 = vweird.f32 %v3946_v32 }
 0x7d6   : > { %v2129_v28 = vpack.c.bf16 %v2122_v26, %v2121_v25  ;;  %vm2057_vm15 = vmor %vm2055_vm10, %vm2056_vm14 }
 0x7d7   : > { %v2051_v0 = vmul.f32 %v3946_v32, %v2050_v27  ;;  %v2048_v34 = vsel %vm2047_vm13, %v3944_v48, %v2044_v63 }
 0x7d8   : > { %2343 = vmatmul.bf16.vlgmr.msrb.gmra.mxu2 %v2129_v28  ;;  %2372 = vmatmul.bf16.vlgmr.msra.gmra.mxu3 %v2129_v28  ;;  %v2101_v30 = vmul.f32 %v2048_v34, %v4813_v19 }
 0x7d9   : > { %v2052_v11 = vmul.f32 0.5, %v2051_v0  ;;  %2401 = vmatmul.bf16.vlgmr.msrb.gmra.mxu0 %v2129_v28  ;;  %2430 = vmatmul.bf16.vlgmr.msrb.gmra.mxu1 %v2129_v28 }
 0x7da   : > { %v2112_v41 = vmul.f32 %v4921_v4, %v2101_v30 }
 0x7db   : > { %v2053_v40 = vsub.f32 1.5, %v2052_v11 }
 0x7dc   : > { %v2123_v51 = vadd.f32 %v4930_v12, %v2112_v41 }
 0x7dd   : > { %v2054_v43 = vmul.f32 %v3946_v32, %v2053_v40 }
 0x7df   : > { %v2058_v31 = vsel %vm2057_vm15, %v3946_v32, %v2054_v43 }
 0x7e0   : > { %v2102_v44 = vmul.f32 %v2058_v31, %v4819_v16 }
 0x7e2   : > { %v2113_v47 = vmul.f32 %v4921_v4, %v2102_v44 }
 0x7e4   : > { %v2124_v57 = vadd.f32 %v4930_v12, %v2113_v47 }
 0x7e6   : > { %v2130_v15 = vpack.c.bf16 %v2124_v57, %v2123_v51 }
 0x7e8   : > { %2348 = vmatmul.bf16.gmra.mxu2 %v2130_v15  ;;  %2377 = vmatmul.bf16.gmra.mxu3 %v2130_v15 }
 0x7e9   : > { %2406 = vmatmul.bf16.gmra.mxu0 %v2130_v15  ;;  %2435 = vmatmul.bf16.gmra.mxu1 %v2130_v15 }
 0x7ea   : > { %v1996_v19 = vpop.xlane.xlu0 %1995 }
 0x7eb   : > { %v2007_v39 = vmul.f32 %v1996_v19, %v4236_v18 }
 0x7ed   : > { %v2015_v49 = vadd.f32 1e-06, %v2007_v39  ;;  %v3802_v39 = vld [vmem:[%s4170_s1 + $0xb8] sm:$0xff] }
 0x7ee   : > { %3069 = vmatpush.bf16.msra.mxu0 %v3802_v39 }
 0x7ef   : > { %3947 = vrsqrt.f32 %v2015_v49  ;;  %vm2065_vm1 = vweird.f32 %v2015_v49 }
 0x7f2   : > { %v1998_v9 = vpop.xlane.xlu2 %1997 }
 0x7f3   : > { %v2008_v16 = vmul.f32 %v1998_v9, %v4236_v18  ;;  %v3794_v9 = vld [vmem:[%s4170_s1 + $0x78] sm:$0xff] }
 0x7f4   : > { %3040 = vmatpush.bf16.msrb.mxu3 %v3794_v9 }
 0x7f5   : > { %v3948_v23 = vpop.eup %3947  ;;  %v2016_v6 = vadd.f32 1e-06, %v2008_v16  ;;  %v3800_v16 = vld [vmem:[%s4170_s1 + $0xa8] sm:$0xff] }
 0x7f6   : > { %v2060_v58 = vmul.f32 %v3948_v23, %v2015_v49  ;;  %vm2066_vm0 = vweird.f32 %v3948_v23  ;;  %v3809_v49 = vld [vmem:[%s4170_s1 + $0xf0] sm:$0xff] }
 0x7f7   : > { %3949 = vrsqrt.f32 %v2016_v6  ;;  %vm2067_vm2 = vmor %vm2065_vm1, %vm2066_vm0  ;;  %vm2075_vm9 = vweird.f32 %v2016_v6 }
 0x7f8   : > { %v2061_v7 = vmul.f32 %v3948_v23, %v2060_v58  ;;  %v3793_v58 = vld [vmem:[%s4170_s1 + $0x70] sm:$0xff] }
 0x7f9   : > { %3041 = vmatpush.bf16.msrb.mxu3 %v3793_v58  ;;  %v3779_v58 = vld [vmem:[%s4170_s1] sm:$0xff] }
 0x7fa   : > { %v2062_v53 = vmul.f32 0.5, %v2061_v7  ;;  %v2000_v56 = vpop.xlane.xlu1 %1999  ;;  %v3799_v7 = vld [vmem:[%s4170_s1 + $0xa0] sm:$0xff] }
 0x7fb   : > { %v2009_v60 = vmul.f32 %v2000_v56, %v4236_v18  ;;  %v3784_v56 = vld [vmem:[%s4170_s1 + $0x28] sm:$0xff] }
 0x7fc   : > { %v2063_v10 = vsub.f32 1.5, %v2062_v53  ;;  %v3807_v53 = vld [vmem:[%s4170_s1 + $0xe0] sm:$0xff] }
 0x7fd   : > { %v3950_v17 = vpop.eup %3949  ;;  %v2017_v55 = vadd.f32 1e-06, %v2009_v60  ;;  %v3792_v60 = vld [vmem:[%s4170_s1 + $0x68] sm:$0xff] }
 0x7fe   : > { %v2064_v62 = vmul.f32 %v3948_v23, %v2063_v10  ;;  %v2070_v36 = vmul.f32 %v3950_v17, %v2016_v6  ;;  %vm2076_vm3 = vweird.f32 %v3950_v17  ;;  %v3785_v6 = vld [vmem:[%s4170_s1 + $0x30] sm:$0xff]  ;;  %3042 = vmatpush.bf16.msrb.mxu3 %v3792_v60  ;;  %v3798_v10 = vld [vmem:[%s4170_s1 + $0x98] sm:$0xff] }
 0x7ff   : > { %3951 = vrsqrt.f32 %v2017_v55  ;;  %vm2077_vm11 = vmor %vm2075_vm9, %vm2076_vm3  ;;  %vm2085_vm5 = vweird.f32 %v2017_v55 }
 0x800   : > { %v2071_v59 = vmul.f32 %v3950_v17, %v2070_v36  ;;  %v2068_v48 = vsel %vm2067_vm2, %v3948_v23, %v2064_v62  ;;  %v3808_v23 = vld [vmem:[%s4170_s1 + $0xe8] sm:$0xff]  ;;  %v3791_v62 = vld [vmem:[%s4170_s1 + $0x60] sm:$0xff] }
 0x801   : > { %v2103_v13 = vmul.f32 %v2068_v48, %v4825_v1  ;;  %v2165_v36 = vld [vmem:[%s4165_s19] sm:$0xf] }
 0x802   : > { %v2072_v3 = vmul.f32 0.5, %v2071_v59  ;;  %v2002_v37 = vpop.xlane.xlu0 %2001  ;;  %3043 = vmatpush.bf16.msrb.mxu3 %v3791_v62  ;;  %v4976_v59 = vperm.slane %v2165_v36, 2  ;;  %v4978_v48 = vperm.slane %v2165_v36, 3 }
 0x803   : > { %v2010_v5 = vmul.f32 %v2002_v37, %v4236_v18  ;;  %v2114_v25 = vmul.f32 %v4921_v4, %v2103_v13  ;;  %v3805_v37 = vld [vmem:[%s4170_s1 + $0xd0] sm:$0xff]  ;;  %v3790_v13 = vld [vmem:[%s4170_s1 + $0x58] sm:$0xff] }
 0x804   : > { %v2073_v42 = vsub.f32 1.5, %v2072_v3  ;;  %v3797_v3 = vld [vmem:[%s4170_s1 + $0x90] sm:$0xff] }
 0x805   : > { %v3952_v8 = vpop.eup %3951  ;;  %v2018_v14 = vadd.f32 1e-06, %v2010_v5  ;;  %v2125_v28 = vadd.f32 %v4930_v12, %v2114_v25 }
 0x806   : > { %v2074_v38 = vmul.f32 %v3950_v17, %v2073_v42  ;;  %v2080_v24 = vmul.f32 %v3952_v8, %v2017_v55  ;;  %vm2086_vm4 = vweird.f32 %v3952_v8  ;;  %v3783_v55 = vld [vmem:[%s4170_s1 + $0x20] sm:$0xff]  ;;  %3044 = vmatpush.bf16.msrb.mxu3 %v3790_v13 }
 0x807   : > { %3953 = vrsqrt.f32 %v2018_v14  ;;  %vm2087_vm6 = vmor %vm2085_vm5, %vm2086_vm4  ;;  %vm2095_vm8 = vweird.f32 %v2018_v14 }
 0x808   : > { %v2078_v50 = vsel %vm2077_vm11, %v3950_v17, %v2074_v38  ;;  %v2081_v46 = vmul.f32 %v3952_v8, %v2080_v24  ;;  %v3806_v17 = vld [vmem:[%s4170_s1 + $0xd8] sm:$0xff]  ;;  %v4990_v24 = vperm.slane %v2165_v36, 0 }
 0x809   : > { %v2104_v32 = vmul.f32 %v2078_v50, %v4831_v21  ;;  %v4992_v50 = vperm.slane %v2165_v36, 1 }
 0x80a   : > { %v2082_v26 = vmul.f32 0.5, %v2081_v46  ;;  %v3796_v46 = vld [vmem:[%s4170_s1 + $0x88] sm:$0xff] }
 0x80b   : > { %v2115_v18 = vmul.f32 %v4921_v4, %v2104_v32  ;;  %v3804_v32 = vld [vmem:[%s4170_s1 + $0xc8] sm:$0xff] }
 0x80c   : > { %v2083_v63 = vsub.f32 1.5, %v2082_v26 }
 0x80d   : > { %v3954_v27 = vpop.eup %3953  ;;  %v2126_v1 = vadd.f32 %v4930_v12, %v2115_v18  ;;  %v3781_v18 = vld [vmem:[%s4170_s1 + $0x10] sm:$0xff] }
 0x80e   : > { %v2084_v0 = vmul.f32 %v3952_v8, %v2083_v63  ;;  %v2090_v34 = vmul.f32 %v3954_v27, %v2018_v14  ;;  %vm2096_vm7 = vweird.f32 %v3954_v27  ;;  %v3789_v63 = vld [vmem:[%s4170_s1 + $0x50] sm:$0xff] }
 0x80f   : > { %v2131_v11 = vpack.c.bf16 %v2126_v1, %v2125_v28  ;;  %vm2097_vm12 = vmor %vm2095_vm8, %vm2096_vm7  ;;  %3045 = vmatpush.bf16.msrb.mxu3 %v3789_v63 }
 0x810   : > { %v2091_v40 = vmul.f32 %v3954_v27, %v2090_v34  ;;  %v2088_v21 = vsel %vm2087_vm6, %v3952_v8, %v2084_v0  ;;  %v3782_v8 = vld [vmem:[%s4170_s1 + $0x18] sm:$0xff] }
 0x811   : > { %2353 = vmatmul.bf16.gmra.mxu2 %v2131_v11  ;;  %2382 = vmatmul.bf16.gmra.mxu3 %v2131_v11  ;;  %v2105_v31 = vmul.f32 %v2088_v21, %v4837_v29  ;;  %v3803_v21 = vld [vmem:[%s4170_s1 + $0xc0] sm:$0xff] }
 0x812   : > { %v2092_v30 = vmul.f32 0.5, %v2091_v40  ;;  %2411 = vmatmul.bf16.gmra.mxu0 %v2131_v11  ;;  %2440 = vmatmul.bf16.gmra.mxu1 %v2131_v11  ;;  %v3795_v40 = vld [vmem:[%s4170_s1 + $0x80] sm:$0xff] }
 0x813   : > { %v2116_v51 = vmul.f32 %v4921_v4, %v2105_v31 }
 0x814   : > { %v2093_v43 = vsub.f32 1.5, %v2092_v30 }
 0x815   : > { %v2127_v15 = vadd.f32 %v4930_v12, %v2116_v51  ;;  %v3780_v51 = vld [vmem:[%s4170_s1 + $0x8] sm:$0xff] }
 0x816   : > { %v2094_v44 = vmul.f32 %v3954_v27, %v2093_v43 }
 0x818   : > { %v2098_v41 = vsel %vm2097_vm12, %v3954_v27, %v2094_v44 }
 0x819   : > { %v2106_v47 = vmul.f32 %v2098_v41, %v4843_v20  ;;  %v3810_v20 = vld [vmem:[%s4170_s1 + $0xf8] sm:$0xff] }
 0x81a   : > { %3098 = vmatpush.bf16.msra.mxu1 %v3810_v20 }
 0x81b   : > { %v2117_v57 = vmul.f32 %v4921_v4, %v2106_v47  ;;  %v3801_v4 = vld [vmem:[%s4170_s1 + $0xb0] sm:$0xff] }
 0x81c   : > { %3070 = vmatpush.bf16.msra.mxu0 %v3801_v4 }
 0x81d   : > { %v2128_v19 = vadd.f32 %v4930_v12, %v2117_v57  ;;  %v3786_v12 = vld [vmem:[%s4170_s1 + $0x38] sm:$0xff]  ;;  %v3788_v57 = vld [vmem:[%s4170_s1 + $0x48] sm:$0xff] }
 0x81e   : > { %3099 = vmatpush.bf16.msra.mxu1 %v3809_v49  ;;  %3011 = vmatpush.bf16.msra.mxu2 %v3786_v12 }
 0x81f   : > { %v2132_v29 = vpack.c.bf16 %v2128_v19, %v2127_v15  ;;  %3046 = vmatpush.bf16.msrb.mxu3 %v3788_v57 }
 0x820   : > { %3071 = vmatpush.bf16.msra.mxu0 %v3800_v16 }
 0x821   : > { %2358 = vmatmul.bf16.gmra.mxu2 %v2132_v29  ;;  %2387 = vmatmul.bf16.gmra.mxu3 %v2132_v29 }
 0x822   : > { %2416 = vmatmul.bf16.gmra.mxu0 %v2132_v29  ;;  %2445 = vmatmul.bf16.gmra.mxu1 %v2132_v29 }
 0x823   : > { %3100 = vmatpush.bf16.msra.mxu1 %v3808_v23  ;;  %3012 = vmatpush.bf16.msra.mxu2 %v3785_v6 }
 0x824   : > { %3072 = vmatpush.bf16.msra.mxu0 %v3799_v7  ;;  %v3787_v7 = vld [vmem:[%s4170_s1 + $0x40] sm:$0xff] }
 0x825   : > { %3047 = vmatpush.bf16.msrb.mxu3 %v3787_v7 }
 0x827   : > { %3101 = vmatpush.bf16.msra.mxu1 %v3807_v53  ;;  %3013 = vmatpush.bf16.msra.mxu2 %v3784_v56 }
 0x828   : > { %3073 = vmatpush.bf16.msra.mxu0 %v3798_v10 }
 0x82b   : > { %3102 = vmatpush.bf16.msra.mxu1 %v3806_v17  ;;  %3014 = vmatpush.bf16.msra.mxu2 %v3783_v55 }
 0x82c   : > { %3074 = vmatpush.bf16.msra.mxu0 %v3797_v3 }
 0x82f   : > { %3103 = vmatpush.bf16.msra.mxu1 %v3805_v37  ;;  %3015 = vmatpush.bf16.msra.mxu2 %v3782_v8 }
 0x830   : > { %3075 = vmatpush.bf16.msra.mxu0 %v3796_v46 }
 0x833   : > { %3104 = vmatpush.bf16.msra.mxu1 %v3804_v32  ;;  %3016 = vmatpush.bf16.msra.mxu2 %v3781_v18 }
 0x834   : > { %3076 = vmatpush.bf16.msra.mxu0 %v3795_v40 }
 0x837   : > { %3105 = vmatpush.bf16.msra.mxu1 %v3803_v21  ;;  %3017 = vmatpush.bf16.msra.mxu2 %v3780_v51 }
 0x83b   : > { %3018 = vmatpush.bf16.msra.mxu2 %v3779_v58 }
 0x856   : > { %v2402_v5 = vpop.f32.mrf.mxu0  ;;  %v2431_v42 = vpop.f32.mrf.mxu1 }
 0x857   : > { %v4985_v14 = vadd.f32 %v2402_v5, %v4976_v59  ;;  %v4988_v38 = vadd.f32 %v2431_v42, %v4978_v48 }
 0x859   : > { %v2453_v25 = vmul.f32 %v4985_v14, %v4985_v14  ;;  %v2454_v26 = vmul.f32 %v4988_v38, %v4988_v38 }
 0x85b   : > { %v2485_v27 = vmul.f32 %v2453_v25, %v4985_v14  ;;  %v2486_v28 = vmul.f32 %v2454_v26, %v4988_v38  ;;  %v2344_v1 = vpop.f32.mrf.mxu2  ;;  %v2373_v0 = vpop.f32.mrf.mxu3 }
 0x85c   : > { %v5005_v34 = vadd.f32 %v2344_v1, %v4990_v24  ;;  %v5008_v11 = vadd.f32 %v2373_v0, %v4992_v50 }
 0x85d   : > { %v2517_v30 = vmul.f32 0.044715, %v2485_v27  ;;  %v2518_v43 = vmul.f32 0.044715, %v2486_v28 }
 0x85e   : > { %v2451_v31 = vmul.f32 %v5005_v34, %v5005_v34  ;;  %v2452_v44 = vmul.f32 %v5008_v11, %v5008_v11  ;;  %v2404_v41 = vpop.f32.mrf.mxu0  ;;  %v2433_v47 = vpop.f32.mrf.mxu1 }
 0x85f   : > { %v2549_v15 = vadd.f32 %v2517_v30, %v4985_v14  ;;  %v2550_v19 = vadd.f32 %v2518_v43, %v4988_v38  ;;  %v5021_v29 = vadd.f32 %v2404_v41, %v4976_v59  ;;  %v5024_v39 = vadd.f32 %v2433_v47, %v4978_v48 }
 0x860   : > { %v2483_v20 = vmul.f32 %v2451_v31, %v5005_v34  ;;  %v2484_v4 = vmul.f32 %v2452_v44, %v5008_v11 }
 0x861   : > { %v2581_v49 = vmul.f32 0.7978846, %v2549_v15  ;;  %v2582_v12 = vmul.f32 0.7978846, %v2550_v19  ;;  %v2457_v9 = vmul.f32 %v5021_v29, %v5021_v29  ;;  %v2458_v16 = vmul.f32 %v5024_v39, %v5024_v39 }
 0x862   : > { %v2515_v23 = vmul.f32 0.044715, %v2483_v20  ;;  %v2516_v6 = vmul.f32 0.044715, %v2484_v4 }
 0x863   : > { %3955 = vtanh.f32 %v2581_v49  ;;  %v2489_v53 = vmul.f32 %v2457_v9, %v5021_v29  ;;  %v2490_v56 = vmul.f32 %v2458_v16, %v5024_v39  ;;  %v2346_v60 = vpop.f32.mrf.mxu2  ;;  %v2375_v10 = vpop.f32.mrf.mxu3 }
 0x864   : > { %3957 = vtanh.f32 %v2582_v12  ;;  %v2547_v17 = vadd.f32 %v2515_v23, %v5005_v34  ;;  %v2548_v55 = vadd.f32 %v2516_v6, %v5008_v11  ;;  %v5039_v62 = vadd.f32 %v2346_v60, %v4990_v24 }
 0x865   : > { %v2521_v36 = vmul.f32 0.044715, %v2489_v53  ;;  %v2522_v3 = vmul.f32 0.044715, %v2490_v56  ;;  %v5042_v37 = vadd.f32 %v2375_v10, %v4992_v50 }
 0x866   : > { %v2579_v5 = vmul.f32 0.7978846, %v2547_v17  ;;  %v2580_v42 = vmul.f32 0.7978846, %v2548_v55  ;;  %v2455_v8 = vmul.f32 %v5039_v62, %v5039_v62  ;;  %v2407_v13 = vpop.f32.mrf.mxu0  ;;  %v2436_v46 = vpop.f32.mrf.mxu1 }
 0x867   : > { %v2553_v32 = vadd.f32 %v2521_v36, %v5021_v29  ;;  %v2554_v25 = vadd.f32 %v2522_v3, %v5024_v39  ;;  %v2456_v26 = vmul.f32 %v5042_v37, %v5042_v37  ;;  %v5051_v18 = vadd.f32 %v2407_v13, %v4976_v59 }
 0x868   : > { %3959 = vtanh.f32 %v2579_v5  ;;  %v2487_v63 = vmul.f32 %v2455_v8, %v5039_v62  ;;  %v5055_v27 = vadd.f32 %v2436_v46, %v4978_v48 }
 0x869   : > { %v3956_v28 = vpop.eup %3955  ;;  %3961 = vtanh.f32 %v2580_v42  ;;  %v2585_v1 = vmul.f32 0.7978846, %v2553_v32  ;;  %v2586_v0 = vmul.f32 0.7978846, %v2554_v25  ;;  %v2488_v40 = vmul.f32 %v2456_v26, %v5042_v37 }
 0x86a   : > { %v3958_v21 = vpop.eup %3957  ;;  %v2645_v30 = vadd.f32 1.0, %v3956_v28  ;;  %v2519_v43 = vmul.f32 0.044715, %v2487_v63  ;;  %v2461_v31 = vmul.f32 %v5051_v18, %v5051_v18  ;;  %v2462_v44 = vmul.f32 %v5055_v27, %v5055_v27 }
 0x86b   : > { %v2646_v41 = vadd.f32 1.0, %v3958_v21  ;;  %3963 = vtanh.f32 %v2585_v1  ;;  %v2520_v47 = vmul.f32 0.044715, %v2488_v40  ;;  %v2349_v51 = vpop.f32.mrf.mxu2  ;;  %v2378_v57 = vpop.f32.mrf.mxu3 }
 0x86c   : > { %3965 = vtanh.f32 %v2586_v0  ;;  %v2551_v15 = vadd.f32 %v2519_v43, %v5039_v62  ;;  %v2493_v19 = vmul.f32 %v2461_v31, %v5051_v18  ;;  %v2494_v4 = vmul.f32 %v2462_v44, %v5055_v27 }
 0x86d   : > { %v2552_v20 = vadd.f32 %v2520_v47, %v5042_v37  ;;  %v5067_v49 = vadd.f32 %v2349_v51, %v4990_v24  ;;  %v2677_v9 = vmul.f32 0.5, %v2645_v30  ;;  %v5070_v6 = vadd.f32 %v2378_v57, %v4992_v50 }
 0x86e   : > { %v3960_v12 = vpop.eup %3959  ;;  %v2583_v16 = vmul.f32 0.7978846, %v2551_v15  ;;  %v2525_v23 = vmul.f32 0.044715, %v2493_v19  ;;  %v2678_v7 = vmul.f32 0.5, %v2646_v41  ;;  %v2409_v25 = vpop.f32.mrf.mxu0 }
 0x86f   : > { %v3962_v58 = vpop.eup %3961  ;;  %v2643_v53 = vadd.f32 1.0, %v3960_v12  ;;  %v2584_v56 = vmul.f32 0.7978846, %v2552_v20  ;;  %v2526_v60 = vmul.f32 0.044715, %v2494_v4  ;;  %v2459_v55 = vmul.f32 %v5067_v49, %v5067_v49  ;;  %v2438_v0 = vpop.f32.mrf.mxu1 }
 0x870   : > { %v2644_v10 = vadd.f32 1.0, %v3962_v58  ;;  %3967 = vtanh.f32 %v2583_v16  ;;  %v2557_v17 = vadd.f32 %v2525_v23, %v5051_v18  ;;  %v2460_v42 = vmul.f32 %v5070_v6, %v5070_v6 }
 0x871   : > { %v3964_v36 = vpop.eup %3963  ;;  %v2675_v3 = vmul.f32 0.5, %v2643_v53  ;;  %3969 = vtanh.f32 %v2584_v56  ;;  %v2558_v5 = vadd.f32 %v2526_v60, %v5055_v27  ;;  %v2709_v13 = vmul.f32 %v2677_v9, %v4985_v14 }
 0x872   : > { %v3966_v8 = vpop.eup %3965  ;;  %v2649_v46 = vadd.f32 1.0, %v3964_v36  ;;  %v2491_v32 = vmul.f32 %v2459_v55, %v5067_v49  ;;  %v2710_v26 = vmul.f32 %v2678_v7, %v4988_v38  ;;  %v2676_v63 = vmul.f32 0.5, %v2644_v10 }
 0x873   : > { %v2650_v28 = vadd.f32 1.0, %v3966_v8  ;;  %v2492_v1 = vmul.f32 %v2460_v42, %v5070_v6  ;;  %v2351_v40 = vpop.f32.mrf.mxu2  ;;  %v2707_v21 = vmul.f32 %v2675_v3, %v5005_v34  ;;  %v2589_v43 = vmul.f32 0.7978846, %v2557_v17  ;;  %v2380_v7 = vpop.f32.mrf.mxu3 }
 0x874   : > { %v2681_v30 = vmul.f32 0.5, %v2649_v46  ;;  %v2523_v31 = vmul.f32 0.044715, %v2491_v32  ;;  %v2590_v41 = vmul.f32 0.7978846, %v2558_v5  ;;  %v5084_v47 = vadd.f32 %v2409_v25, %v4976_v59 }
 0x875   : > { %v2682_v44 = vmul.f32 0.5, %v2650_v28  ;;  %v2524_v14 = vmul.f32 0.044715, %v2492_v1  ;;  %v5089_v15 = vadd.f32 %v2438_v0, %v4978_v48  ;;  %v5092_v19 = vadd.f32 %v2351_v40, %v4990_v24 }
 0x876   : > { %v3968_v51 = vpop.eup %3967  ;;  %v2713_v38 = vmul.f32 %v2681_v30, %v5021_v29  ;;  %v2555_v57 = vadd.f32 %v2523_v31, %v5067_v49  ;;  %v2708_v20 = vmul.f32 %v2676_v63, %v5008_v11  ;;  %v2465_v9 = vmul.f32 %v5084_v47, %v5084_v47 }
 0x877   : > { %v3970_v34 = vpop.eup %3969  ;;  %v2714_v4 = vmul.f32 %v2682_v44, %v5024_v39  ;;  %v2647_v12 = vadd.f32 1.0, %v3968_v51  ;;  %v2556_v29 = vadd.f32 %v2524_v14, %v5070_v6  ;;  %v2466_v58 = vmul.f32 %v5089_v15, %v5089_v15 }
 0x878   : > { %v2741_v16 = vpack.c.bf16 %v2713_v38, %v2709_v13  ;;  %v2648_v23 = vadd.f32 1.0, %v3970_v34  ;;  %3971 = vtanh.f32 %v2589_v43  ;;  %v2497_v60 = vmul.f32 %v2465_v9, %v5084_v47 }
 0x879   : > { %v2742_v53 = vpack.c.bf16 %v2714_v4, %v2710_v26  ;;  %v2679_v56 = vmul.f32 0.5, %v2647_v12  ;;  %v2587_v10 = vmul.f32 0.7978846, %v2555_v57  ;;  %v2498_v39 = vmul.f32 %v2466_v58, %v5089_v15 }
 0x87a   : > { %v2680_v11 = vmul.f32 0.5, %v2648_v23  ;;  %v2463_v17 = vmul.f32 %v5092_v19, %v5092_v19  ;;  %3077 = vmatmul.bf16.vlgmr.msra.gmra.mxu0 %v2741_v16  ;;  %3973 = vtanh.f32 %v2590_v41  ;;  %v2529_v36 = vmul.f32 0.044715, %v2497_v60 }
 0x87b   : > { %v2711_v55 = vmul.f32 %v2679_v56, %v5039_v62  ;;  %v5107_v3 = vadd.f32 %v2380_v7, %v4992_v50  ;;  %3106 = vmatmul.bf16.vlgmr.msra.gmra.mxu1 %v2742_v53  ;;  %v2588_v42 = vmul.f32 0.7978846, %v2556_v29  ;;  %v2530_v8 = vmul.f32 0.044715, %v2498_v39 }
 0x87c   : > { %v2712_v5 = vmul.f32 %v2680_v11, %v5042_v37  ;;  %v2495_v13 = vmul.f32 %v2463_v17, %v5092_v19  ;;  %v2561_v32 = vadd.f32 %v2529_v36, %v5084_v47  ;;  %3975 = vtanh.f32 %v2587_v10 }
 0x87d   : > { %v2739_v46 = vpack.c.bf16 %v2711_v55, %v2707_v21  ;;  %v2464_v25 = vmul.f32 %v5107_v3, %v5107_v3  ;;  %v2562_v62 = vadd.f32 %v2530_v8, %v5089_v15  ;;  %3977 = vtanh.f32 %v2588_v42 }
 0x87e   : > { %v2740_v26 = vpack.c.bf16 %v2712_v5, %v2708_v20  ;;  %v2527_v63 = vmul.f32 0.044715, %v2495_v13  ;;  %v3972_v28 = vpop.eup %3971  ;;  %v2593_v1 = vmul.f32 0.7978846, %v2561_v32 }
 0x87f   : > { %v2496_v0 = vmul.f32 %v2464_v25, %v5107_v3  ;;  %3019 = vmatmul.bf16.vlgmr.msra.gmra.mxu2 %v2739_v46  ;;  %v2594_v37 = vmul.f32 0.7978846, %v2562_v62  ;;  %v2653_v41 = vadd.f32 1.0, %v3972_v28 }
 0x880   : > { %v2559_v40 = vadd.f32 %v2527_v63, %v5092_v19  ;;  %3048 = vmatmul.bf16.vlgmr.msrb.gmra.mxu3 %v2740_v26  ;;  %v3974_v21 = vpop.eup %3973  ;;  %3979 = vtanh.f32 %v2593_v1 }
 0x881   : > { %v2528_v30 = vmul.f32 0.044715, %v2496_v0  ;;  %3981 = vtanh.f32 %v2594_v37  ;;  %v2654_v51 = vadd.f32 1.0, %v3974_v21  ;;  %v2685_v12 = vmul.f32 0.5, %v2653_v41 }
 0x882   : > { %v2591_v43 = vmul.f32 0.7978846, %v2559_v40  ;;  %v3976_v44 = vpop.eup %3975 }
 0x883   : > { %v2560_v31 = vadd.f32 %v2528_v30, %v5107_v3  ;;  %v3978_v38 = vpop.eup %3977  ;;  %v2651_v34 = vadd.f32 1.0, %v3976_v44  ;;  %v2686_v16 = vmul.f32 0.5, %v2654_v51  ;;  %v2717_v60 = vmul.f32 %v2685_v12, %v5051_v18 }
 0x884   : > { %3983 = vtanh.f32 %v2591_v43  ;;  %v2652_v58 = vadd.f32 1.0, %v3978_v38 }
 0x885   : > { %v2592_v14 = vmul.f32 0.7978846, %v2560_v31  ;;  %v2683_v56 = vmul.f32 0.5, %v2651_v34  ;;  %v2718_v39 = vmul.f32 %v2686_v16, %v5055_v27 }
 0x886   : > { %v3980_v57 = vpop.eup %3979  ;;  %v2684_v42 = vmul.f32 0.5, %v2652_v58 }
 0x887   : > { %3985 = vtanh.f32 %v2592_v14  ;;  %v3982_v20 = vpop.eup %3981  ;;  %v2657_v4 = vadd.f32 1.0, %v3980_v57  ;;  %v2715_v32 = vmul.f32 %v2683_v56, %v5067_v49 }
 0x888   : > { %v2658_v9 = vadd.f32 1.0, %v3982_v20  ;;  %v2716_v49 = vmul.f32 %v2684_v42, %v5070_v6 }
 0x889   : > { %v2689_v29 = vmul.f32 0.5, %v2657_v4 }
 0x88a   : > { %v3984_v23 = vpop.eup %3983  ;;  %v2690_v7 = vmul.f32 0.5, %v2658_v9 }
 0x88b   : > { %v2655_v53 = vadd.f32 1.0, %v3984_v23  ;;  %v2721_v11 = vmul.f32 %v2689_v29, %v5084_v47 }
 0x88c   : > { %v2722_v17 = vmul.f32 %v2690_v7, %v5089_v15 }
 0x88d   : > { %v3986_v10 = vpop.eup %3985  ;;  %v2687_v55 = vmul.f32 0.5, %v2655_v53  ;;  %v2745_v36 = vpack.c.bf16 %v2721_v11, %v2717_v60 }
 0x88e   : > { %v2656_v5 = vadd.f32 1.0, %v3986_v10  ;;  %v2746_v8 = vpack.c.bf16 %v2722_v17, %v2718_v39 }
 0x88f   : > { %v2412_v13 = vpop.f32.mrf.mxu0  ;;  %v2441_v46 = vpop.f32.mrf.mxu1  ;;  %v2719_v25 = vmul.f32 %v2687_v55, %v5092_v19  ;;  %3082 = vmatmul.bf16.gmra.mxu0 %v2745_v36 }
 0x890   : > { %v5125_v18 = vadd.f32 %v2412_v13, %v4976_v59  ;;  %v5128_v47 = vadd.f32 %v2441_v46, %v4978_v48  ;;  %v2688_v27 = vmul.f32 0.5, %v2656_v5  ;;  %3111 = vmatmul.bf16.gmra.mxu1 %v2746_v8 }
 0x891   : > { %v2743_v15 = vpack.c.bf16 %v2719_v25, %v2715_v32 }
 0x892   : > { %v2469_v26 = vmul.f32 %v5125_v18, %v5125_v18  ;;  %v2470_v62 = vmul.f32 %v5128_v47, %v5128_v47  ;;  %v2720_v19 = vmul.f32 %v2688_v27, %v5107_v3 }
 0x893   : > { %3024 = vmatmul.bf16.gmra.mxu2 %v2743_v15 }
 0x894   : > { %v2501_v63 = vmul.f32 %v2469_v26, %v5125_v18  ;;  %v2502_v28 = vmul.f32 %v2470_v62, %v5128_v47  ;;  %v2744_v1 = vpack.c.bf16 %v2720_v19, %v2716_v49  ;;  %v2354_v0 = vpop.f32.mrf.mxu2  ;;  %v2383_v37 = vpop.f32.mrf.mxu3 }
 0x895   : > { %v5139_v40 = vadd.f32 %v2354_v0, %v4990_v24  ;;  %v5142_v21 = vadd.f32 %v2383_v37, %v4992_v50 }
 0x896   : > { %v2533_v30 = vmul.f32 0.044715, %v2501_v63  ;;  %v2534_v43 = vmul.f32 0.044715, %v2502_v28  ;;  %3053 = vmatmul.bf16.gmra.mxu3 %v2744_v1 }
 0x897   : > { %v2467_v6 = vmul.f32 %v5139_v40, %v5139_v40  ;;  %v2468_v3 = vmul.f32 %v5142_v21, %v5142_v21  ;;  %v2414_v31 = vpop.f32.mrf.mxu0  ;;  %v2443_v44 = vpop.f32.mrf.mxu1 }
 0x898   : > { %v2565_v41 = vadd.f32 %v2533_v30, %v5125_v18  ;;  %v2566_v14 = vadd.f32 %v2534_v43, %v5128_v47  ;;  %v5151_v51 = vadd.f32 %v2414_v31, %v4976_v59  ;;  %v5154_v38 = vadd.f32 %v2443_v44, %v4978_v48 }
 0x899   : > { %v2499_v57 = vmul.f32 %v2467_v6, %v5139_v40  ;;  %v2500_v34 = vmul.f32 %v2468_v3, %v5142_v21 }
 0x89a   : > { %v2597_v20 = vmul.f32 0.7978846, %v2565_v41  ;;  %v2598_v4 = vmul.f32 0.7978846, %v2566_v14  ;;  %v2473_v12 = vmul.f32 %v5151_v51, %v5151_v51  ;;  %v2474_v9 = vmul.f32 %v5154_v38, %v5154_v38 }
 0x89b   : > { %v2531_v16 = vmul.f32 0.044715, %v2499_v57  ;;  %v2532_v23 = vmul.f32 0.044715, %v2500_v34 }
 0x89c   : > { %3987 = vtanh.f32 %v2597_v20  ;;  %v2505_v29 = vmul.f32 %v2473_v12, %v5151_v51  ;;  %v2506_v58 = vmul.f32 %v2474_v9, %v5154_v38  ;;  %v2356_v7 = vpop.f32.mrf.mxu2  ;;  %v2385_v53 = vpop.f32.mrf.mxu3 }
 0x89d   : > { %3989 = vtanh.f32 %v2598_v4  ;;  %v2563_v56 = vadd.f32 %v2531_v16, %v5139_v40  ;;  %v2564_v60 = vadd.f32 %v2532_v23, %v5142_v21  ;;  %v5167_v11 = vadd.f32 %v2356_v7, %v4990_v24 }
 0x89e   : > { %v2537_v10 = vmul.f32 0.044715, %v2505_v29  ;;  %v2538_v39 = vmul.f32 0.044715, %v2506_v58  ;;  %v5170_v17 = vadd.f32 %v2385_v53, %v4992_v50 }
 0x89f   : > { %v2595_v55 = vmul.f32 0.7978846, %v2563_v56  ;;  %v2596_v36 = vmul.f32 0.7978846, %v2564_v60  ;;  %v2471_v5 = vmul.f32 %v5167_v11, %v5167_v11  ;;  %v2417_v42 = vpop.f32.mrf.mxu0  ;;  %v2446_v8 = vpop.f32.mrf.mxu1 }
 0x8a0   : > { %v2569_v13 = vadd.f32 %v2537_v10, %v5151_v51  ;;  %v2570_v46 = vadd.f32 %v2538_v39, %v5154_v38  ;;  %v2472_v32 = vmul.f32 %v5170_v17, %v5170_v17  ;;  %v5179_v25 = vadd.f32 %v2417_v42, %v4976_v59 }
 0x8a1   : > { %3991 = vtanh.f32 %v2595_v55  ;;  %v2503_v27 = vmul.f32 %v2471_v5, %v5167_v11  ;;  %v5183_v15 = vadd.f32 %v2446_v8, %v4978_v48 }
 0x8a2   : > { %v3988_v26 = vpop.eup %3987  ;;  %3993 = vtanh.f32 %v2596_v36  ;;  %v2601_v62 = vmul.f32 0.7978846, %v2569_v13  ;;  %v2504_v49 = vmul.f32 %v2472_v32, %v5170_v17  ;;  %v2602_v63 = vmul.f32 0.7978846, %v2570_v46 }
 0x8a3   : > { %v3990_v19 = vpop.eup %3989  ;;  %v2535_v28 = vmul.f32 0.044715, %v2503_v27  ;;  %v2477_v1 = vmul.f32 %v5179_v25, %v5179_v25  ;;  %v2478_v0 = vmul.f32 %v5183_v15, %v5183_v15  ;;  %v2661_v44 = vadd.f32 1.0, %v3988_v26 }
 0x8a4   : > { %3995 = vtanh.f32 %v2601_v62  ;;  %v2536_v37 = vmul.f32 0.044715, %v2504_v49  ;;  %v2359_v30 = vpop.f32.mrf.mxu2  ;;  %v2388_v43 = vpop.f32.mrf.mxu3  ;;  %v2662_v34 = vadd.f32 1.0, %v3990_v19 }
 0x8a5   : > { %v2567_v6 = vadd.f32 %v2535_v28, %v5167_v11  ;;  %v2509_v3 = vmul.f32 %v2477_v1, %v5179_v25  ;;  %v2510_v31 = vmul.f32 %v2478_v0, %v5183_v15  ;;  %v5195_v14 = vadd.f32 %v2359_v30, %v4990_v24 }
 0x8a6   : > { %v2568_v41 = vadd.f32 %v2536_v37, %v5170_v17  ;;  %v5198_v57 = vadd.f32 %v2388_v43, %v4992_v50  ;;  %3997 = vtanh.f32 %v2602_v63  ;;  %v2693_v55 = vmul.f32 0.5, %v2661_v44 }
 0x8a7   : > { %v5200_v20 = vpop.eup %3991  ;;  %v2599_v4 = vmul.f32 0.7978846, %v2567_v6  ;;  %v2541_v12 = vmul.f32 0.044715, %v2509_v3  ;;  %v2542_v9 = vmul.f32 0.044715, %v2510_v31  ;;  %v2419_v16 = vpop.f32.mrf.mxu0  ;;  %v2475_v7 = vmul.f32 %v5195_v14, %v5195_v14 }
 0x8a8   : > { %v2448_v23 = vpop.f32.mrf.mxu1  ;;  %v5202_v29 = vpop.eup %3993  ;;  %v2600_v58 = vmul.f32 0.7978846, %v2568_v41  ;;  %v2476_v53 = vmul.f32 %v5198_v57, %v5198_v57  ;;  %v5209_v56 = vadd.f32 %v2419_v16, %v4976_v59  ;;  %v2725_v0 = vmul.f32 %v2693_v55, %v5125_v18 }
 0x8a9   : > { %v2573_v60 = vadd.f32 %v2541_v12, %v5179_v25  ;;  %v2574_v10 = vadd.f32 %v2542_v9, %v5183_v15  ;;  %v5214_v39 = vadd.f32 %v2448_v23, %v4978_v48  ;;  %3999 = vtanh.f32 %v2599_v4 }
 0x8aa   : > { %v3996_v36 = vpop.eup %3995  ;;  %v2507_v5 = vmul.f32 %v2475_v7, %v5195_v14  ;;  %v2508_v42 = vmul.f32 %v2476_v53, %v5198_v57  ;;  %v2481_v8 = vmul.f32 %v5209_v56, %v5209_v56  ;;  %4001 = vtanh.f32 %v2600_v58 }
 0x8ab   : > { %v2605_v59 = vmul.f32 0.7978846, %v2573_v60  ;;  %v2482_v13 = vmul.f32 %v5214_v39, %v5214_v39  ;;  %v2665_v46 = vadd.f32 1.0, %v3996_v36  ;;  %v2606_v32 = vmul.f32 0.7978846, %v2574_v10 }
 0x8ac   : > { %v2539_v27 = vmul.f32 0.044715, %v2507_v5  ;;  %v2540_v48 = vmul.f32 0.044715, %v2508_v42  ;;  %v2513_v26 = vmul.f32 %v2481_v8, %v5209_v56  ;;  %v2361_v62 = vpop.f32.mrf.mxu2  ;;  %v2390_v49 = vpop.f32.mrf.mxu3  ;;  %v2694_v53 = vmul.f32 0.5, %v2662_v34 }
 0x8ad   : > { %v3998_v19 = vpop.eup %3997  ;;  %v2514_v63 = vmul.f32 %v2482_v13, %v5214_v39  ;;  %v5225_v28 = vadd.f32 %v2361_v62, %v4990_v24  ;;  %v5228_v1 = vadd.f32 %v2390_v49, %v4992_v50  ;;  %4003 = vtanh.f32 %v2605_v59 }
 0x8ae   : > { %v2571_v37 = vadd.f32 %v2539_v27, %v5195_v14  ;;  %v2572_v30 = vadd.f32 %v2540_v48, %v5198_v57  ;;  %v2545_v43 = vmul.f32 0.044715, %v2513_v26  ;;  %v2697_v24 = vmul.f32 0.5, %v2665_v46 }
 0x8af   : > { %v2546_v6 = vmul.f32 0.044715, %v2514_v63  ;;  %v2479_v3 = vmul.f32 %v5225_v28, %v5225_v28  ;;  %v2480_v31 = vmul.f32 %v5228_v1, %v5228_v1  ;;  %v4000_v44 = vpop.eup %3999  ;;  %4005 = vtanh.f32 %v2606_v32 }
 0x8b0   : > { %v2603_v50 = vmul.f32 0.7978846, %v2571_v37  ;;  %v2577_v41 = vadd.f32 %v2545_v43, %v5209_v56  ;;  %v2666_v18 = vadd.f32 1.0, %v3998_v19  ;;  %v4002_v4 = vpop.eup %4001  ;;  %v2729_v23 = vmul.f32 %v2697_v24, %v5151_v51 }
 0x8b1   : > { %v2578_v12 = vadd.f32 %v2546_v6, %v5214_v39  ;;  %v2511_v9 = vmul.f32 %v2479_v3, %v5225_v28  ;;  %v2512_v16 = vmul.f32 %v2480_v31, %v5228_v1  ;;  %v2604_v58 = vmul.f32 0.7978846, %v2572_v30 }
 0x8b2   : > { %v2609_v7 = vmul.f32 0.7978846, %v2577_v41  ;;  %v2698_v60 = vmul.f32 0.5, %v2666_v18  ;;  %4007 = vtanh.f32 %v2603_v50  ;;  %v2749_v42 = vpack.c.bf16 %v2729_v23, %v2725_v0 }
 0x8b3   : > { %v2610_v10 = vmul.f32 0.7978846, %v2578_v12  ;;  %v2543_v55 = vmul.f32 0.044715, %v2511_v9  ;;  %v2544_v36 = vmul.f32 0.044715, %v2512_v16  ;;  %v4004_v5 = vpop.eup %4003  ;;  %v2726_v8 = vmul.f32 %v2694_v53, %v5128_v47 }
 0x8b4   : > { %4009 = vtanh.f32 %v2609_v7  ;;  %v2730_v59 = vmul.f32 %v2698_v60, %v5154_v38  ;;  %v2659_v46 = vadd.f32 1.0, %v5200_v20  ;;  %3087 = vmatmul.bf16.gmra.mxu0 %v2749_v42  ;;  %v2663_v27 = vadd.f32 1.0, %v4000_v44 }
 0x8b5   : > { %4011 = vtanh.f32 %v2610_v10  ;;  %v2575_v13 = vadd.f32 %v2543_v55, %v5225_v28  ;;  %v2576_v51 = vadd.f32 %v2544_v36, %v5228_v1  ;;  %v4006_v34 = vpop.eup %4005  ;;  %v2660_v48 = vadd.f32 1.0, %v5202_v29 }
 0x8b6   : > { %v2750_v32 = vpack.c.bf16 %v2730_v59, %v2726_v8  ;;  %v2664_v26 = vadd.f32 1.0, %v4002_v4  ;;  %4013 = vtanh.f32 %v2604_v58  ;;  %v2691_v47 = vmul.f32 0.5, %v2659_v46 }
 0x8b7   : > { %v2607_v62 = vmul.f32 0.7978846, %v2575_v13  ;;  %v2608_v49 = vmul.f32 0.7978846, %v2576_v51  ;;  %v2695_v38 = vmul.f32 0.5, %v2663_v27  ;;  %v2692_v19 = vmul.f32 0.5, %v2660_v48 }
 0x8b8   : > { %3116 = vmatmul.bf16.gmra.mxu1 %v2750_v32  ;;  %v2696_v63 = vmul.f32 0.5, %v2664_v26  ;;  %v2669_v0 = vadd.f32 1.0, %v4004_v5  ;;  %v4008_v37 = vpop.eup %4007  ;;  %v2723_v20 = vmul.f32 %v2691_v47, %v5139_v40  ;;  %v2670_v30 = vadd.f32 1.0, %v4006_v34 }
 0x8b9   : > { %4015 = vtanh.f32 %v2607_v62  ;;  %v2727_v6 = vmul.f32 %v2695_v38, %v5167_v11  ;;  %v2724_v29 = vmul.f32 %v2692_v19, %v5142_v21  ;;  %v2667_v11 = vadd.f32 1.0, %v4008_v37 }
 0x8ba   : > { %v4010_v43 = vpop.eup %4009  ;;  %4017 = vtanh.f32 %v2608_v49  ;;  %v2728_v3 = vmul.f32 %v2696_v63, %v5170_v17  ;;  %v2701_v41 = vmul.f32 0.5, %v2669_v0  ;;  %v2702_v40 = vmul.f32 0.5, %v2670_v30 }
 0x8bb   : > { %v4012_v31 = vpop.eup %4011  ;;  %v2673_v24 = vadd.f32 1.0, %v4010_v43  ;;  %v2747_v44 = vpack.c.bf16 %v2727_v6, %v2723_v20  ;;  %v2699_v8 = vmul.f32 0.5, %v2667_v11 }
 0x8bc   : > { %v2748_v50 = vpack.c.bf16 %v2728_v3, %v2724_v29  ;;  %v2674_v18 = vadd.f32 1.0, %v4012_v31  ;;  %v4014_v4 = vpop.eup %4013  ;;  %v2733_v21 = vmul.f32 %v2701_v41, %v5179_v25  ;;  %v2734_v55 = vmul.f32 %v2702_v40, %v5183_v15 }
 0x8bd   : > { %v2705_v12 = vmul.f32 0.5, %v2673_v24  ;;  %3029 = vmatmul.bf16.gmra.mxu2 %v2747_v44  ;;  %v2668_v53 = vadd.f32 1.0, %v4014_v4  ;;  %v2731_v25 = vmul.f32 %v2699_v8, %v5195_v14 }
 0x8be   : > { %3058 = vmatmul.bf16.gmra.mxu3 %v2748_v50  ;;  %v2706_v9 = vmul.f32 0.5, %v2674_v18 }
 0x8bf   : > { %v4016_v16 = vpop.eup %4015  ;;  %v2737_v23 = vmul.f32 %v2705_v12, %v5209_v56  ;;  %v2700_v59 = vmul.f32 0.5, %v2668_v53 }
 0x8c0   : > { %v4018_v58 = vpop.eup %4017  ;;  %v2738_v17 = vmul.f32 %v2706_v9, %v5214_v39  ;;  %v2671_v7 = vadd.f32 1.0, %v4016_v16 }
 0x8c1   : > { %v2672_v60 = vadd.f32 1.0, %v4018_v58  ;;  %v2753_v10 = vpack.c.bf16 %v2737_v23, %v2733_v21  ;;  %v2732_v39 = vmul.f32 %v2700_v59, %v5198_v57 }
 0x8c2   : > { %v2703_v36 = vmul.f32 0.5, %v2671_v7  ;;  %v2754_v42 = vpack.c.bf16 %v2738_v17, %v2734_v55 }
 0x8c3   : > { %v2704_v5 = vmul.f32 0.5, %v2672_v60 }
 0x8c4   : > { %3092 = vmatmul.bf16.gmra.mxu0 %v2753_v10  ;;  %v2735_v56 = vmul.f32 %v2703_v36, %v5225_v28  ;;  %v5265_v28 = vld [vmem:[%s603_s21] ss:$0 sm:$0xff] }
 0x8c5   : > { %v2736_v13 = vmul.f32 %v2704_v5, %v5228_v1 }
 0x8c6   : > { %v2751_v51 = vpack.c.bf16 %v2735_v56, %v2731_v25 }
 0x8c7   : > { %v2752_v46 = vpack.c.bf16 %v2736_v13, %v2732_v39 }
 0x8c8   : > { %3121 = vmatmul.bf16.gmra.mxu1 %v2754_v42 }
 0x8cd   : > { %3034 = vmatmul.bf16.gmra.mxu2 %v2751_v51 }
 0x8ce   : > { %3063 = vmatmul.bf16.gmra.mxu3 %v2752_v46 }
 0x8f7   : > { %v3078_v34 = vpop.f32.mrf.mxu0 }
 0x8f8   : > { %v3107_v48 = vpop.f32.mrf.mxu1 }
 0x8ff   : > { %v3080_v38 = vpop.f32.mrf.mxu0 }
 0x900   : > { %v3109_v63 = vpop.f32.mrf.mxu1 }
 0x902   : > { %v3020_v15 = vpop.f32.mrf.mxu2 }
 0x903   : > { %v3049_v32 = vpop.f32.mrf.mxu3 }
 0x904   : > { %v3050_v27 = vadd.f32 %v3049_v32, %v3020_v15 }
 0x906   : > { %v3079_v26 = vadd.f32 %v3078_v34, %v3050_v27 }
 0x908   : > { %v3108_v62 = vadd.f32 %v3107_v48, %v3079_v26 }
 0x90a   : > { %v3127_v14 = vadd.f32 %v3108_v62, %v4754_v22  ;;  %v3022_v57 = vpop.f32.mrf.mxu2 }
 0x90b   : > { %v3051_v1 = vpop.f32.mrf.mxu3 }
 0x90c   : > { %v3139_v49 = vadd.f32 %v5265_v28, %v3127_v14  ;;  %v3052_v47 = vadd.f32 %v3051_v1, %v3022_v57  ;;  %v3083_v30 = vpop.f32.mrf.mxu0 }
 0x90d   : > { %v3112_v29 = vpop.f32.mrf.mxu1 }
 0x90e   : > { %3147 = vst [vmem:[%s5323_s13] sm:$0xff] %v3139_v49  ;;  %v3081_v19 = vadd.f32 %v3080_v38, %v3052_v47 }
 0x910   : > { %v3110_v0 = vadd.f32 %v3109_v63, %v3081_v19 }
 0x912   : > { %v3128_v37 = vadd.f32 %v3110_v0, %v4760_v45 }
 0x914   : > { %v3140_v20 = vadd.f32 %v5265_v28, %v3128_v37  ;;  %v3085_v18 = vpop.f32.mrf.mxu0 }
 0x915   : > { %v3114_v12 = vpop.f32.mrf.mxu1 }
 0x916   : > { %3148 = vst [vmem:[%s5323_s13 + $0x8] sm:$0xff] %v3140_v20  ;;  %v3025_v22 = vpop.f32.mrf.mxu2 }
 0x919   : > { %v3054_v43 = vpop.f32.mrf.mxu3 }
 0x91a   : > { %v3055_v6 = vadd.f32 %v3054_v43, %v3025_v22 }
 0x91c   : > { %v3084_v3 = vadd.f32 %v3083_v30, %v3055_v6 }
 0x91e   : > { %v3113_v31 = vadd.f32 %v3112_v29, %v3084_v3  ;;  %v3027_v24 = vpop.f32.mrf.mxu2 }
 0x920   : > { %v3129_v44 = vadd.f32 %v3113_v31, %v4766_v35 }
 0x921   : > { %v3056_v50 = vpop.f32.mrf.mxu3 }
 0x922   : > { %v3141_v41 = vadd.f32 %v5265_v28, %v3129_v44  ;;  %v3057_v45 = vadd.f32 %v3056_v50, %v3027_v24 }
 0x924   : > { %3149 = vst [vmem:[%s5323_s13 + $0x10] sm:$0xff] %v3141_v41  ;;  %v3086_v4 = vadd.f32 %v3085_v18, %v3057_v45 }
 0x926   : > { %v3115_v40 = vadd.f32 %v3114_v12, %v3086_v4 }
 0x928   : > { %v3130_v9 = vadd.f32 %v3115_v40, %v4772_v52 }
 0x92a   : > { %v3142_v16 = vadd.f32 %v5265_v28, %v3130_v9 }
 0x92c   : > { %3150 = vst [vmem:[%s5323_s13 + $0x18] sm:$0xff] %v3142_v16 }
 0x931   : > { %v3088_v35 = vpop.f32.mrf.mxu0 }
 0x935   : > { %v3117_v23 = vpop.f32.mrf.mxu1 }
 0x939   : > { %v3090_v7 = vpop.f32.mrf.mxu0 }
 0x93d   : > { %v3119_v60 = vpop.f32.mrf.mxu1 }
 0x940   : > { %v3030_v11 = vpop.f32.mrf.mxu2 }
 0x941   : > { %v3059_v58 = vpop.f32.mrf.mxu3  ;;  %v3093_v59 = vpop.f32.mrf.mxu0 }
 0x942   : > { %v3060_v21 = vadd.f32 %v3059_v58, %v3030_v11 }
 0x944   : > { %v3089_v17 = vadd.f32 %v3088_v35, %v3060_v21 }
 0x946   : > { %v3118_v53 = vadd.f32 %v3117_v23, %v3089_v17 }
 0x948   : > { %v3131_v10 = vadd.f32 %v3118_v53, %v4778_v33  ;;  %v3032_v55 = vpop.f32.mrf.mxu2  ;;  %v3122_v33 = vpop.f32.mrf.mxu1 }
 0x949   : > { %v3061_v36 = vpop.f32.mrf.mxu3 }
 0x94a   : > { %v3143_v52 = vadd.f32 %v5265_v28, %v3131_v10  ;;  %v3062_v5 = vadd.f32 %v3061_v36, %v3032_v55 }
 0x94c   : > { %3151 = vst [vmem:[%s5323_s13 + $0x20] sm:$0xff] %v3143_v52  ;;  %v3091_v42 = vadd.f32 %v3090_v7, %v3062_v5 }
 0x94e   : > { %v3120_v8 = vadd.f32 %v3119_v60, %v3091_v42 }
 0x950   : > { %v3132_v56 = vadd.f32 %v3120_v8, %v4784_v54  ;;  %v3035_v13 = vpop.f32.mrf.mxu2  ;;  %v3095_v54 = vpop.f32.mrf.mxu0 }
 0x951   : > { %v3064_v25 = vpop.f32.mrf.mxu3  ;;  %v3124_v14 = vpop.f32.mrf.mxu1 }
 0x952   : > { %v3144_v39 = vadd.f32 %v5265_v28, %v3132_v56  ;;  %v3065_v51 = vadd.f32 %v3064_v25, %v3035_v13 }
 0x954   : > { %3152 = vst [vmem:[%s5323_s13 + $0x28] sm:$0xff] %v3144_v39  ;;  %v3094_v46 = vadd.f32 %v3093_v59, %v3065_v51 }
 0x956   : > { %v3123_v15 = vadd.f32 %v3122_v33, %v3094_v46 }
 0x958   : > { %v3133_v34 = vadd.f32 %v3123_v15, %v4790_v61  ;;  %v3037_v32 = vpop.f32.mrf.mxu2 }
 0x959   : > { %v3066_v27 = vpop.f32.mrf.mxu3 }
 0x95a   : > { %v3145_v48 = vadd.f32 %v5265_v28, %v3133_v34  ;;  %v3067_v26 = vadd.f32 %v3066_v27, %v3037_v32 }
 0x95c   : > { %3153 = vst [vmem:[%s5323_s13 + $0x30] sm:$0xff] %v3145_v48  ;;  %v3096_v62 = vadd.f32 %v3095_v54, %v3067_v26 }
 0x95e   : > { %v3125_v57 = vadd.f32 %v3124_v14, %v3096_v62 }
 0x960   : > { %v3134_v1 = vadd.f32 %v3125_v57, %v4796_v2 }
 0x962   : > { %v3146_v49 = vadd.f32 %v5265_v28, %v3134_v1 }
 0x964   : > { %3154 = vst [vmem:[%s5323_s13 + $0x38] sm:$0xff] %v3146_v49 }
 0x965 PF: > { %s5347_s29 = sld [smem:[#allocation2_spill]] }
 0x96b   : > { %s23_s25 = sadd.s32 1, %s5347_s29  }
 0x96c   : > { %p20_p5 = scmp.ge.s32.totalorder %s23_s25, 4  }
 0x96e   :  { %22 = sbr.rel (!%p20_p5) target bundleno = 5 (0x5), region = 135 }

</bundles_post_ra>
